<compile_context>
chip_gen: v6e
topology: v6e:2x2x1
jax: 0.10.0
libtpu: 0.0.40
codegen_flags: <defaults>
</compile_context>

<pallas_src>
import jax
import jax.numpy as jnp
from jax import lax
from jax.experimental import pallas as pl
from jax.experimental.pallas import tpu as pltpu

EPS = 1e-5


# ---------------------------------------------------------------------------
# Fused bottleneck kernel (one grid step == one image)
# ---------------------------------------------------------------------------
def _bottleneck_kernel(xp_ref, w1_ref, b1_ref, w2_ref, b2_ref, w3_ref, b3_ref,
                       o_ref, o1p_ref):
    # xp_ref : (1, H+2, W+2, Cin)  f32   input with 1-pixel spatial halo
    # w1_ref : (Cin, P)            bf16  conv1 weight (bn1 scale folded in)
    # w2_ref : (9, P, P)           bf16  conv2 weight (bn2 scale folded in)
    # w3_ref : (P, C3)             bf16  conv3 weight (bn3 scale folded in)
    # b*_ref : (1, *)              f32   folded BN biases
    # o_ref  : (1, H, W, C3)       f32   block output
    # o1p_ref: (H+2, W+2, P)       bf16  VMEM scratch: zero-bordered conv1 out
    _, Hp, Wp, Cin = xp_ref.shape
    H, W = Hp - 2, Wp - 2
    P = w1_ref.shape[1]
    C3 = w3_ref.shape[1]
    Mp = Hp * Wp
    M = H * W

    xp = xp_ref[...]                                            # (1,Hp,Wp,Cin)

    # --- conv1 (1x1) + bn1 + relu, computed on the padded grid --------------
    y1 = jnp.dot(xp.reshape(Mp, Cin).astype(jnp.bfloat16), w1_ref[...],
                 preferred_element_type=jnp.float32)
    y1 = jnp.maximum(y1 + b1_ref[...], 0.0).reshape(Hp, Wp, P)

    # Zero the 1-pixel border (== conv2 "same" zero padding) and stage the
    # result with a single full-block (aligned) store into bf16 VMEM scratch.
    hh = lax.broadcasted_iota(jnp.int32, (Hp, Wp, 1), 0)
    ww = lax.broadcasted_iota(jnp.int32, (Hp, Wp, 1), 1)
    interior = (hh > 0) & (hh < Hp - 1) & (ww > 0) & (ww < Wp - 1)
    o1p_ref[...] = jnp.where(interior, y1, 0.0).astype(jnp.bfloat16)

    # --- conv2 (3x3, pad=1) + bn2 + relu: 9 accumulated MXU dots -------------
    acc = jnp.broadcast_to(b2_ref[...], (M, P)).astype(jnp.float32)
    for ky in range(3):
        for kx in range(3):
            patch = o1p_ref[ky:ky + H, kx:kx + W, :].reshape(M, P)
            acc = acc + jnp.dot(patch, w2_ref[ky * 3 + kx],
                                preferred_element_type=jnp.float32)
    y2 = jnp.maximum(acc, 0.0)

    # --- conv3 (1x1) + bn3 + residual + relu ---------------------------------
    resid = xp[:, 1:H + 1, 1:W + 1, :].reshape(M, Cin)          # the input x
    y3 = jnp.dot(y2.astype(jnp.bfloat16), w3_ref[...],
                 preferred_element_type=jnp.float32)
    y3 = y3 + b3_ref[...] + resid
    o_ref[...] = jnp.maximum(y3, 0.0).reshape(1, H, W, C3)


# ---------------------------------------------------------------------------
# Wrapper: BN folding, weight layout, pallas_call
# ---------------------------------------------------------------------------
def _fold_bn(gamma, beta, mean, var):
    scale = gamma / jnp.sqrt(var + EPS)
    bias = beta - mean * scale
    return scale, bias


def bottleneck_forward(x_nchw, params):
    N, Cin, H, W = x_nchw.shape
    P = params["w1"].shape[0]                     # planes
    C3 = params["w3"].shape[0]                    # planes * expansion
    assert Cin == C3, "no-downsample path requires in_planes == planes*expansion"

    s1, b1 = _fold_bn(*params["bn1"])
    s2, b2 = _fold_bn(*params["bn2"])
    s3, b3 = _fold_bn(*params["bn3"])

    # Fold BN scales into conv weights; bf16 matmul operands.
    w1 = (params["w1"][:, :, 0, 0].T * s1[None, :]).astype(jnp.bfloat16)      # (Cin,P)
    w2 = jnp.transpose(params["w2"], (2, 3, 1, 0)) * s2[None, None, None, :]  # (3,3,P,P)
    w2 = w2.reshape(9, P, P).astype(jnp.bfloat16)
    w3 = (params["w3"][:, :, 0, 0].T * s3[None, :]).astype(jnp.bfloat16)      # (P,C3)
    b1 = b1.reshape(1, P).astype(jnp.float32)
    b2 = b2.reshape(1, P).astype(jnp.float32)
    b3 = b3.reshape(1, C3).astype(jnp.float32)

    # NCHW -> NHWC with a 1-pixel halo; the pad fuses into the transpose copy.
    xp = jnp.pad(jnp.transpose(x_nchw, (0, 2, 3, 1)),
                 ((0, 0), (1, 1), (1, 1), (0, 0)))

    out_nhwc = pl.pallas_call(
        _bottleneck_kernel,
        out_shape=jax.ShapeDtypeStruct((N, H, W, C3), jnp.float32),
        grid=(N,),
        in_specs=[
            pl.BlockSpec((1, H + 2, W + 2, Cin), lambda n: (n, 0, 0, 0)),
            pl.BlockSpec((Cin, P), lambda n: (0, 0)),
            pl.BlockSpec((1, P), lambda n: (0, 0)),
            pl.BlockSpec((9, P, P), lambda n: (0, 0, 0)),
            pl.BlockSpec((1, P), lambda n: (0, 0)),
            pl.BlockSpec((P, C3), lambda n: (0, 0)),
            pl.BlockSpec((1, C3), lambda n: (0, 0)),
        ],
        out_specs=pl.BlockSpec((1, H, W, C3), lambda n: (n, 0, 0, 0)),
        scratch_shapes=[pltpu.VMEM((H + 2, W + 2, P), jnp.bfloat16)],
        compiler_params=pltpu.CompilerParams(
            dimension_semantics=("parallel",),
            vmem_limit_bytes=48 * 1024 * 1024,
        ),
    )(xp, w1, b1, w2, b2, w3, b3)

    return jnp.transpose(out_nhwc, (0, 3, 1, 2))


# ---------------------------------------------------------------------------
# Pure-JAX f32 reference (correctness check only)
# ---------------------------------------------------------------------------
def bottleneck_ref(x, params):
    def bn(y, g, bt, m, v):
        return (y - m[None, :, None, None]) / jnp.sqrt(v + EPS)[None, :, None, None] \
            * g[None, :, None, None] + bt[None, :, None, None]

    dn = ("NCHW", "OIHW", "NCHW")
    out = lax.conv_general_dilated(x, params["w1"], (1, 1), "VALID",
                                   dimension_numbers=dn)
    out = jnp.maximum(bn(out, *params["bn1"]), 0.0)
    out = lax.conv_general_dilated(out, params["w2"], (1, 1),
                                   [(1, 1), (1, 1)], dimension_numbers=dn)
    out = jnp.maximum(bn(out, *params["bn2"]), 0.0)
    out = lax.conv_general_dilated(out, params["w3"], (1, 1), "VALID",
                                   dimension_numbers=dn)
    out = bn(out, *params["bn3"])
    return jnp.maximum(out + x, 0.0)


# ---------------------------------------------------------------------------
def make_params(key, in_planes, planes):
    exp = 4
    ks = jax.random.split(key, 3)

    def bn_params(c):
        a = jnp.arange(c, dtype=jnp.float32)
        gamma = 1.0 + 0.01 * a
        beta = 0.02 * a - 0.01
        mean = 0.03 * a
        var = 1.0 + 0.05 * a
        return (gamma, beta, mean, var)

    return {
        "w1": 0.1 * jax.random.normal(ks[0], (planes, in_planes, 1, 1), jnp.float32),
        "w2": 0.1 * jax.random.normal(ks[1], (planes, planes, 3, 3), jnp.float32),
        "w3": 0.1 * jax.random.normal(ks[2], (planes * exp, planes, 1, 1), jnp.float32),
        "bn1": bn_params(planes),
        "bn2": bn_params(planes),
        "bn3": bn_params(planes * exp),
    }


if __name__ == "__main__":
    # Small shapes: residual add requires in_planes == planes * expansion.
    N, H, W = 2, 16, 16
    planes = 4
    in_planes = planes * 4  # 16

    key = jax.random.PRNGKey(0)
    kx, kp = jax.random.split(key)
    x = jax.random.normal(kx, (N, in_planes, H, W), jnp.float32)
    params = make_params(kp, in_planes, planes)

    fwd = jax.jit(bottleneck_forward)
    out = jax.block_until_ready(fwd(x, params))

    ref = bottleneck_ref(x, params)
    assert out.shape == ref.shape == (N, in_planes, H, W)
    max_err = float(jnp.max(jnp.abs(out - ref)))
    # bf16 MXU operands vs. pure-f32 reference -> relaxed tolerance.
    assert jnp.allclose(out, ref, atol=2e-2, rtol=2e-2), max_err

    print("KERNEL_OK")
</pallas_src>

<mosaic_0001>
module attributes {stable_mosaic.version = 11 : i64} {
  func.func @_bottleneck_kernel(%arg0: i32, %arg1: memref<1x18x18x16xf32, #tpu.memory_space<vmem>>, %arg2: memref<16x4xbf16, #tpu.memory_space<vmem>>, %arg3: memref<1x4xf32, #tpu.memory_space<vmem>>, %arg4: memref<9x4x4xbf16, #tpu.memory_space<vmem>>, %arg5: memref<1x4xf32, #tpu.memory_space<vmem>>, %arg6: memref<4x16xbf16, #tpu.memory_space<vmem>>, %arg7: memref<1x16xf32, #tpu.memory_space<vmem>>, %arg8: memref<1x16x16x16xf32, #tpu.memory_space<vmem>>, %arg9: memref<18x18x4xbf16, #tpu.memory_space<vmem>>) attributes {dimension_semantics = [#tpu.dimension_semantics<parallel>], iteration_bounds = array<i64: 2>, scalar_prefetch = 0 : i64, scratch_operands = 1 : i64, tpu.core_type = #tpu.core_type<tc>, window_params = [{transform_indices = @transform_0, window_bounds = array<i64: 1, 18, 18, 16>}, {pipeline_mode = #tpu.pipeline_mode<synchronous>, transform_indices = @transform_1, window_bounds = array<i64: 16, 4>}, {pipeline_mode = #tpu.pipeline_mode<synchronous>, transform_indices = @transform_2, window_bounds = array<i64: 1, 4>}, {pipeline_mode = #tpu.pipeline_mode<synchronous>, transform_indices = @transform_3, window_bounds = array<i64: 9, 4, 4>}, {pipeline_mode = #tpu.pipeline_mode<synchronous>, transform_indices = @transform_4, window_bounds = array<i64: 1, 4>}, {pipeline_mode = #tpu.pipeline_mode<synchronous>, transform_indices = @transform_5, window_bounds = array<i64: 4, 16>}, {pipeline_mode = #tpu.pipeline_mode<synchronous>, transform_indices = @transform_6, window_bounds = array<i64: 1, 16>}, {transform_indices = @transform_7, window_bounds = array<i64: 1, 16, 16, 16>}]} {
    %c0 = arith.constant 0 : index
    %c0_0 = arith.constant 0 : index
    %c0_1 = arith.constant 0 : index
    %c0_2 = arith.constant 0 : index
    %0 = vector.load %arg1[%c0, %c0_0, %c0_1, %c0_2] : memref<1x18x18x16xf32, #tpu.memory_space<vmem>>, vector<1x18x18x16xf32>
    %1 = vector.shape_cast %0 : vector<1x18x18x16xf32> to vector<324x16xf32>
    %2 = arith.truncf %1 : vector<324x16xf32> to vector<324x16xbf16>
    %c0_3 = arith.constant 0 : index
    %c0_4 = arith.constant 0 : index
    %3 = vector.load %arg2[%c0_3, %c0_4] : memref<16x4xbf16, #tpu.memory_space<vmem>>, vector<16x4xbf16>
    %cst = arith.constant dense<0.000000e+00> : vector<324x4xf32>
    %4 = tpu.matmul %2, %3, %cst {dimension_numbers = #tpu.dot_dimension_numbers<[1], [0], [0], [1], [0, 0, 1, 1], [], []>} : vector<324x16xbf16>, vector<16x4xbf16>, vector<324x4xf32> -> vector<324x4xf32>
    %c0_5 = arith.constant 0 : index
    %c0_6 = arith.constant 0 : index
    %5 = vector.load %arg3[%c0_5, %c0_6] : memref<1x4xf32, #tpu.memory_space<vmem>>, vector<1x4xf32>
    %6 = vector.broadcast %5 : vector<1x4xf32> to vector<324x4xf32>
    %7 = arith.addf %4, %6 : vector<324x4xf32>
    %cst_7 = arith.constant 0.000000e+00 : f32
    %8 = vector.broadcast %cst_7 : f32 to vector<324x4xf32>
    %9 = arith.maximumf %7, %8 : vector<324x4xf32>
    %10 = vector.shape_cast %9 : vector<324x4xf32> to vector<18x18x4xf32>
    %11 = tpu.iota {dimensions = array<i32: 0>} : vector<18x18x1xi32>
    %12 = tpu.iota {dimensions = array<i32: 1>} : vector<18x18x1xi32>
    %c0_i32 = arith.constant 0 : i32
    %13 = vector.broadcast %c0_i32 : i32 to vector<18x18x1xi32>
    %14 = arith.cmpi sgt, %11, %13 : vector<18x18x1xi32>
    %c17_i32 = arith.constant 17 : i32
    %15 = vector.broadcast %c17_i32 : i32 to vector<18x18x1xi32>
    %16 = arith.cmpi slt, %11, %15 : vector<18x18x1xi32>
    %17 = arith.andi %14, %16 : vector<18x18x1xi1>
    %c0_i32_8 = arith.constant 0 : i32
    %18 = vector.broadcast %c0_i32_8 : i32 to vector<18x18x1xi32>
    %19 = arith.cmpi sgt, %12, %18 : vector<18x18x1xi32>
    %20 = arith.andi %17, %19 : vector<18x18x1xi1>
    %c17_i32_9 = arith.constant 17 : i32
    %21 = vector.broadcast %c17_i32_9 : i32 to vector<18x18x1xi32>
    %22 = arith.cmpi slt, %12, %21 : vector<18x18x1xi32>
    %23 = arith.andi %20, %22 : vector<18x18x1xi1>
    %cst_10 = arith.constant 0.000000e+00 : f32
    %24 = vector.shape_cast %23 : vector<18x18x1xi1> to vector<18x18x1xi1>
    %25 = vector.broadcast %24 : vector<18x18x1xi1> to vector<18x18x4xi1>
    %26 = vector.broadcast %cst_10 : f32 to vector<18x18x4xf32>
    %27 = arith.select %25, %10, %26 : vector<18x18x4xi1>, vector<18x18x4xf32>
    %28 = arith.truncf %27 : vector<18x18x4xf32> to vector<18x18x4xbf16>
    %c0_11 = arith.constant 0 : index
    %c0_12 = arith.constant 0 : index
    %c0_13 = arith.constant 0 : index
    %29 = vector.load %arg9[%c0_11, %c0_12, %c0_13] : memref<18x18x4xbf16, #tpu.memory_space<vmem>>, vector<18x18x4xbf16>
    tpu.vector_store %arg9[%c0_11, %c0_12, %c0_13], %28 {strides = array<i32>} : memref<18x18x4xbf16, #tpu.memory_space<vmem>>, vector<18x18x4xbf16>,
    %c0_14 = arith.constant 0 : index
    %c0_15 = arith.constant 0 : index
    %30 = vector.load %arg5[%c0_14, %c0_15] : memref<1x4xf32, #tpu.memory_space<vmem>>, vector<1x4xf32>
    %31 = vector.shape_cast %30 : vector<1x4xf32> to vector<1x4xf32>
    %32 = vector.broadcast %31 : vector<1x4xf32> to vector<256x4xf32>
    %c0_16 = arith.constant 0 : index
    %c0_17 = arith.constant 0 : index
    %c0_18 = arith.constant 0 : index
    %33 = vector.load %arg9[%c0_16, %c0_17, %c0_18] : memref<18x18x4xbf16, #tpu.memory_space<vmem>>, vector<16x16x4xbf16>
    %34 = vector.shape_cast %33 : vector<16x16x4xbf16> to vector<256x4xbf16>
    %c0_19 = arith.constant 0 : index
    %c0_20 = arith.constant 0 : index
    %c0_21 = arith.constant 0 : index
    %35 = vector.load %arg4[%c0_19, %c0_20, %c0_21] : memref<9x4x4xbf16, #tpu.memory_space<vmem>>, vector<1x4x4xbf16>
    %36 = vector.shape_cast %35 : vector<1x4x4xbf16> to vector<4x4xbf16>
    %cst_22 = arith.constant dense<0.000000e+00> : vector<256x4xf32>
    %37 = tpu.matmul %34, %36, %cst_22 {dimension_numbers = #tpu.dot_dimension_numbers<[1], [0], [0], [1], [0, 0, 1, 1], [], []>} : vector<256x4xbf16>, vector<4x4xbf16>, vector<256x4xf32> -> vector<256x4xf32>
    %38 = arith.addf %32, %37 : vector<256x4xf32>
    %c0_23 = arith.constant 0 : index
    %c1 = arith.constant 1 : index
    %c0_24 = arith.constant 0 : index
    %39 = vector.load %arg9[%c0_23, %c1, %c0_24] : memref<18x18x4xbf16, #tpu.memory_space<vmem>>, vector<16x16x4xbf16>
    %40 = vector.shape_cast %39 : vector<16x16x4xbf16> to vector<256x4xbf16>
    %c1_25 = arith.constant 1 : index
    %c0_26 = arith.constant 0 : index
    %c0_27 = arith.constant 0 : index
    %41 = vector.load %arg4[%c1_25, %c0_26, %c0_27] : memref<9x4x4xbf16, #tpu.memory_space<vmem>>, vector<1x4x4xbf16>
    %42 = vector.shape_cast %41 : vector<1x4x4xbf16> to vector<4x4xbf16>
    %cst_28 = arith.constant dense<0.000000e+00> : vector<256x4xf32>
    %43 = tpu.matmul %40, %42, %cst_28 {dimension_numbers = #tpu.dot_dimension_numbers<[1], [0], [0], [1], [0, 0, 1, 1], [], []>} : vector<256x4xbf16>, vector<4x4xbf16>, vector<256x4xf32> -> vector<256x4xf32>
    %44 = arith.addf %38, %43 : vector<256x4xf32>
    %c0_29 = arith.constant 0 : index
    %c2 = arith.constant 2 : index
    %c0_30 = arith.constant 0 : index
    %45 = vector.load %arg9[%c0_29, %c2, %c0_30] : memref<18x18x4xbf16, #tpu.memory_space<vmem>>, vector<16x16x4xbf16>
    %46 = vector.shape_cast %45 : vector<16x16x4xbf16> to vector<256x4xbf16>
    %c2_31 = arith.constant 2 : index
    %c0_32 = arith.constant 0 : index
    %c0_33 = arith.constant 0 : index
    %47 = vector.load %arg4[%c2_31, %c0_32, %c0_33] : memref<9x4x4xbf16, #tpu.memory_space<vmem>>, vector<1x4x4xbf16>
    %48 = vector.shape_cast %47 : vector<1x4x4xbf16> to vector<4x4xbf16>
    %cst_34 = arith.constant dense<0.000000e+00> : vector<256x4xf32>
    %49 = tpu.matmul %46, %48, %cst_34 {dimension_numbers = #tpu.dot_dimension_numbers<[1], [0], [0], [1], [0, 0, 1, 1], [], []>} : vector<256x4xbf16>, vector<4x4xbf16>, vector<256x4xf32> -> vector<256x4xf32>
    %50 = arith.addf %44, %49 : vector<256x4xf32>
    %c1_35 = arith.constant 1 : index
    %c0_36 = arith.constant 0 : index
    %c0_37 = arith.constant 0 : index
    %51 = vector.load %arg9[%c1_35, %c0_36, %c0_37] : memref<18x18x4xbf16, #tpu.memory_space<vmem>>, vector<16x16x4xbf16>
    %52 = vector.shape_cast %51 : vector<16x16x4xbf16> to vector<256x4xbf16>
    %c3 = arith.constant 3 : index
    %c0_38 = arith.constant 0 : index
    %c0_39 = arith.constant 0 : index
    %53 = vector.load %arg4[%c3, %c0_38, %c0_39] : memref<9x4x4xbf16, #tpu.memory_space<vmem>>, vector<1x4x4xbf16>
    %54 = vector.shape_cast %53 : vector<1x4x4xbf16> to vector<4x4xbf16>
    %cst_40 = arith.constant dense<0.000000e+00> : vector<256x4xf32>
    %55 = tpu.matmul %52, %54, %cst_40 {dimension_numbers = #tpu.dot_dimension_numbers<[1], [0], [0], [1], [0, 0, 1, 1], [], []>} : vector<256x4xbf16>, vector<4x4xbf16>, vector<256x4xf32> -> vector<256x4xf32>
    %56 = arith.addf %50, %55 : vector<256x4xf32>
    %c1_41 = arith.constant 1 : index
    %c1_42 = arith.constant 1 : index
    %c0_43 = arith.constant 0 : index
    %57 = vector.load %arg9[%c1_41, %c1_42, %c0_43] : memref<18x18x4xbf16, #tpu.memory_space<vmem>>, vector<16x16x4xbf16>
    %58 = vector.shape_cast %57 : vector<16x16x4xbf16> to vector<256x4xbf16>
    %c4 = arith.constant 4 : index
    %c0_44 = arith.constant 0 : index
    %c0_45 = arith.constant 0 : index
    %59 = vector.load %arg4[%c4, %c0_44, %c0_45] : memref<9x4x4xbf16, #tpu.memory_space<vmem>>, vector<1x4x4xbf16>
    %60 = vector.shape_cast %59 : vector<1x4x4xbf16> to vector<4x4xbf16>
    %cst_46 = arith.constant dense<0.000000e+00> : vector<256x4xf32>
    %61 = tpu.matmul %58, %60, %cst_46 {dimension_numbers = #tpu.dot_dimension_numbers<[1], [0], [0], [1], [0, 0, 1, 1], [], []>} : vector<256x4xbf16>, vector<4x4xbf16>, vector<256x4xf32> -> vector<256x4xf32>
    %62 = arith.addf %56, %61 : vector<256x4xf32>
    %c1_47 = arith.constant 1 : index
    %c2_48 = arith.constant 2 : index
    %c0_49 = arith.constant 0 : index
    %63 = vector.load %arg9[%c1_47, %c2_48, %c0_49] : memref<18x18x4xbf16, #tpu.memory_space<vmem>>, vector<16x16x4xbf16>
    %64 = vector.shape_cast %63 : vector<16x16x4xbf16> to vector<256x4xbf16>
    %c5 = arith.constant 5 : index
    %c0_50 = arith.constant 0 : index
    %c0_51 = arith.constant 0 : index
    %65 = vector.load %arg4[%c5, %c0_50, %c0_51] : memref<9x4x4xbf16, #tpu.memory_space<vmem>>, vector<1x4x4xbf16>
    %66 = vector.shape_cast %65 : vector<1x4x4xbf16> to vector<4x4xbf16>
    %cst_52 = arith.constant dense<0.000000e+00> : vector<256x4xf32>
    %67 = tpu.matmul %64, %66, %cst_52 {dimension_numbers = #tpu.dot_dimension_numbers<[1], [0], [0], [1], [0, 0, 1, 1], [], []>} : vector<256x4xbf16>, vector<4x4xbf16>, vector<256x4xf32> -> vector<256x4xf32>
    %68 = arith.addf %62, %67 : vector<256x4xf32>
    %c2_53 = arith.constant 2 : index
    %c0_54 = arith.constant 0 : index
    %c0_55 = arith.constant 0 : index
    %69 = vector.load %arg9[%c2_53, %c0_54, %c0_55] : memref<18x18x4xbf16, #tpu.memory_space<vmem>>, vector<16x16x4xbf16>
    %70 = vector.shape_cast %69 : vector<16x16x4xbf16> to vector<256x4xbf16>
    %c6 = arith.constant 6 : index
    %c0_56 = arith.constant 0 : index
    %c0_57 = arith.constant 0 : index
    %71 = vector.load %arg4[%c6, %c0_56, %c0_57] : memref<9x4x4xbf16, #tpu.memory_space<vmem>>, vector<1x4x4xbf16>
    %72 = vector.shape_cast %71 : vector<1x4x4xbf16> to vector<4x4xbf16>
    %cst_58 = arith.constant dense<0.000000e+00> : vector<256x4xf32>
    %73 = tpu.matmul %70, %72, %cst_58 {dimension_numbers = #tpu.dot_dimension_numbers<[1], [0], [0], [1], [0, 0, 1, 1], [], []>} : vector<256x4xbf16>, vector<4x4xbf16>, vector<256x4xf32> -> vector<256x4xf32>
    %74 = arith.addf %68, %73 : vector<256x4xf32>
    %c2_59 = arith.constant 2 : index
    %c1_60 = arith.constant 1 : index
    %c0_61 = arith.constant 0 : index
    %75 = vector.load %arg9[%c2_59, %c1_60, %c0_61] : memref<18x18x4xbf16, #tpu.memory_space<vmem>>, vector<16x16x4xbf16>
    %76 = vector.shape_cast %75 : vector<16x16x4xbf16> to vector<256x4xbf16>
    %c7 = arith.constant 7 : index
    %c0_62 = arith.constant 0 : index
    %c0_63 = arith.constant 0 : index
    %77 = vector.load %arg4[%c7, %c0_62, %c0_63] : memref<9x4x4xbf16, #tpu.memory_space<vmem>>, vector<1x4x4xbf16>
    %78 = vector.shape_cast %77 : vector<1x4x4xbf16> to vector<4x4xbf16>
    %cst_64 = arith.constant dense<0.000000e+00> : vector<256x4xf32>
    %79 = tpu.matmul %76, %78, %cst_64 {dimension_numbers = #tpu.dot_dimension_numbers<[1], [0], [0], [1], [0, 0, 1, 1], [], []>} : vector<256x4xbf16>, vector<4x4xbf16>, vector<256x4xf32> -> vector<256x4xf32>
    %80 = arith.addf %74, %79 : vector<256x4xf32>
    %c2_65 = arith.constant 2 : index
    %c2_66 = arith.constant 2 : index
    %c0_67 = arith.constant 0 : index
    %81 = vector.load %arg9[%c2_65, %c2_66, %c0_67] : memref<18x18x4xbf16, #tpu.memory_space<vmem>>, vector<16x16x4xbf16>
    %82 = vector.shape_cast %81 : vector<16x16x4xbf16> to vector<256x4xbf16>
    %c8 = arith.constant 8 : index
    %c0_68 = arith.constant 0 : index
    %c0_69 = arith.constant 0 : index
    %83 = vector.load %arg4[%c8, %c0_68, %c0_69] : memref<9x4x4xbf16, #tpu.memory_space<vmem>>, vector<1x4x4xbf16>
    %84 = vector.shape_cast %83 : vector<1x4x4xbf16> to vector<4x4xbf16>
    %cst_70 = arith.constant dense<0.000000e+00> : vector<256x4xf32>
    %85 = tpu.matmul %82, %84, %cst_70 {dimension_numbers = #tpu.dot_dimension_numbers<[1], [0], [0], [1], [0, 0, 1, 1], [], []>} : vector<256x4xbf16>, vector<4x4xbf16>, vector<256x4xf32> -> vector<256x4xf32>
    %86 = arith.addf %80, %85 : vector<256x4xf32>
    %cst_71 = arith.constant 0.000000e+00 : f32
    %87 = vector.broadcast %cst_71 : f32 to vector<256x4xf32>
    %88 = arith.maximumf %86, %87 : vector<256x4xf32>
    %89 = vector.extract_strided_slice %0 {offsets = [0, 1, 1, 0], sizes = [1, 16, 16, 16], strides = [1, 1, 1, 1]} : vector<1x18x18x16xf32> to vector<1x16x16x16xf32>
    %90 = vector.shape_cast %89 : vector<1x16x16x16xf32> to vector<256x16xf32>
    %91 = arith.truncf %88 : vector<256x4xf32> to vector<256x4xbf16>
    %c0_72 = arith.constant 0 : index
    %c0_73 = arith.constant 0 : index
    %92 = vector.load %arg6[%c0_72, %c0_73] : memref<4x16xbf16, #tpu.memory_space<vmem>>, vector<4x16xbf16>
    %cst_74 = arith.constant dense<0.000000e+00> : vector<256x16xf32>
    %93 = tpu.matmul %91, %92, %cst_74 {dimension_numbers = #tpu.dot_dimension_numbers<[1], [0], [0], [1], [0, 0, 1, 1], [], []>} : vector<256x4xbf16>, vector<4x16xbf16>, vector<256x16xf32> -> vector<256x16xf32>
    %c0_75 = arith.constant 0 : index
    %c0_76 = arith.constant 0 : index
    %94 = vector.load %arg7[%c0_75, %c0_76] : memref<1x16xf32, #tpu.memory_space<vmem>>, vector<1x16xf32>
    %95 = vector.broadcast %94 : vector<1x16xf32> to vector<256x16xf32>
    %96 = arith.addf %93, %95 : vector<256x16xf32>
    %97 = arith.addf %96, %90 : vector<256x16xf32>
    %cst_77 = arith.constant 0.000000e+00 : f32
    %98 = vector.broadcast %cst_77 : f32 to vector<256x16xf32>
    %99 = arith.maximumf %97, %98 : vector<256x16xf32>
    %100 = vector.shape_cast %99 : vector<256x16xf32> to vector<1x16x16x16xf32>
    %c0_78 = arith.constant 0 : index
    %c0_79 = arith.constant 0 : index
    %c0_80 = arith.constant 0 : index
    %c0_81 = arith.constant 0 : index
    %101 = vector.load %arg8[%c0_78, %c0_79, %c0_80, %c0_81] : memref<1x16x16x16xf32, #tpu.memory_space<vmem>>, vector<1x16x16x16xf32>
    tpu.vector_store %arg8[%c0_78, %c0_79, %c0_80, %c0_81], %100 {strides = array<i32>} : memref<1x16x16x16xf32, #tpu.memory_space<vmem>>, vector<1x16x16x16xf32>,
    return
  }
  func.func @transform_0(%arg0: i32) -> (i32, i32, i32, i32) {
    %c0_i32 = arith.constant 0 : i32
    %c0_i32_0 = arith.constant 0 : i32
    %c0_i32_1 = arith.constant 0 : i32
    %c0_i32_2 = arith.constant 0 : i32
    return %arg0, %c0_i32, %c0_i32_0, %c0_i32_1 : i32, i32, i32, i32
  }
  func.func @transform_1(%arg0: i32) -> (i32, i32) {
    %c0_i32 = arith.constant 0 : i32
    %c0_i32_0 = arith.constant 0 : i32
    %c0_i32_1 = arith.constant 0 : i32
    return %c0_i32, %c0_i32_0 : i32, i32
  }
  func.func @transform_2(%arg0: i32) -> (i32, i32) {
    %c0_i32 = arith.constant 0 : i32
    %c0_i32_0 = arith.constant 0 : i32
    %c0_i32_1 = arith.constant 0 : i32
    return %c0_i32, %c0_i32_0 : i32, i32
  }
  func.func @transform_3(%arg0: i32) -> (i32, i32, i32) {
    %c0_i32 = arith.constant 0 : i32
    %c0_i32_0 = arith.constant 0 : i32
    %c0_i32_1 = arith.constant 0 : i32
    %c0_i32_2 = arith.constant 0 : i32
    return %c0_i32, %c0_i32_0, %c0_i32_1 : i32, i32, i32
  }
  func.func @transform_4(%arg0: i32) -> (i32, i32) {
    %c0_i32 = arith.constant 0 : i32
    %c0_i32_0 = arith.constant 0 : i32
    %c0_i32_1 = arith.constant 0 : i32
    return %c0_i32, %c0_i32_0 : i32, i32
  }
  func.func @transform_5(%arg0: i32) -> (i32, i32) {
    %c0_i32 = arith.constant 0 : i32
    %c0_i32_0 = arith.constant 0 : i32
    %c0_i32_1 = arith.constant 0 : i32
    return %c0_i32, %c0_i32_0 : i32, i32
  }
  func.func @transform_6(%arg0: i32) -> (i32, i32) {
    %c0_i32 = arith.constant 0 : i32
    %c0_i32_0 = arith.constant 0 : i32
    %c0_i32_1 = arith.constant 0 : i32
    return %c0_i32, %c0_i32_0 : i32, i32
  }
  func.func @transform_7(%arg0: i32) -> (i32, i32, i32, i32) {
    %c0_i32 = arith.constant 0 : i32
    %c0_i32_0 = arith.constant 0 : i32
    %c0_i32_1 = arith.constant 0 : i32
    %c0_i32_2 = arith.constant 0 : i32
    return %arg0, %c0_i32, %c0_i32_0, %c0_i32_1 : i32, i32, i32, i32
  }
}

</mosaic_0001>

<bundles_post_ra>
// kernel: bottleneck_forward.1
= control target key start
LH: loop header
LB: loop body
LE: loop exit
PB: predicated region body
PF: predicated region fallthrough
CT: control target
= control target key end

     0   :  { %s10729_s24 = smov 0   ;;  %s13250_s0 = inlined_call_operand.vmem [shape: f32[2,18,18,16], index: 0, kind: input, shape index: {}]   ;;  %s13251_s1 = inlined_call_operand.vmem [shape: bf16[16,4], index: 1, kind: input, shape index: {}]   ;;  %s13252_s2 = inlined_call_operand.vmem [shape: f32[1,4], index: 2, kind: input, shape index: {}]   ;;  %s13253_s3 = inlined_call_operand.vmem [shape: bf16[9,4,4], index: 3, kind: input, shape index: {}]   ;;  %s13254_s4 = inlined_call_operand.vmem [shape: f32[1,4], index: 4, kind: input, shape index: {}]   ;;  %s13255_s5 = inlined_call_operand.vmem [shape: bf16[4,16], index: 5, kind: input, shape index: {}]   ;;  %s13256_s6 = inlined_call_operand.vmem [shape: f32[1,16], index: 6, kind: input, shape index: {}]   ;;  %s13257_s7 = inlined_call_operand.vmem [shape: f32[2,16,16,16], index: 7, kind: output, shape index: {}]  }
   0x1 LB: > { %s9305_s25 = sadd.s32 4294967295, %s10683_s24   ;;  %p9309_p0 = scmp.ge.s32.totalorder %s10683_s24, 1  ;;  %s10683_s24 = sphi %s10729_s24, %s17_s24  }
   0x2   : > { %p237_p1 = scmp.lt.s32.totalorder %s10683_s24, 3 }
   0x4   : > { %p238_p2 = pnand %p9309_p0, %p237_p1 }
   0x6   : > { %241 = sbr.rel (%p238_p2) target bundleno = 1178 (0x49a), region = 48 }
   0xb   : > { %v10448_v0 = vld [vmem:[%s13251_s1] sm:$0xff]   ;;  %v392_v1 = vlaneseq  ;;  %v10685_v2 = vmov 0.0   ;;  %p269_p3 = scmp.lt.s32.totalorder %s9305_s25, 1  ;;  %vm10686_vm0 = vmmov 0   ;;  %v10687_v3 = vmov 1983009808  }
   0xc   : > { %9997 = vmatprep.subr.bf16.mxu0 %v10685_v2  ;;  %10423 = vmatprep.subr.bf16.mxu1 %v10685_v2  ;;  %v390_v4 = vunpack.c.l.s4 %v10687_v3  ;;  %vm1891_vm1 = vcmask 130048   ;;  %vm4039_vm2 = vcmask 27648   ;;  %vm4042_vm3 = vcmask 24576  }
   0xd   : > { %9998 = vmatpush3.bf16.msra.mxu0 %v10448_v0  ;;  %9999 = vmatprep.mubr.msk.bf16.mxu0 %vm10686_vm0, %v10685_v2  ;;  %v10744_v5 = vshrl.u32 %v392_v1, 7  ;;  %s13430_s25 = smov (!%p269_p3, %s9305_s25), 1  ;;  %vm4264_vm4 = vcmask 1041408   ;;  %vm4215_vm5 = vcmask 31744   ;;  %vm4509_vm8 = vsmask.f32 3328 }
   0xe   : > { %10424 = vmatpush3.bf16.msra.mxu1 %v10448_v0  ;;  %10075 = vmatprep.mubr.msk.bf16.mxu1 %vm10686_vm0, %v10685_v2  ;;  %v391_v6 = vunpack.c.0.s8 %v390_v4  ;;  %s10435_s28 = smul.u32 432, %s13430_s25  ;;  %vm4510_vm9 = vsmask.f32 7440  ;;  %vm5254_vm11 = vcmask 1042432   ;;  %vm5255_vm12 = vcmask 1046532   ;;  %s9756_s27 = sshll.u32 %s13430_s25, 8 }
   0xf   : > { %vm2929_vm6 = vcmp.gt.s32.totalorder %v10744_v5, 0  ;;  %vm11275_vm10 = vmor %vm4509_vm8, %vm4510_vm9  ;;  %vm8805_vm14 = vcmask 1046528   ;;  %s13079_s30 = scalar_lea.vmem %s13257_s7, %s9756_s27 }
  0x10   : > { %v10752_v7 = vsub.s32 %v391_v6, %v10744_v5  ;;  %s10757_s8 = scalar_lea.vmem %s13250_s0, %s10435_s28  ;;  %vm11536_vm13 = vmor %vm5254_vm11, %vm5255_vm12 }
  0x11   : > { %v280_v8 = vld [vmem:[%s10757_s8] sm:$0xff]  ;;  %v281_v9 = vld [vmem:[%s10757_s8 + $0x8] sm:$0xff]  ;;  %v283_v14 = vld [vmem:[%s10757_s8 + $0x18] sm:$0xff] }
  0x12   : > { %v388_v10 = vcombine.high %v280_v8, %v280_v8  ;;  %v395_v11 = vrot.slane %v280_v8, %v10752_v7  ;;  %v405_v12 = vcombine.high %v281_v9, %v281_v9  ;;  %v412_v13 = vrot.slane %v281_v9, %v10752_v7  ;;  %v284_v15 = vld [vmem:[%s10757_s8 + $0x20] sm:$0xff]  ;;  %v9313_v24 = vld.sshfl [vmem:[%s10757_s8 + $0x10] sm:$0x3 pattern:$0x76325410]  ;;  %v287_v47 = vld [vmem:[%s10757_s8 + $0x38] sm:$0xff] }
  0x13   : > { %v429_v16 = vcombine.high %v283_v14, %v283_v14  ;;  %v436_v17 = vrot.slane %v283_v14, %v10752_v7  ;;  %v446_v18 = vcombine.high %v284_v15, %v284_v15  ;;  %v453_v19 = vrot.slane %v284_v15, %v10752_v7  ;;  %v10661_v37 = vld.sshfl [vmem:[%s10757_s8 + $0x28] sm:$0x3 pattern:$0x76325410]  ;;  %v286_v42 = vld [vmem:[%s10757_s8 + $0x30] sm:$0xff] }
  0x14   : > { %v402_v20 = vrot.slane %v388_v10, %v10752_v7  ;;  %v403_v21 = vcombine.high %v395_v11, %v395_v11  ;;  %v419_v22 = vrot.slane %v405_v12, %v10752_v7  ;;  %v420_v23 = vcombine.high %v412_v13, %v412_v13  ;;  %v289_v60 = vld [vmem:[%s10757_s8 + $0x48] sm:$0xff]  ;;  %v10662_v6 = vld.sshfl [vmem:[%s10757_s8 + $0x40] sm:$0x3 pattern:$0x76325410] }
  0x15   : > { %v443_v25 = vrot.slane %v429_v16, %v10752_v7  ;;  %v444_v26 = vcombine.high %v436_v17, %v436_v17  ;;  %v460_v27 = vrot.slane %v446_v18, %v10752_v7  ;;  %v461_v28 = vcombine.high %v453_v19, %v453_v19 }
  0x16   : > { %v404_v29 = vcombine.high %v402_v20, %v402_v20  ;;  %v421_v30 = vcombine.high %v419_v22, %v419_v22  ;;  %v1126_v31 = vcombine.low %v395_v11, %v403_v21  ;;  %v1143_v32 = vcombine.low %v412_v13, %v420_v23  ;;  %v290_v13 = vld [vmem:[%s10757_s8 + $0x50] sm:$0xff] }
  0x17   : > { %v445_v33 = vcombine.high %v443_v25, %v443_v25  ;;  %v1160_v34 = vcombine.low %v9313_v24, %v436_v17  ;;  %v1161_v35 = vcombine.low %v444_v26, %v443_v25  ;;  %v1178_v36 = vcombine.low %v461_v28, %v460_v27 }
  0x18   : > { %v1127_v38 = vcombine.low %v402_v20, %v404_v29  ;;  %v1134_v39 = vrot.slane %v1126_v31, %v10752_v7  ;;  %v1144_v40 = vcombine.low %v419_v22, %v421_v30  ;;  %v1151_v41 = vrot.slane %v1143_v32, %v10752_v7  ;;  %v292_v20 = vld [vmem:[%s10757_s8 + $0x60] sm:$0xff]  ;;  %v293_v32 = vld [vmem:[%s10757_s8 + $0x68] sm:$0xff] }
  0x19   : > { %v1168_v43 = vrot.slane %v1160_v34, %v10752_v7  ;;  %v1175_v44 = vrot.slane %v1161_v35, %v10752_v7  ;;  %v1177_v45 = vcombine.low %v445_v33, %v453_v19  ;;  %v1192_v46 = vrot.slane %v1178_v36, %v10752_v7  ;;  %v10663_v35 = vld.sshfl [vmem:[%s10757_s8 + $0x58] sm:$0x3 pattern:$0x76325410] }
  0x1a   : > { %v1141_v48 = vrot.slane %v1127_v38, %v10752_v7  ;;  %v1158_v49 = vrot.slane %v1144_v40, %v10752_v7  ;;  %v462_v50 = vcombine.high %v460_v27, %v460_v27  ;;  %v470_v52 = vcombine.high %v286_v42, %v286_v42 }
  0x1b   : > { %v1185_v51 = vrot.slane %v1177_v45, %v10752_v7  ;;  %v477_v53 = vrot.slane %v286_v42, %v10752_v7  ;;  %v494_v56 = vrot.slane %v287_v47, %v10752_v7  ;;  %v1176_v57 = vcombine.low %v1168_v43, %v1175_v44 }
  0x1c   : > { %v1142_v54 = vcombine.low %v1134_v39, %v1141_v48  ;;  %v1159_v55 = vcombine.low %v1151_v41, %v1158_v49  ;;  %v484_v58 = vrot.slane %v470_v52, %v10752_v7  ;;  %v487_v61 = vcombine.high %v287_v47, %v287_v47  ;;  %v295_v48 = vld [vmem:[%s10757_s8 + $0x78] sm:$0xff] }
  0x1d   : > { %v485_v59 = vcombine.high %v477_v53, %v477_v53  ;;  %v1193_v63 = vcombine.low %v1185_v51, %v1192_v46  ;;  %v502_v0 = vcombine.high %v494_v56, %v494_v56  ;;  %v1194_v1 = vcombine.low %v462_v50, %v10661_v37 }
  0x1e   : > { %v1855_v62 = vpack.c.bf16 %v1159_v55, %v1142_v54  ;;  %v486_v3 = vcombine.high %v484_v58, %v484_v58  ;;  %v501_v8 = vrot.slane %v487_v61, %v10752_v7  ;;  %v511_v10 = vcombine.high %v289_v60, %v289_v60 }
  0x1f   : > { %v1195_v4 = vcombine.low %v477_v53, %v485_v59  ;;  %v1212_v9 = vcombine.low %v494_v56, %v502_v0  ;;  %v518_v11 = vrot.slane %v289_v60, %v10752_v7  ;;  %v1856_v14 = vpack.c.bf16 %v1193_v63, %v1176_v57  ;;  %v10664_v53 = vld.sshfl [vmem:[%s10757_s8 + $0x70] sm:$0x3 pattern:$0x76325410]  ;;  %v296_v60 = vld [vmem:[%s10757_s8 + $0x80] sm:$0xff] }
  0x20   : > { %10000 = vmatmul.mubr.msk.bf16.vlgmr.msra.gmra.mxu0 %vm1891_vm1, %v1855_v62  ;;  %v1211_v12 = vcombine.low %v484_v58, %v486_v3  ;;  %v1202_v15 = vrot.slane %v1194_v1, %v10752_v7  ;;  %v525_v16 = vrot.slane %v511_v10, %v10752_v7  ;;  %v503_v18 = vcombine.high %v501_v8, %v501_v8  ;;  %v298_v10 = vld [vmem:[%s10757_s8 + $0x90] sm:$0xff] }
  0x21   : > { %10003 = vmatprep.mubr.msk.bf16.mxu0 %vm10686_vm0, %v10685_v2  ;;  %v1209_v17 = vrot.slane %v1195_v4, %v10752_v7  ;;  %v526_v19 = vcombine.high %v518_v11, %v518_v11  ;;  %v528_v21 = vcombine.high %v290_v13, %v290_v13  ;;  %v1226_v23 = vrot.slane %v1212_v9, %v10752_v7 }
  0x22   : > { %v1219_v22 = vrot.slane %v1211_v12, %v10752_v7  ;;  %v527_v24 = vcombine.high %v525_v16, %v525_v16  ;;  %v535_v25 = vrot.slane %v290_v13, %v10752_v7  ;;  %v1229_v26 = vcombine.low %v10662_v6, %v518_v11 }
  0x23   : > { %v552_v27 = vcombine.high %v292_v20, %v292_v20  ;;  %v1210_v28 = vcombine.low %v1202_v15, %v1209_v17  ;;  %v1228_v29 = vcombine.low %v501_v8, %v503_v18  ;;  %v1245_v30 = vcombine.low %v526_v19, %v525_v16 }
  0x24   : > { %v542_v31 = vrot.slane %v528_v21, %v10752_v7  ;;  %v1227_v33 = vcombine.low %v1219_v22, %v1226_v23  ;;  %v1246_v34 = vcombine.low %v527_v24, %v535_v25  ;;  %v559_v36 = vrot.slane %v292_v20, %v10752_v7  ;;  %v10665_v20 = vld.sshfl [vmem:[%s10757_s8 + $0x88] sm:$0x3 pattern:$0x76325410]  ;;  %v299_v22 = vld [vmem:[%s10757_s8 + $0x98] sm:$0xff] }
  0x25   : > { %v566_v37 = vrot.slane %v552_v27, %v10752_v7  ;;  %v1243_v38 = vrot.slane %v1229_v26, %v10752_v7  ;;  %v543_v39 = vcombine.high %v535_v25, %v535_v25  ;;  %v569_v40 = vcombine.high %v293_v32, %v293_v32 }
  0x26   : > { %v1236_v41 = vrot.slane %v1228_v29, %v10752_v7  ;;  %v1253_v42 = vrot.slane %v1245_v30, %v10752_v7  ;;  %v544_v43 = vcombine.high %v542_v31, %v542_v31  ;;  %v1857_v44 = vpack.c.bf16 %v1227_v33, %v1210_v28 }
  0x27   : > { %v1260_v45 = vrot.slane %v1246_v34, %v10752_v7  ;;  %v567_v46 = vcombine.high %v559_v36, %v559_v36  ;;  %v568_v47 = vcombine.high %v566_v37, %v566_v37  ;;  %v576_v49 = vrot.slane %v293_v32, %v10752_v7 }
  0x28   : > { %10004 = vmatmul.mubr.msk.bf16.gmra.mxu0 %vm1891_vm1, %v1856_v14  ;;  %v583_v50 = vrot.slane %v569_v40, %v10752_v7  ;;  %v1244_v51 = vcombine.low %v1236_v41, %v1243_v38  ;;  %v1262_v52 = vcombine.low %v543_v39, %v542_v31  ;;  %v593_v54 = vcombine.high %v295_v48, %v295_v48  ;;  %v302_v40 = vld [vmem:[%s10757_s8 + $0xb0] sm:$0xff] }
  0x29   : > { %10007 = vmatprep.mubr.msk.bf16.mxu0 %vm10686_vm0, %v10685_v2  ;;  %v600_v55 = vrot.slane %v295_v48, %v10752_v7  ;;  %v1261_v56 = vcombine.low %v1253_v42, %v1260_v45  ;;  %v1263_v57 = vcombine.low %v544_v43, %v10663_v35  ;;  %v1279_v58 = vcombine.low %v559_v36, %v567_v46  ;;  %v10666_v43 = vld.sshfl [vmem:[%s10757_s8 + $0xa0] sm:$0x3 pattern:$0x76325410] }
  0x2a   : > { %v1280_v59 = vcombine.low %v566_v37, %v568_v47  ;;  %v584_v61 = vcombine.high %v576_v49, %v576_v49  ;;  %v585_v62 = vcombine.high %v583_v50, %v583_v50  ;;  %v1270_v63 = vrot.slane %v1262_v52, %v10752_v7 }
  0x2b   : > { %v607_v0 = vrot.slane %v593_v54, %v10752_v7  ;;  %v608_v1 = vcombine.high %v600_v55, %v600_v55  ;;  %v610_v3 = vcombine.high %v296_v60, %v296_v60  ;;  %v1858_v4 = vpack.c.bf16 %v1261_v56, %v1244_v51 }
  0x2c   : > { %v1277_v6 = vrot.slane %v1263_v57, %v10752_v7  ;;  %v1287_v8 = vrot.slane %v1279_v58, %v10752_v7  ;;  %v1294_v9 = vrot.slane %v1280_v59, %v10752_v7  ;;  %v1296_v11 = vcombine.low %v576_v49, %v584_v61 }
  0x2d   : > { %v1297_v12 = vcombine.low %v583_v50, %v585_v62  ;;  %v1313_v13 = vcombine.low %v10664_v53, %v600_v55  ;;  %v617_v14 = vrot.slane %v296_v60, %v10752_v7  ;;  %v1314_v15 = vcombine.low %v608_v1, %v607_v0  ;;  %v10667_v62 = vld.sshfl [vmem:[%s10757_s8 + $0xb8] sm:$0x3 pattern:$0x76325410] }
  0x2e   : > { %v624_v16 = vrot.slane %v610_v3, %v10752_v7  ;;  %v641_v17 = vrot.slane %v298_v10, %v10752_v7  ;;  %v1278_v18 = vcombine.low %v1270_v63, %v1277_v6  ;;  %v1295_v19 = vcombine.low %v1287_v8, %v1294_v9  ;;  %v304_v3 = vld [vmem:[%s10757_s8 + $0xc0] sm:$0xff]  ;;  %v305_v6 = vld [vmem:[%s10757_s8 + $0xc8] sm:$0xff] }
  0x2f   : > { %v1304_v21 = vrot.slane %v1296_v11, %v10752_v7  ;;  %v1311_v23 = vrot.slane %v1297_v12, %v10752_v7  ;;  %v1321_v24 = vrot.slane %v1313_v13, %v10752_v7  ;;  %v609_v25 = vcombine.high %v607_v0, %v607_v0 }
  0x30   : > { %10008 = vmatmul.mubr.msk.bf16.gmra.mxu0 %vm1891_vm1, %v1857_v44  ;;  %v625_v26 = vcombine.high %v617_v14, %v617_v14  ;;  %v1328_v27 = vrot.slane %v1314_v15, %v10752_v7  ;;  %v626_v28 = vcombine.high %v624_v16, %v624_v16  ;;  %v649_v29 = vcombine.high %v641_v17, %v641_v17  ;;  %v301_v44 = vld [vmem:[%s10757_s8 + $0xa8] sm:$0xff] }
  0x31   : > { %10011 = vmatprep.mubr.msk.bf16.mxu0 %vm10686_vm0, %v10685_v2  ;;  %v1859_v30 = vpack.c.bf16 %v1295_v19, %v1278_v18  ;;  %v634_v31 = vcombine.high %v298_v10, %v298_v10  ;;  %v651_v32 = vcombine.high %v299_v22, %v299_v22  ;;  %v1312_v33 = vcombine.low %v1304_v21, %v1311_v23 }
  0x32   : > { %v1330_v34 = vcombine.low %v609_v25, %v617_v14  ;;  %v1331_v35 = vcombine.low %v625_v26, %v624_v16  ;;  %v1329_v36 = vcombine.low %v1321_v24, %v1328_v27  ;;  %v1347_v37 = vcombine.low %v626_v28, %v10665_v20  ;;  %v307_v28 = vld [vmem:[%s10757_s8 + $0xd8] sm:$0xff] }
  0x33   : > { %v1348_v38 = vcombine.low %v641_v17, %v649_v29  ;;  %v658_v39 = vrot.slane %v299_v22, %v10752_v7  ;;  %v648_v41 = vrot.slane %v634_v31, %v10752_v7  ;;  %v665_v42 = vrot.slane %v651_v32, %v10752_v7 }
  0x34   : > { %v1338_v45 = vrot.slane %v1330_v34, %v10752_v7  ;;  %v1345_v46 = vrot.slane %v1331_v35, %v10752_v7  ;;  %v675_v47 = vcombine.high %v301_v44, %v301_v44  ;;  %v692_v48 = vcombine.high %v302_v40, %v302_v40 }
  0x35   : > { %v1860_v49 = vpack.c.bf16 %v1329_v36, %v1312_v33  ;;  %v1355_v50 = vrot.slane %v1347_v37, %v10752_v7  ;;  %v1362_v51 = vrot.slane %v1348_v38, %v10752_v7  ;;  %v666_v52 = vcombine.high %v658_v39, %v658_v39 }
  0x36   : > { %v650_v53 = vcombine.high %v648_v41, %v648_v41  ;;  %v667_v54 = vcombine.high %v665_v42, %v665_v42  ;;  %v682_v55 = vrot.slane %v301_v44, %v10752_v7  ;;  %v689_v56 = vrot.slane %v675_v47, %v10752_v7 }
  0x37   : > { %v699_v57 = vrot.slane %v302_v40, %v10752_v7  ;;  %v706_v58 = vrot.slane %v692_v48, %v10752_v7  ;;  %v1346_v59 = vcombine.low %v1338_v45, %v1345_v46  ;;  %v1363_v60 = vcombine.low %v1355_v50, %v1362_v51  ;;  %v310_v51 = vld [vmem:[%s10757_s8 + $0xf0] sm:$0xff] }
  0x38   : > { %10012 = vmatmul.mubr.msk.bf16.gmra.mxu0 %vm1891_vm1, %v1858_v4  ;;  %v1365_v61 = vcombine.low %v658_v39, %v666_v52  ;;  %v1364_v63 = vcombine.low %v648_v41, %v650_v53  ;;  %v1381_v0 = vcombine.low %v665_v42, %v667_v54  ;;  %v1382_v1 = vcombine.low %v10666_v43, %v682_v55  ;;  %v308_v39 = vld [vmem:[%s10757_s8 + $0xe0] sm:$0xff]  ;;  %v10668_v43 = vld.sshfl [vmem:[%s10757_s8 + $0xd0] sm:$0x3 pattern:$0x76325410] }
  0x39   : > { %10015 = vmatprep.mubr.msk.bf16.mxu0 %vm10686_vm0, %v10685_v2  ;;  %v690_v4 = vcombine.high %v682_v55, %v682_v55  ;;  %v691_v8 = vcombine.high %v689_v56, %v689_v56  ;;  %v707_v9 = vcombine.high %v699_v57, %v699_v57  ;;  %v708_v10 = vcombine.high %v706_v58, %v706_v58 }
  0x3a   : > { %v1861_v11 = vpack.c.bf16 %v1363_v60, %v1346_v59  ;;  %v1379_v12 = vrot.slane %v1365_v61, %v10752_v7  ;;  %v716_v13 = vcombine.high %v304_v3, %v304_v3  ;;  %v1372_v14 = vrot.slane %v1364_v63, %v10752_v7 }
  0x3b   : > { %v1389_v15 = vrot.slane %v1381_v0, %v10752_v7  ;;  %v1396_v16 = vrot.slane %v1382_v1, %v10752_v7  ;;  %v733_v17 = vcombine.high %v305_v6, %v305_v6  ;;  %v1398_v18 = vcombine.low %v690_v4, %v689_v56  ;;  %v313_v0 = vld [vmem:[%s10757_s8 + $0x108] sm:$0xff] }
  0x3c   : > { %v1399_v19 = vcombine.low %v691_v8, %v699_v57  ;;  %v1415_v20 = vcombine.low %v707_v9, %v706_v58  ;;  %v1416_v21 = vcombine.low %v708_v10, %v10667_v62  ;;  %v723_v22 = vrot.slane %v304_v3, %v10752_v7  ;;  %v311_v57 = vld [vmem:[%s10757_s8 + $0xf8] sm:$0xff]  ;;  %v10669_v8 = vld.sshfl [vmem:[%s10757_s8 + $0xe8] sm:$0x3 pattern:$0x76325410] }
  0x3d   : > { %v730_v23 = vrot.slane %v716_v13, %v10752_v7  ;;  %v1380_v24 = vcombine.low %v1372_v14, %v1379_v12  ;;  %v1397_v25 = vcombine.low %v1389_v15, %v1396_v16  ;;  %v740_v26 = vrot.slane %v305_v6, %v10752_v7 }
  0x3e   : > { %v747_v27 = vrot.slane %v733_v17, %v10752_v7  ;;  %v1406_v29 = vrot.slane %v1398_v18, %v10752_v7  ;;  %v1423_v31 = vrot.slane %v1415_v20, %v10752_v7  ;;  %v1430_v32 = vrot.slane %v1416_v21, %v10752_v7 }
  0x3f   : > { %v731_v33 = vcombine.high %v723_v22, %v723_v22  ;;  %v732_v34 = vcombine.high %v730_v23, %v730_v23  ;;  %v757_v35 = vcombine.high %v307_v28, %v307_v28  ;;  %v1862_v36 = vpack.c.bf16 %v1397_v25, %v1380_v24  ;;  %v10670_v25 = vld.sshfl [vmem:[%s10757_s8 + $0x100] sm:$0x3 pattern:$0x76325410] }
  0x40   : > { %10016 = vmatmul.mubr.msk.bf16.gmra.mxu0 %vm1891_vm1, %v1859_v30  ;;  %v1413_v30 = vrot.slane %v1399_v19, %v10752_v7  ;;  %v748_v37 = vcombine.high %v740_v26, %v740_v26  ;;  %v749_v38 = vcombine.high %v747_v27, %v747_v27  ;;  %v1431_v41 = vcombine.low %v1423_v31, %v1430_v32 }
  0x41   : > { %10019 = vmatprep.mubr.msk.bf16.mxu0 %vm10686_vm0, %v10685_v2  ;;  %v1432_v42 = vcombine.low %v723_v22, %v731_v33  ;;  %v1433_v44 = vcombine.low %v730_v23, %v732_v34  ;;  %v764_v45 = vrot.slane %v307_v28, %v10752_v7  ;;  %v771_v46 = vrot.slane %v757_v35, %v10752_v7  ;;  %v314_v28 = vld [vmem:[%s10757_s8 + $0x110] sm:$0xff] }
  0x42   : > { %v1414_v40 = vcombine.low %v1406_v29, %v1413_v30  ;;  %v1449_v47 = vcombine.low %v740_v26, %v748_v37  ;;  %v1450_v48 = vcombine.low %v747_v27, %v749_v38  ;;  %v781_v50 = vrot.slane %v308_v39, %v10752_v7 }
  0x43   : > { %v1440_v53 = vrot.slane %v1432_v42, %v10752_v7  ;;  %v1447_v54 = vrot.slane %v1433_v44, %v10752_v7  ;;  %v772_v55 = vcombine.high %v764_v45, %v764_v45  ;;  %v773_v56 = vcombine.high %v771_v46, %v771_v46 }
  0x44   : > { %v1863_v52 = vpack.c.bf16 %v1431_v41, %v1414_v40  ;;  %v798_v58 = vcombine.high %v310_v51, %v310_v51  ;;  %v1457_v59 = vrot.slane %v1449_v47, %v10752_v7  ;;  %v1464_v60 = vrot.slane %v1450_v48, %v10752_v7 }
  0x45   : > { %v789_v62 = vcombine.high %v781_v50, %v781_v50  ;;  %v1466_v63 = vcombine.low %v10668_v43, %v764_v45  ;;  %v805_v1 = vrot.slane %v310_v51, %v10752_v7  ;;  %v822_v3 = vrot.slane %v311_v57, %v10752_v7 }
  0x46   : > { %v1467_v4 = vcombine.low %v772_v55, %v771_v46  ;;  %v1483_v6 = vcombine.low %v773_v56, %v781_v50  ;;  %v812_v9 = vrot.slane %v798_v58, %v10752_v7  ;;  %v815_v10 = vcombine.high %v311_v57, %v311_v57  ;;  %v10672_v55 = vld.sshfl [vmem:[%s10757_s8 + $0x190] sm:$0x3 pattern:$0x76325410]  ;;  %v331_v56 = vld [vmem:[%s10757_s8 + $0x198] sm:$0xff] }
  0x47   : > { %v1465_v12 = vcombine.low %v1457_v59, %v1464_v60  ;;  %v839_v14 = vcombine.high %v313_v0, %v313_v0  ;;  %v1474_v15 = vrot.slane %v1466_v63, %v10752_v7  ;;  %v813_v17 = vcombine.high %v805_v1, %v805_v1 }
  0x48   : > { %10020 = vmatmul.mubr.msk.bf16.gmra.mxu0 %vm1891_vm1, %v1860_v49  ;;  %v774_v49 = vcombine.high %v308_v39, %v308_v39  ;;  %v830_v18 = vcombine.high %v822_v3, %v822_v3  ;;  %v1481_v19 = vrot.slane %v1467_v4, %v10752_v7  ;;  %v1491_v20 = vrot.slane %v1483_v6, %v10752_v7  ;;  %v316_v39 = vld [vmem:[%s10757_s8 + $0x120] sm:$0xff] }
  0x49   : > { %10023 = vmatprep.mubr.msk.bf16.mxu0 %vm10686_vm0, %v10685_v2  ;;  %v814_v21 = vcombine.high %v812_v9, %v812_v9  ;;  %v829_v22 = vrot.slane %v815_v10, %v10752_v7  ;;  %v846_v26 = vrot.slane %v313_v0, %v10752_v7  ;;  %v853_v27 = vrot.slane %v839_v14, %v10752_v7 }
  0x4a   : > { %v788_v61 = vrot.slane %v774_v49, %v10752_v7  ;;  %v1501_v30 = vcombine.low %v805_v1, %v813_v17  ;;  %v1518_v31 = vcombine.low %v822_v3, %v830_v18  ;;  %v1482_v32 = vcombine.low %v1474_v15, %v1481_v19 }
  0x4b   : > { %v1517_v33 = vcombine.low %v812_v9, %v814_v21  ;;  %v831_v34 = vcombine.high %v829_v22, %v829_v22  ;;  %v855_v37 = vcombine.high %v853_v27, %v853_v27  ;;  %v863_v38 = vrot.slane %v314_v28, %v10752_v7 }
  0x4c   : > { %v1484_v13 = vcombine.low %v789_v62, %v788_v61  ;;  %v790_v16 = vcombine.high %v788_v61, %v788_v61  ;;  %v856_v40 = vcombine.high %v314_v28, %v314_v28  ;;  %v1515_v42 = vrot.slane %v1501_v30, %v10752_v7  ;;  %v317_v61 = vld [vmem:[%s10757_s8 + $0x128] sm:$0xff]  ;;  %v332_v62 = vld [vmem:[%s10757_s8 + $0x1a0] sm:$0xff] }
  0x4d   : > { %v1532_v43 = vrot.slane %v1518_v31, %v10752_v7  ;;  %v1525_v44 = vrot.slane %v1517_v33, %v10752_v7  ;;  %v1534_v45 = vcombine.low %v829_v22, %v831_v34  ;;  %v1535_v46 = vcombine.low %v10670_v25, %v846_v26  ;;  %v10942_v25 = vld.sshfl [vmem:[%s10757_s8 + $0x130] sm:$0x3 pattern:$0x76325410] }
  0x4e   : > { %v1498_v24 = vrot.slane %v1484_v13, %v10752_v7  ;;  %v1500_v29 = vcombine.low %v790_v16, %v10669_v8  ;;  %v880_v47 = vcombine.high %v316_v39, %v316_v39  ;;  %v1552_v50 = vcombine.low %v855_v37, %v863_v38 }
  0x4f   : > { %v870_v51 = vrot.slane %v856_v40, %v10752_v7  ;;  %v1533_v57 = vcombine.low %v1525_v44, %v1532_v43  ;;  %v1542_v58 = vrot.slane %v1534_v45, %v10752_v7  ;;  %v1549_v59 = vrot.slane %v1535_v46, %v10752_v7 }
  0x50   : > { %10024 = vmatmul.mubr.msk.bf16.gmra.mxu0 %vm1891_vm1, %v1861_v11  ;;  %v1448_v11 = vcombine.low %v1440_v53, %v1447_v54  ;;  %v1499_v35 = vcombine.low %v1491_v20, %v1498_v24  ;;  %v1508_v41 = vrot.slane %v1500_v29, %v10752_v7  ;;  %v10671_v53 = vld.sshfl [vmem:[%s10757_s8 + $0x118] sm:$0x3 pattern:$0x76325410]  ;;  %v887_v54 = vrot.slane %v316_v39, %v10752_v7  ;;  %v320_v39 = vld [vmem:[%s10757_s8 + $0x140] sm:$0xff] }
  0x51   : > { %10027 = vmatprep.mubr.msk.bf16.mxu0 %vm10686_vm0, %v10685_v2  ;;  %v894_v60 = vrot.slane %v880_v47, %v10752_v7  ;;  %v1566_v0 = vrot.slane %v1552_v50, %v10752_v7  ;;  %v871_v1 = vcombine.high %v863_v38, %v863_v38  ;;  %v872_v3 = vcombine.high %v870_v51, %v870_v51  ;;  %v319_v20 = vld [vmem:[%s10757_s8 + $0x138] sm:$0xff] }
  0x52   : > { %v1864_v23 = vpack.c.bf16 %v1465_v12, %v1448_v11  ;;  %v1865_v48 = vpack.c.bf16 %v1499_v35, %v1482_v32  ;;  %v1085_v4 = vcombine.high %v331_v56, %v331_v56  ;;  %v895_v6 = vcombine.high %v887_v54, %v887_v54 }
  0x53   : > { %v897_v8 = vcombine.high %v317_v61, %v317_v61  ;;  %v1092_v9 = vrot.slane %v331_v56, %v10752_v7  ;;  %v1102_v10 = vcombine.high %v332_v62, %v332_v62  ;;  %v1550_v12 = vcombine.low %v1542_v58, %v1549_v59 }
  0x54   : > { %v896_v13 = vcombine.high %v894_v60, %v894_v60  ;;  %v904_v14 = vrot.slane %v317_v61, %v10752_v7  ;;  %v1568_v16 = vcombine.low %v871_v1, %v870_v51  ;;  %v1099_v17 = vrot.slane %v1085_v4, %v10752_v7 }
  0x55   : > { %v1100_v18 = vcombine.high %v1092_v9, %v1092_v9  ;;  %v1569_v19 = vcombine.low %v872_v3, %v10671_v53  ;;  %v1109_v21 = vrot.slane %v332_v62, %v10752_v7  ;;  %v1116_v22 = vrot.slane %v1102_v10, %v10752_v7 }
  0x56   : > { %v1585_v24 = vcombine.low %v887_v54, %v895_v6  ;;  %v1586_v29 = vcombine.low %v894_v60, %v896_v13  ;;  %v912_v30 = vcombine.high %v904_v14, %v904_v14  ;;  %v921_v33 = vcombine.high %v319_v20, %v319_v20  ;;  %v10674_v6 = vld.sshfl [vmem:[%s10757_s8 + $0x148] sm:$0x3 pattern:$0x76325410] }
  0x57   : > { %v1773_v28 = vcombine.low %v1100_v18, %v1099_v17  ;;  %v1117_v31 = vcombine.high %v1109_v21, %v1109_v21  ;;  %v928_v34 = vrot.slane %v319_v20, %v10752_v7  ;;  %v1576_v37 = vrot.slane %v1568_v16, %v10752_v7 }
  0x58   : > { %10028 = vmatmul.mubr.msk.bf16.gmra.mxu0 %vm1891_vm1, %v1862_v36  ;;  %v854_v36 = vcombine.high %v846_v26, %v846_v26  ;;  %v911_v26 = vrot.slane %v897_v8, %v10752_v7  ;;  %v1583_v38 = vrot.slane %v1569_v19, %v10752_v7  ;;  %v1602_v45 = vcombine.low %v904_v14, %v912_v30 }
  0x59   : > { %10031 = vmatprep.mubr.msk.bf16.mxu0 %vm10686_vm0, %v10685_v2  ;;  %v1787_v35 = vrot.slane %v1773_v28, %v10752_v7  ;;  %v1790_v40 = vcombine.low %v1117_v31, %v1116_v22  ;;  %v1600_v50 = vrot.slane %v1586_v29, %v10752_v7  ;;  %v935_v51 = vrot.slane %v921_v33, %v10752_v7 }
  0x5a   : > { %v1551_v49 = vcombine.low %v854_v36, %v853_v27  ;;  %v1101_v27 = vcombine.high %v1099_v17, %v1099_v17  ;;  %v913_v43 = vcombine.high %v911_v26, %v911_v26  ;;  %v938_v53 = vcombine.high %v320_v39, %v320_v39 }
  0x5b   : > { %v1804_v47 = vrot.slane %v1790_v40, %v10752_v7  ;;  %v1584_v54 = vcombine.low %v1576_v37, %v1583_v38  ;;  %v1619_v59 = vcombine.low %v10942_v25, %v928_v34  ;;  %v10688_v60 = vmov 0.0|0.0   ;;  %v10675_v25 = vld.sshfl [vmem:[%s10757_s8 + $0x160] sm:$0x3 pattern:$0x76325410]  ;;  %v326_v37 = vld [vmem:[%s10757_s8 + $0x170] sm:$0xff] }
  0x5c   : > { %v1559_v63 = vrot.slane %v1551_v49, %v10752_v7  ;;  %v1789_v36 = vcombine.low %v1101_v27, %v1109_v21  ;;  %v1118_v49 = vcombine.high %v1116_v22, %v1116_v22  ;;  %v1603_v58 = vcombine.low %v911_v26, %v913_v43  ;;  %v325_v26 = vld [vmem:[%s10757_s8 + $0x168] sm:$0xff] }
  0x5d   : > { %v9338_v61 = vcombine.low %v10688_v60, %v10688_v60  ;;  %v9339_v62 = vcombine.high %v10688_v60, %v10688_v60  ;;  %v952_v8 = vrot.slane %v938_v53, %v10752_v7  ;;  %v937_v13 = vcombine.high %v935_v51, %v935_v51 }
  0x5e   : > { %v1567_v15 = vcombine.low %v1559_v63, %v1566_v0  ;;  %v1797_v44 = vrot.slane %v1789_v36, %v10752_v7  ;;  %v945_v63 = vrot.slane %v320_v39, %v10752_v7  ;;  %v323_v0 = vld [vmem:[%s10757_s8 + $0x158] sm:$0xff]  ;;  %v1627_v16 = vrot.slane %v1619_v59, %v10752_v7 }
  0x5f   : > { %4040 = vst.msk [vmem:[#allocation2] sm:$0xf] %vm4039_vm2, %v9338_v61  ;;  %4041 = vst.msk [vmem:[#allocation2 + $0x4] sm:$0xf] %vm4039_vm2, %v9339_v62  ;;  %v979_v14 = vcombine.high %v323_v0, %v323_v0  ;;  %v954_v20 = vcombine.high %v952_v8, %v952_v8  ;;  %v986_v27 = vrot.slane %v323_v0, %v10752_v7 }
  0x60   : > { %10032 = vmatmul.mubr.msk.bf16.gmra.mxu0 %vm1891_vm1, %v1863_v52  ;;  %v1516_v52 = vcombine.low %v1508_v41, %v1515_v42  ;;  %v1867_v41 = vpack.c.bf16 %v1567_v15, %v1550_v12  ;;  %v1593_v42 = vrot.slane %v1585_v24, %v10752_v7  ;;  %v1805_v56 = vcombine.low %v1797_v44, %v1804_v47  ;;  %v4134_v24 = vld [vmem:[%s13253_s3] sm:$0x3]  ;;  %v10676_v59 = vld.sshfl [vmem:[%s10757_s8 + $0x178] sm:$0x3 pattern:$0x76325410] }
  0x61   : > { %10035 = vmatprep.mubr.msk.bf16.mxu0 %vm10686_vm0, %v10685_v2  ;;  %4093 = vst.msk [vmem:[#allocation2 + $0xd0] sm:$0xf] %vm4039_vm2, %v9339_v62  ;;  %4092 = vst.msk [vmem:[#allocation2 + $0xcc] sm:$0xf] %vm4039_vm2, %v9338_v61  ;;  %v1610_v12 = vrot.slane %v1602_v45, %v10752_v7  ;;  %v1617_v15 = vrot.slane %v1603_v58, %v10752_v7  ;;  %v953_v17 = vcombine.high %v945_v63, %v945_v63  ;;  %v328_v62 = vld [vmem:[%s10757_s8 + $0x180] sm:$0xff] }
  0x62   : > { %v1866_v11 = vpack.c.bf16 %v1533_v57, %v1516_v52  ;;  %v936_v52 = vcombine.high %v928_v34, %v928_v34  ;;  %v1601_v3 = vcombine.low %v1593_v42, %v1600_v50  ;;  %4043 = vst.msk [vmem:[#allocation2 + $0x8] sm:$0x1] %vm4042_vm3, %v9338_v61  ;;  %4094 = vst.msk [vmem:[#allocation2 + $0xd4] sm:$0x1] %vm4042_vm3, %v9338_v61  ;;  %10425 = vmatprep.subr.msk.bf16.mxu1 %vm4264_vm4, %v4134_v24 }
  0x63   : > { %v993_v28 = vrot.slane %v979_v14, %v10752_v7  ;;  %v4266_v29 = vsel %vm4264_vm4, %v4134_v24, 0  ;;  %v1618_v30 = vcombine.low %v1610_v12, %v1617_v15  ;;  %v1636_v31 = vcombine.low %v937_v13, %v945_v63  ;;  %v329_v63 = vld [vmem:[%s10757_s8 + $0x188] sm:$0xff] }
  0x64   : > { %v1620_v4 = vcombine.low %v936_v52, %v935_v51  ;;  %v1868_v18 = vpack.c.bf16 %v1601_v3, %v1584_v54  ;;  %v994_v39 = vcombine.high %v986_v27, %v986_v27  ;;  %v1003_v43 = vcombine.high %v325_v26, %v325_v26 }
  0x65   : > { %v995_v40 = vcombine.high %v993_v28, %v993_v28  ;;  %v1644_v42 = vrot.slane %v1636_v31, %v10752_v7  ;;  %v1020_v44 = vcombine.high %v326_v37, %v326_v37  ;;  %v1027_v54 = vrot.slane %v326_v37, %v10752_v7 }
  0x66   : > { %v1634_v19 = vrot.slane %v1620_v4, %v10752_v7  ;;  %v10485_v33 = vld [vmem:[#allocation2] sm:$0xff]   ;;  %v1671_v50 = vcombine.low %v986_v27, %v994_v39  ;;  %v1017_v53 = vrot.slane %v1003_v43, %v10752_v7  ;;  %v1061_v12 = vcombine.high %v329_v63, %v329_v63 }
  0x67   : > { %v1687_v51 = vcombine.low %v993_v28, %v995_v40 }
  0x68   : > { %10036 = vmatmul.mubr.msk.bf16.gmra.mxu0 %vm1891_vm1, %v1864_v23  ;;  %v1772_v23 = vcombine.low %v10672_v55, %v1092_v9  ;;  %v322_v55 = vld [vmem:[%s10757_s8 + $0x150] sm:$0xff]  ;;  %v1635_v34 = vcombine.low %v1627_v16, %v1634_v19  ;;  %v1685_v0 = vrot.slane %v1671_v50, %v10752_v7  ;;  %v1051_v19 = vrot.slane %v328_v62, %v10752_v7 }
  0x69   : > { %10039 = vmatprep.mubr.msk.bf16.mxu0 %vm10686_vm0, %v10685_v2  ;;  %v969_v9 = vrot.slane %v322_v55, %v10752_v7  ;;  %v962_v10 = vcombine.high %v322_v55, %v322_v55  ;;  %v1034_v55 = vrot.slane %v1020_v44, %v10752_v7 }
  0x6a   : > { %v1780_v32 = vrot.slane %v1772_v23, %v10752_v7  ;;  %v1869_v45 = vpack.c.bf16 %v1635_v34, %v1618_v30  ;;  %v1059_v28 = vcombine.high %v1051_v19, %v1051_v19 }
  0x6b   : > { %v977_v21 = vcombine.high %v969_v9, %v969_v9  ;;  %v976_v22 = vrot.slane %v962_v10, %v10752_v7 }
  0x6c   : > { %v1788_v46 = vcombine.low %v1780_v32, %v1787_v35  ;;  %v1637_v32 = vcombine.low %v953_v17, %v952_v8  ;;  %v1653_v35 = vcombine.low %v954_v20, %v10674_v6  ;;  %v1019_v6 = vcombine.high %v1017_v53, %v1017_v53 }
  0x6d   : > { %v1654_v36 = vcombine.low %v969_v9, %v977_v21  ;;  %v978_v38 = vcombine.high %v976_v22, %v976_v22  ;;  %v1035_v8 = vcombine.high %v1027_v54, %v1027_v54  ;;  %v1036_v9 = vcombine.high %v1034_v55, %v1034_v55 }
  0x6e   : > { %v1874_v1 = vpack.c.bf16 %v1805_v56, %v1788_v46  ;;  %v1651_v46 = vrot.slane %v1637_v32, %v10752_v7  ;;  %v1661_v47 = vrot.slane %v1653_v35, %v10752_v7  ;;  %v9507_v56 = vld [vmem:[%s13253_s3 + $0x6] sm:$0x3]  ;;  %v1705_v16 = vcombine.low %v1019_v6, %v1027_v54 }
  0x6f   : > { %10428 = vmatprep.subr.msk.bf16.mxu0 %vm4264_vm4, %v9507_v56  ;;  %v5827_v60 = vsel %vm4264_vm4, %v9507_v56, 0  ;;  %v1721_v17 = vcombine.low %v1035_v8, %v1034_v55  ;;  %v1068_v21 = vrot.slane %v329_v63, %v10752_v7  ;;  %v1738_v34 = vcombine.low %v1051_v19, %v1059_v28 }
  0x70   : > { %10040 = vmatmul.mubr.msk.bf16.gmra.mxu0 %vm1891_vm1, %v1865_v48  ;;  %v9314_v48 = vld.sshfl [vmem:[%s10757_s8 + $0x1a8] sm:$0x3 pattern:$0x76325410]  ;;  %10076 = vmatmul.mubr.msk.bf16.vlgmr.msra.gmra.mxu1 %vm1891_vm1, %v1874_v1  ;;  %v1695_v1 = vrot.slane %v1687_v51, %v10752_v7  ;;  %v11055_v51 = vld [vmem:[%s13252_s2] ss:$0 sm:$0xff] }
  0x71   : > { %10043 = vmatprep.mubr.msk.bf16.mxu0 %vm10686_vm0, %v10685_v2  ;;  %v1806_v57 = vcombine.low %v1118_v49, %v9314_v48  ;;  %10079 = vmatprep.mubr.msk.bf16.mxu1 %vm10686_vm0, %v10685_v2  ;;  %v1668_v48 = vrot.slane %v1654_v36, %v10752_v7  ;;  %v1670_v49 = vcombine.low %v976_v22, %v978_v38 }
  0x72   : > { %10084 = vmatpush3.bf16.msra.mxu1 %v4266_v29  ;;  %10186 = vmatpush3.bf16.msra.mxu0 %v5827_v60  ;;  %v1075_v22 = vrot.slane %v1061_v12, %v10752_v7  ;;  %v1076_v30 = vcombine.high %v1068_v21, %v1068_v21  ;;  %v1746_v39 = vrot.slane %v1738_v34, %v10752_v7  ;;  %v11065_v12 = vadd.s32 16, %v10744_v5 }
  0x73   : > { %v1669_v58 = vcombine.low %v1661_v47, %v1668_v48  ;;  %v1678_v61 = vrot.slane %v1670_v49, %v10752_v7  ;;  %v11048_v48 = vld [vmem:[%s13253_s3 + $0x2] sm:$0x3] }
  0x74   : > { %v1077_v31 = vcombine.high %v1075_v22, %v1075_v22  ;;  %v1755_v36 = vcombine.low %v1068_v21, %v1076_v30  ;;  %10426 = vmatprep.subr.msk.bf16.mxu1 %vm4264_vm4, %v11048_v48  ;;  %vm2940_vm7 = vcmp.lt.s32.totalorder %v11065_v12, 17 }
  0x75   : > { %v1686_v13 = vcombine.low %v1678_v61, %v1685_v0 }
  0x76   : > { %v1756_v37 = vcombine.low %v1075_v22, %v1077_v31 }
  0x78   : > { %10044 = vmatmul.mubr.msk.bf16.gmra.mxu0 %vm1891_vm1, %v1866_v11  ;;  %v1813_v11 = vrot.slane %v1806_v57, %v10752_v7  ;;  %v1652_v57 = vcombine.low %v1644_v42, %v1651_v46  ;;  %v1770_v42 = vrot.slane %v1756_v37, %v10752_v7 }
  0x79   : > { %10047 = vmatprep.mubr.msk.bf16.mxu0 %vm10686_vm0, %v10685_v2 }
  0x7a   : > { %v1875_v23 = vpack.c.bf16 %v1813_v11, %v1813_v11  ;;  %v1870_v10 = vpack.c.bf16 %v1669_v58, %v1652_v57  ;;  %v1044_v11 = vcombine.high %v328_v62, %v328_v62 }
  0x7c   : > { %10080 = vmatmul.mubr.msk.bf16.gmra.mxu1 %vm1891_vm1, %v1875_v23  ;;  %v1058_v20 = vrot.slane %v1044_v11, %v10752_v7 }
  0x7d   : > { %10085 = vmatprep.mubr.msk.bf16.mxu1 %vm4215_vm5, %v10485_v33 }
  0x7e   : > { %v1060_v29 = vcombine.high %v1058_v20, %v1058_v20 }
  0x80   : > { %10048 = vmatmul.mubr.msk.bf16.gmra.mxu0 %vm1891_vm1, %v1867_v41  ;;  %v1010_v41 = vrot.slane %v325_v26, %v10752_v7  ;;  %v1729_v26 = vrot.slane %v1721_v17, %v10752_v7  ;;  %v1739_v35 = vcombine.low %v1058_v20, %v1060_v29 }
  0x81   : > { %10051 = vmatprep.mubr.msk.bf16.mxu0 %vm10686_vm0, %v10685_v2 }
  0x82   : > { %v1688_v52 = vcombine.low %v10675_v25, %v1010_v41  ;;  %v1018_v4 = vcombine.high %v1010_v41, %v1010_v41  ;;  %v1719_v25 = vrot.slane %v1705_v16, %v10752_v7  ;;  %v1753_v40 = vrot.slane %v1739_v35, %v10752_v7 }
  0x83   : > { %v1763_v41 = vrot.slane %v1755_v36, %v10752_v7 }
  0x84   : > { %v1702_v3 = vrot.slane %v1688_v52, %v10752_v7  ;;  %v1704_v15 = vcombine.low %v1018_v4, %v1017_v53  ;;  %v1754_v43 = vcombine.low %v1746_v39, %v1753_v40 }
  0x85   : > { %v1771_v44 = vcombine.low %v1763_v41, %v1770_v42 }
  0x86   : > { %v1703_v14 = vcombine.low %v1695_v1, %v1702_v3  ;;  %v1712_v24 = vrot.slane %v1704_v15, %v10752_v7 }
  0x88   : > { %10052 = vmatmul.mubr.msk.bf16.gmra.mxu0 %vm1891_vm1, %v1868_v18  ;;  %v1722_v18 = vcombine.low %v1036_v9, %v10676_v59  ;;  %v1871_v23 = vpack.c.bf16 %v1703_v14, %v1686_v13  ;;  %v1720_v32 = vcombine.low %v1712_v24, %v1719_v25 }
  0x89   : > { %10055 = vmatprep.mubr.msk.bf16.mxu0 %vm10686_vm0, %v10685_v2 }
  0x8a   : > { %v1736_v27 = vrot.slane %v1722_v18, %v10752_v7 }
  0x8c   : > { %v1737_v33 = vcombine.low %v1729_v26, %v1736_v27 }
  0x8e   : > { %v1872_v38 = vpack.c.bf16 %v1737_v33, %v1720_v32 }
  0x90   : > { %10056 = vmatmul.mubr.msk.bf16.gmra.mxu0 %vm1891_vm1, %v1869_v45  ;;  %v1873_v45 = vpack.c.bf16 %v1771_v44, %v1754_v43 }
  0x91   : > { %10059 = vmatprep.mubr.msk.bf16.mxu0 %vm10686_vm0, %v10685_v2 }
  0x98   : > { %10060 = vmatmul.mubr.msk.bf16.gmra.mxu0 %vm1891_vm1, %v1870_v10 }
  0x99   : > { %10063 = vmatprep.mubr.msk.bf16.mxu0 %vm10686_vm0, %v10685_v2 }
  0xa0   : > { %10064 = vmatmul.mubr.msk.bf16.gmra.mxu0 %vm1891_vm1, %v1871_v23 }
  0xa1   : > { %10067 = vmatprep.mubr.msk.bf16.mxu0 %vm10686_vm0, %v10685_v2 }
  0xa8   : > { %10068 = vmatmul.mubr.msk.bf16.gmra.mxu0 %vm1891_vm1, %v1872_v38 }
  0xa9   : > { %10071 = vmatprep.mubr.msk.bf16.mxu0 %vm10686_vm0, %v10685_v2 }
  0xb0   : > { %10072 = vmatmul.mubr.msk.bf16.gmra.mxu0 %vm1891_vm1, %v1873_v45 }
  0xe0   : > { %v1989_v46 = vpop.f32.mrf.mxu0 }
  0xe2   : > { %v10001_v47 = vpop.f32.mrf.mxu0 }
  0xe4   : > { %v1992_v49 = vpop.f32.mrf.mxu0 }
  0xe6   : > { %v10002_v50 = vpop.f32.mrf.mxu0 }
  0xe8   : > { %v1997_v2 = vpop.f32.mrf.mxu0 }
  0xe9   : > { %v1998_v52 = vadd.f32 %v11055_v51, %v1997_v2 }
  0xea   : > { %v10005_v53 = vpop.f32.mrf.mxu0 }
  0xeb   : > { %v2157_v54 = vmax.f32 %v1998_v52, 0.0 }
  0xec   : > { %v2000_v55 = vpop.f32.mrf.mxu0 }
  0xed   : > { %v2271_v56 = vcombine.high %v2157_v54, %v2157_v54  ;;  %v2278_v57 = vrot.slane %v2157_v54, %v10752_v7  ;;  %v2001_v58 = vadd.f32 %v11055_v51, %v2000_v55 }
  0xee   : > { %v10006_v59 = vpop.f32.mrf.mxu0 }
  0xef   : > { %v2285_v60 = vrot.slane %v2271_v56, %v10752_v7  ;;  %v2286_v61 = vcombine.high %v2278_v57, %v2278_v57  ;;  %v2158_v62 = vmax.f32 %v2001_v58, 0.0 }
  0xf0   : > { %v2005_v63 = vpop.f32.mrf.mxu0 }
  0xf1   : > { %v3000_v0 = vcombine.low %v2286_v61, %v2285_v60  ;;  %v2287_v1 = vcombine.high %v2285_v60, %v2285_v60  ;;  %v2288_v3 = vcombine.high %v2158_v62, %v2158_v62  ;;  %v2295_v4 = vrot.slane %v2158_v62, %v10752_v7 }
  0xf2   : > { %v2006_v6 = vadd.f32 %v11055_v51, %v2005_v63  ;;  %v10009_v8 = vpop.f32.mrf.mxu0 }
  0xf3   : > { %v2302_v9 = vrot.slane %v2288_v3, %v10752_v7  ;;  %v2303_v10 = vcombine.high %v2295_v4, %v2295_v4  ;;  %v3001_v11 = vcombine.low %v2287_v1, %v2295_v4  ;;  %v3008_v13 = vrot.slane %v3000_v0, %v10752_v7 }
  0xf4   : > { %v2159_v14 = vmax.f32 %v2006_v6, 0.0  ;;  %v2008_v15 = vpop.f32.mrf.mxu0 }
  0xf5   : > { %v3015_v16 = vrot.slane %v3001_v11, %v10752_v7  ;;  %v3017_v17 = vcombine.low %v2303_v10, %v2302_v9  ;;  %v2304_v18 = vcombine.high %v2302_v9, %v2302_v9  ;;  %v2009_v19 = vadd.f32 %v11055_v51, %v2008_v15 }
  0xf6   : > { %v2305_v20 = vcombine.high %v2159_v14, %v2159_v14  ;;  %v2312_v21 = vrot.slane %v2159_v14, %v10752_v7  ;;  %v10010_v22 = vpop.f32.mrf.mxu0 }
  0xf7   : > { %v3016_v23 = vcombine.low %v3008_v13, %v3015_v16  ;;  %v2160_v24 = vmax.f32 %v2009_v19, 0.0  ;;  %v3025_v25 = vrot.slane %v3017_v17, %v10752_v7 }
  0xf8   : > { %v2319_v26 = vrot.slane %v2305_v20, %v10752_v7  ;;  %v2320_v27 = vcombine.high %v2312_v21, %v2312_v21  ;;  %v3018_v28 = vcombine.low %v2304_v18, %v2312_v21  ;;  %v2013_v29 = vpop.f32.mrf.mxu0 }
  0xf9   : > { %v3754_v30 = vsel %vm2929_vm6, %v3016_v23, 0.0  ;;  %v2322_v31 = vcombine.high %v2160_v24, %v2160_v24  ;;  %v2329_v32 = vrot.slane %v2160_v24, %v10752_v7  ;;  %v2014_v33 = vadd.f32 %v11055_v51, %v2013_v29 }
  0xfa   : > { %v9757_v34 = vpack.c.bf16 %v3754_v30, %v3754_v30  ;;  %v2321_v35 = vcombine.high %v2319_v26, %v2319_v26  ;;  %v3032_v36 = vrot.slane %v3018_v28, %v10752_v7  ;;  %v3040_v37 = vrot.slane %v2320_v27, %v10752_v7  ;;  %v10013_v38 = vpop.f32.mrf.mxu0 }
  0xfb   : > { %v2336_v39 = vrot.slane %v2322_v31, %v10752_v7  ;;  %v2337_v40 = vcombine.high %v2329_v32, %v2329_v32  ;;  %v2161_v41 = vmax.f32 %v2014_v33, 0.0  ;;  %v4995_v30 = vsel %vm4264_vm4, %v11048_v48, 0 }
  0xfc   : > { %4044 = vst.msk [vmem:[#allocation2 + $0xc] sm:$0xf] %vm4039_vm2, %v9757_v34  ;;  %v3033_v42 = vcombine.low %v3025_v25, %v3032_v36  ;;  %v3041_v43 = vcombine.low %v2319_v26, %v2321_v35  ;;  %v3756_v44 = vsel %vm2940_vm7, %v3040_v37, 0.0  ;;  %v2016_v45 = vpop.f32.mrf.mxu0  ;;  %v11105_v25 = vld [vmem:[#allocation2] sm:$0xf] }
  0xfd   : > { %v9759_v46 = vpack.c.bf16 %v3756_v44, %v3756_v44  ;;  %v2338_v47 = vcombine.high %v2336_v39, %v2336_v39  ;;  %v3042_v49 = vcombine.low %v2329_v32, %v2337_v40  ;;  %v2339_v50 = vcombine.high %v2161_v41, %v2161_v41  ;;  %v9474_v40 = vld [vmem:[%s13253_s3 + $0x4] sm:$0x3] }
  0xfe   : > { %v9758_v2 = vpack.c.bf16 %v3033_v42, %v3033_v42  ;;  %v2346_v52 = vrot.slane %v2161_v41, %v10752_v7  ;;  %v2017_v53 = vadd.f32 %v11055_v51, %v2016_v45  ;;  %v10014_v54 = vpop.f32.mrf.mxu0  ;;  %v3049_v55 = vrot.slane %v3041_v43, %v10752_v7 }
  0xff   : > { %4046 = vst.msk [vmem:[#allocation2 + $0x14] sm:$0x1] %vm4042_vm3, %v9759_v46  ;;  %v3056_v56 = vrot.slane %v3042_v49, %v10752_v7  ;;  %v3058_v57 = vcombine.low %v2336_v39, %v2338_v47  ;;  %v2353_v58 = vrot.slane %v2339_v50, %v10752_v7  ;;  %v4513_v44 = vshrl.u32 %v11105_v25, 16 }
 0x100   : > { %4045 = vst.msk [vmem:[#allocation2 + $0x10] sm:$0xf] %vm4039_vm2, %v9758_v2  ;;  %v2354_v59 = vcombine.high %v2346_v52, %v2346_v52  ;;  %v2162_v60 = vmax.f32 %v2017_v53, 0.0  ;;  %v2021_v61 = vpop.f32.mrf.mxu0  ;;  %v4516_v49 = vshll.u32 %v11105_v25, 16 }
 0x101   : > { %v3057_v62 = vcombine.low %v3049_v55, %v3056_v56  ;;  %v3081_v63 = vrot.slane %v2353_v58, %v10752_v7  ;;  %v2355_v0 = vcombine.high %v2353_v58, %v2353_v58  ;;  %v2022_v6 = vadd.f32 %v11055_v51, %v2021_v61 }
 0x102   : > { %v3059_v1 = vcombine.low %v2346_v52, %v2354_v59  ;;  %v2356_v3 = vcombine.high %v2162_v60, %v2162_v60  ;;  %v2363_v4 = vrot.slane %v2162_v60, %v10752_v7  ;;  %v10017_v8 = vpop.f32.mrf.mxu0  ;;  %v3066_v9 = vrot.slane %v3058_v57, %v10752_v7 }
 0x103   : > { %v3757_v10 = vsel %vm2929_vm6, %v3057_v62, 0.0  ;;  %v3759_v11 = vsel %vm2940_vm7, %v3081_v63, 0.0  ;;  %v2163_v20 = vmax.f32 %v2022_v6, 0.0 }
 0x104   : > { %v9760_v13 = vpack.c.bf16 %v3757_v10, %v3757_v10  ;;  %v3073_v14 = vrot.slane %v3059_v1, %v10752_v7  ;;  %v9762_v15 = vpack.c.bf16 %v3759_v11, %v3759_v11  ;;  %v2370_v16 = vrot.slane %v2356_v3, %v10752_v7  ;;  %v2024_v17 = vpop.f32.mrf.mxu0 }
 0x105   : > { %v2371_v18 = vcombine.high %v2363_v4, %v2363_v4  ;;  %v3082_v19 = vcombine.low %v2355_v0, %v2363_v4  ;;  %v2025_v21 = vadd.f32 %v11055_v51, %v2024_v17  ;;  %v2373_v27 = vcombine.high %v2163_v20, %v2163_v20 }
 0x106   : > { %4047 = vst.msk [vmem:[#allocation2 + $0x18] sm:$0xf] %vm4039_vm2, %v9760_v13  ;;  %v3074_v22 = vcombine.low %v3066_v9, %v3073_v14  ;;  %v2372_v23 = vcombine.high %v2370_v16, %v2370_v16  ;;  %v10018_v24 = vpop.f32.mrf.mxu0  ;;  %v2380_v28 = vrot.slane %v2163_v20, %v10752_v7  ;;  %v11136_v11 = vrot.slane %v4513_v44, 4 }
 0x107   : > { %4049 = vst.msk [vmem:[#allocation2 + $0x20] sm:$0x1] %vm4042_vm3, %v9762_v15  ;;  %v3083_v26 = vcombine.low %v2371_v18, %v2370_v16  ;;  %v10486_v29 = vld [vmem:[#allocation2 + $0xc] sm:$0xff]   ;;  %v3090_v32 = vrot.slane %v3082_v19, %v10752_v7  ;;  %v2164_v33 = vmax.f32 %v2025_v21, 0.0  ;;  %v2387_v37 = vrot.slane %v2373_v27, %v10752_v7  ;;  %v9589_v24 = vld [vmem:[%s13253_s3 + $0xa] sm:$0x3] }
 0x108   : > { %v9761_v31 = vpack.c.bf16 %v3074_v22, %v3074_v22  ;;  %v2029_v34 = vpop.f32.mrf.mxu0  ;;  %v10487_v35 = vld [vmem:[#allocation2 + $0xc] sm:$0xff]   ;;  %v2388_v38 = vcombine.high %v2380_v28, %v2380_v28  ;;  %v3099_v39 = vcombine.low %v2372_v23, %v2380_v28  ;;  %10086 = vmatmul.mubr.msk.bf16.vlgmr.msra.gmra.mxu1 %vm4215_vm5, %v10486_v29  ;;  %10430 = vmatprep.subr.msk.bf16.mxu0 %vm4264_vm4, %v9589_v24 }
 0x109   : > { %v3097_v36 = vrot.slane %v3083_v26, %v10752_v7  ;;  %v2390_v48 = vcombine.high %v2164_v33, %v2164_v33  ;;  %v2397_v41 = vrot.slane %v2164_v33, %v10752_v7  ;;  %v2030_v42 = vadd.f32 %v11055_v51, %v2029_v34  ;;  %10187 = vmatprep.mubr.msk.bf16.mxu0 %vm4215_vm5, %v10487_v35  ;;  %v4462_v33 = vld [vmem:[#allocation2 + $0x4] sm:$0xf] }
 0x10a   : > { %4048 = vst.msk [vmem:[#allocation2 + $0x1c] sm:$0xf] %vm4039_vm2, %v9761_v31  ;;  %v10021_v43 = vpop.f32.mrf.mxu0  ;;  %10118 = vmatpush3.bf16.msra.mxu1 %v4995_v30  ;;  %v2389_v46 = vcombine.high %v2387_v37, %v2387_v37  ;;  %v3100_v47 = vcombine.low %v2388_v38, %v2387_v37  ;;  %v3107_v50 = vrot.slane %v3099_v39, %v10752_v7  ;;  %v4518_v34 = vrot.slane %v4516_v49, 5 }
 0x10b   : > { %v3098_v45 = vcombine.low %v3090_v32, %v3097_v36  ;;  %10427 = vmatprep.subr.msk.bf16.mxu1 %vm4264_vm4, %v9474_v40  ;;  %v2404_v2 = vrot.slane %v2390_v48, %v10752_v7  ;;  %v2405_v52 = vcombine.high %v2397_v41, %v2397_v41  ;;  %v2165_v53 = vmax.f32 %v2030_v42, 0.0 }
 0x10c   : > { %v2032_v54 = vpop.f32.mrf.mxu0  ;;  %v3114_v56 = vrot.slane %v3100_v47, %v10752_v7  ;;  %v3122_v57 = vrot.slane %v2389_v46, %v10752_v7  ;;  %v4522_v46 = vshll.u32 %v4462_v33, 16 }
 0x10d   : > { %v3760_v55 = vsel %vm2929_vm6, %v3098_v45, 0.0  ;;  %v2033_v58 = vadd.f32 %v11055_v51, %v2032_v54  ;;  %v2406_v60 = vcombine.high %v2404_v2, %v2404_v2  ;;  %v3123_v61 = vcombine.low %v2397_v41, %v2405_v52 }
 0x10e   : > { %v9763_v59 = vpack.c.bf16 %v3760_v55, %v3760_v55  ;;  %v2407_v62 = vcombine.high %v2165_v53, %v2165_v53  ;;  %v10022_v63 = vpop.f32.mrf.mxu0  ;;  %v3115_v0 = vcombine.low %v3107_v50, %v3114_v56  ;;  %v3762_v1 = vsel %vm2940_vm7, %v3122_v57, 0.0 }
 0x10f   : > { %v2414_v3 = vrot.slane %v2165_v53, %v10752_v7  ;;  %v2166_v4 = vmax.f32 %v2033_v58, 0.0  ;;  %v9765_v6 = vpack.c.bf16 %v3762_v1, %v3762_v1  ;;  %v3124_v8 = vcombine.low %v2404_v2, %v2406_v60 }
 0x110   : > { %4050 = vst.msk [vmem:[#allocation2 + $0x24] sm:$0xf] %vm4039_vm2, %v9763_v59  ;;  %v2421_v9 = vrot.slane %v2407_v62, %v10752_v7  ;;  %v2037_v10 = vpop.f32.mrf.mxu0  ;;  %v9764_v13 = vpack.c.bf16 %v3115_v0, %v3115_v0  ;;  %v3131_v18 = vrot.slane %v3123_v61, %v10752_v7  ;;  %v4519_v2 = vor.u32 %v4518_v34, %v11136_v11 }
 0x111   : > { %v2422_v14 = vcombine.high %v2414_v3, %v2414_v3  ;;  %v2424_v15 = vcombine.high %v2166_v4, %v2166_v4  ;;  %v2431_v16 = vrot.slane %v2166_v4, %v10752_v7  ;;  %v10488_v17 = vld [vmem:[#allocation2 + $0x18] sm:$0xff]   ;;  %4052 = vst.msk [vmem:[#allocation2 + $0x2c] sm:$0x1] %vm4042_vm3, %v9765_v6  ;;  %v3138_v19 = vrot.slane %v3124_v8, %v10752_v7 }
 0x112   : > { %v2423_v20 = vcombine.high %v2421_v9, %v2421_v9  ;;  %v2038_v21 = vadd.f32 %v11055_v51, %v2037_v10  ;;  %v10025_v22 = vpop.f32.mrf.mxu0  ;;  %v10489_v23 = vld [vmem:[#allocation2 + $0x18] sm:$0xff]   ;;  %4051 = vst.msk [vmem:[#allocation2 + $0x28] sm:$0xf] %vm4039_vm2, %v9764_v13  ;;  %10089 = vmatprep.mubr.msk.bf16.mxu1 %vm4215_vm5, %v10488_v17  ;;  %v4526_v52 = vshrl.u32 %v4462_v33, 16  ;;  %v11170_v8 = vrot.slane %v4519_v2, 4 }
 0x113   : > { %v3140_v25 = vcombine.low %v2414_v3, %v2422_v14  ;;  %v2438_v26 = vrot.slane %v2424_v15, %v10752_v7  ;;  %v2439_v27 = vcombine.high %v2431_v16, %v2431_v16  ;;  %v3163_v28 = vrot.slane %v2431_v16, %v10752_v7  ;;  %10188 = vmatmul.mubr.msk.bf16.vlgmr.msra.gmra.mxu0 %vm4215_vm5, %v10489_v23 }
 0x114   : > { %v3139_v29 = vcombine.low %v3131_v18, %v3138_v19  ;;  %v3141_v30 = vcombine.low %v2421_v9, %v2423_v20  ;;  %v2167_v31 = vmax.f32 %v2038_v21, 0.0  ;;  %v2040_v32 = vpop.f32.mrf.mxu0  ;;  %v11172_v9 = vrot.slane %v4522_v46, 5 }
 0x115   : > { %v3148_v35 = vrot.slane %v3140_v25, %v10752_v7  ;;  %v3164_v36 = vcombine.low %v2439_v27, %v2438_v26  ;;  %v3765_v37 = vsel %vm2940_vm7, %v3163_v28, 0.0  ;;  %v2440_v38 = vcombine.high %v2438_v26, %v2438_v26 }
 0x116   : > { %v3763_v39 = vsel %vm2929_vm6, %v3139_v29, 0.0  ;;  %v3155_v40 = vrot.slane %v3141_v30, %v10752_v7  ;;  %v9768_v48 = vpack.c.bf16 %v3765_v37, %v3765_v37  ;;  %v2441_v41 = vcombine.high %v2167_v31, %v2167_v31  ;;  %v10026_v42 = vpop.f32.mrf.mxu0 }
 0x117   : > { %v9766_v43 = vpack.c.bf16 %v3763_v39, %v3763_v39  ;;  %v2448_v44 = vrot.slane %v2167_v31, %v10752_v7  ;;  %v2041_v45 = vadd.f32 %v11055_v51, %v2040_v32  ;;  %v3172_v58 = vrot.slane %v3164_v36, %v10752_v7 }
 0x118   : > { %v3156_v47 = vcombine.low %v3148_v35, %v3155_v40  ;;  %4055 = vst.msk [vmem:[#allocation2 + $0x38] sm:$0x1] %vm4042_vm3, %v9768_v48  ;;  %v2455_v49 = vrot.slane %v2441_v41, %v10752_v7  ;;  %v2045_v50 = vpop.f32.mrf.mxu0  ;;  %v11176_v14 = vrot.slane %v4526_v52, 4 }
 0x119   : > { %4053 = vst.msk [vmem:[#allocation2 + $0x30] sm:$0xf] %vm4039_vm2, %v9766_v43  ;;  %v2456_v53 = vcombine.high %v2448_v44, %v2448_v44  ;;  %v3165_v54 = vcombine.low %v2440_v38, %v2448_v44  ;;  %v2168_v55 = vmax.f32 %v2041_v45, 0.0  ;;  %v2046_v56 = vadd.f32 %v11055_v51, %v2045_v50  ;;  %v10490_v61 = vld [vmem:[#allocation2 + $0x24] sm:$0xff]   ;;  %v11190_v38 = vld [vmem:[#allocation2 + $0xc] sm:$0xf] }
 0x11a   : > { %v9767_v57 = vpack.c.bf16 %v3156_v47, %v3156_v47  ;;  %v2457_v59 = vcombine.high %v2455_v49, %v2455_v49  ;;  %v10029_v60 = vpop.f32.mrf.mxu0  ;;  %v10491_v3 = vld [vmem:[#allocation2 + $0x24] sm:$0xff]   ;;  %10090 = vmatmul.mubr.msk.bf16.gmra.mxu1 %vm4215_vm5, %v10490_v61 }
 0x11b   : > { %v3179_v62 = vrot.slane %v3165_v54, %v10752_v7  ;;  %v3181_v63 = vcombine.low %v2456_v53, %v2455_v49  ;;  %v2458_v0 = vcombine.high %v2168_v55, %v2168_v55  ;;  %v2465_v1 = vrot.slane %v2168_v55, %v10752_v7  ;;  %10191 = vmatprep.mubr.msk.bf16.mxu0 %vm4215_vm5, %v10491_v3 }
 0x11c   : > { %4054 = vst.msk [vmem:[#allocation2 + $0x34] sm:$0xf] %vm4039_vm2, %v9767_v57  ;;  %v2169_v4 = vmax.f32 %v2046_v56, 0.0  ;;  %v2048_v6 = vpop.f32.mrf.mxu0  ;;  %v4529_v56 = vor.u32 %v11176_v14, %v11172_v9  ;;  %v4537_v57 = vshrl.u32 %v11190_v38, 16 }
 0x11d   : > { %v3180_v10 = vcombine.low %v3172_v58, %v3179_v62  ;;  %v2472_v11 = vrot.slane %v2458_v0, %v10752_v7  ;;  %v2473_v13 = vcombine.high %v2465_v1, %v2465_v1  ;;  %v3182_v15 = vcombine.low %v2457_v59, %v2465_v1 }
 0x11e   : > { %v2475_v16 = vcombine.high %v2169_v4, %v2169_v4  ;;  %v2482_v17 = vrot.slane %v2169_v4, %v10752_v7  ;;  %v2049_v18 = vadd.f32 %v11055_v51, %v2048_v6  ;;  %v10030_v19 = vpop.f32.mrf.mxu0  ;;  %v3189_v20 = vrot.slane %v3181_v63, %v10752_v7  ;;  %v11210_v4 = vld [vmem:[#allocation2 + $0x8] sm:$0x1] }
 0x11f   : > { %v3766_v21 = vsel %vm2929_vm6, %v3180_v10, 0.0  ;;  %v2474_v22 = vcombine.high %v2472_v11, %v2472_v11  ;;  %v3204_v23 = vrot.slane %v2473_v13, %v10752_v7  ;;  %v3196_v25 = vrot.slane %v3182_v15, %v10752_v7 }
 0x120   : > { %v9769_v24 = vpack.c.bf16 %v3766_v21, %v3766_v21  ;;  %v2489_v26 = vrot.slane %v2475_v16, %v10752_v7  ;;  %v2490_v27 = vcombine.high %v2482_v17, %v2482_v17  ;;  %v2053_v28 = vpop.f32.mrf.mxu0  ;;  %v2170_v31 = vmax.f32 %v2049_v18, 0.0 }
 0x121   : > { %v3205_v29 = vcombine.low %v2472_v11, %v2474_v22  ;;  %v3768_v30 = vsel %vm2940_vm7, %v3204_v23, 0.0  ;;  %v2054_v32 = vadd.f32 %v11055_v51, %v2053_v28  ;;  %v3197_v33 = vcombine.low %v3189_v20, %v3196_v25 }
 0x122   : > { %4056 = vst.msk [vmem:[#allocation2 + $0x3c] sm:$0xf] %vm4039_vm2, %v9769_v24  ;;  %v9771_v34 = vpack.c.bf16 %v3768_v30, %v3768_v30  ;;  %v2491_v35 = vcombine.high %v2489_v26, %v2489_v26  ;;  %v3206_v36 = vcombine.low %v2482_v17, %v2490_v27  ;;  %v10033_v37 = vpop.f32.mrf.mxu0  ;;  %v2492_v39 = vcombine.high %v2170_v31, %v2170_v31 }
 0x123   : > { %v2499_v40 = vrot.slane %v2170_v31, %v10752_v7  ;;  %v2171_v48 = vmax.f32 %v2054_v32, 0.0  ;;  %v10492_v41 = vld [vmem:[#allocation2 + $0x30] sm:$0xff]   ;;  %v3213_v42 = vrot.slane %v3205_v29, %v10752_v7  ;;  %v9770_v43 = vpack.c.bf16 %v3197_v33, %v3197_v33 }
 0x124   : > { %4058 = vst.msk [vmem:[#allocation2 + $0x44] sm:$0x1] %vm4042_vm3, %v9771_v34  ;;  %v3220_v44 = vrot.slane %v3206_v36, %v10752_v7  ;;  %v3222_v45 = vcombine.low %v2489_v26, %v2491_v35  ;;  %v2056_v46 = vpop.f32.mrf.mxu0  ;;  %v10493_v47 = vld [vmem:[#allocation2 + $0x30] sm:$0xff]   ;;  %v2506_v49 = vrot.slane %v2492_v39, %v10752_v7  ;;  %10093 = vmatprep.mubr.msk.bf16.mxu1 %vm4215_vm5, %v10492_v41  ;;  %v4532_v23 = vshll.u32 %v11210_v4, 16 }
 0x125   : > { %v2507_v50 = vcombine.high %v2499_v40, %v2499_v40  ;;  %v2509_v2 = vcombine.high %v2171_v48, %v2171_v48  ;;  %v2516_v52 = vrot.slane %v2171_v48, %v10752_v7  ;;  %4057 = vst.msk [vmem:[#allocation2 + $0x40] sm:$0xf] %vm4039_vm2, %v9770_v43  ;;  %v2057_v54 = vadd.f32 %v11055_v51, %v2056_v46 }
 0x126   : > { %v3221_v53 = vcombine.low %v3213_v42, %v3220_v44  ;;  %10192 = vmatmul.mubr.msk.bf16.gmra.mxu0 %vm4215_vm5, %v10493_v47  ;;  %v10034_v55 = vpop.f32.mrf.mxu0  ;;  %v3245_v59 = vrot.slane %v2506_v49, %v10752_v7  ;;  %v2508_v60 = vcombine.high %v2506_v49, %v2506_v49  ;;  %v3230_v62 = vrot.slane %v3222_v45, %v10752_v7 }
 0x127   : > { %v3223_v58 = vcombine.low %v2499_v40, %v2507_v50  ;;  %v2523_v61 = vrot.slane %v2509_v2, %v10752_v7  ;;  %v2524_v0 = vcombine.high %v2516_v52, %v2516_v52  ;;  %v2172_v1 = vmax.f32 %v2057_v54, 0.0 }
 0x128   : > { %v3769_v63 = vsel %vm2929_vm6, %v3221_v53, 0.0  ;;  %v2061_v3 = vpop.f32.mrf.mxu0  ;;  %v3771_v11 = vsel %vm2940_vm7, %v3245_v59, 0.0  ;;  %v3246_v13 = vcombine.low %v2508_v60, %v2516_v52  ;;  %v4540_v28 = vshll.u32 %v11190_v38, 16 }
 0x129   : > { %v9772_v6 = vpack.c.bf16 %v3769_v63, %v3769_v63  ;;  %v3237_v10 = vrot.slane %v3223_v58, %v10752_v7  ;;  %v9774_v15 = vpack.c.bf16 %v3771_v11, %v3771_v11  ;;  %v3247_v16 = vcombine.low %v2524_v0, %v2523_v61 }
 0x12a   : > { %v2525_v17 = vcombine.high %v2523_v61, %v2523_v61  ;;  %v2526_v18 = vcombine.high %v2172_v1, %v2172_v1  ;;  %v10037_v19 = vpop.f32.mrf.mxu0  ;;  %v2533_v21 = vrot.slane %v2172_v1, %v10752_v7  ;;  %v2062_v22 = vadd.f32 %v11055_v51, %v2061_v3 }
 0x12b   : > { %4059 = vst.msk [vmem:[#allocation2 + $0x48] sm:$0xf] %vm4039_vm2, %v9772_v6  ;;  %v3238_v20 = vcombine.low %v3230_v62, %v3237_v10  ;;  %v3254_v24 = vrot.slane %v3246_v13, %v10752_v7  ;;  %v3261_v25 = vrot.slane %v3247_v16, %v10752_v7  ;;  %v11225_v40 = vrot.slane %v4537_v57, 4 }
 0x12c   : > { %4061 = vst.msk [vmem:[#allocation2 + $0x50] sm:$0x1] %vm4042_vm3, %v9774_v15  ;;  %v2540_v26 = vrot.slane %v2526_v18, %v10752_v7  ;;  %v2064_v27 = vpop.f32.mrf.mxu0  ;;  %v2541_v30 = vcombine.high %v2533_v21, %v2533_v21  ;;  %v3263_v31 = vcombine.low %v2525_v17, %v2533_v21  ;;  %v2173_v32 = vmax.f32 %v2062_v22, 0.0  ;;  %v10494_v33 = vld [vmem:[#allocation2 + $0x3c] sm:$0xff]  }
 0x12d   : > { %v9773_v29 = vpack.c.bf16 %v3238_v20, %v3238_v20  ;;  %v3262_v34 = vcombine.low %v3254_v24, %v3261_v25  ;;  %v2065_v36 = vadd.f32 %v11055_v51, %v2064_v27  ;;  %v10495_v37 = vld [vmem:[#allocation2 + $0x3c] sm:$0xff]   ;;  %10094 = vmatmul.mubr.msk.bf16.gmra.mxu1 %vm4215_vm5, %v10494_v33  ;;  %v11230_v38 = vrot.slane %v4540_v28, 5  ;;  %v4465_v33 = vld [vmem:[#allocation2 + $0x10] sm:$0xf] }
 0x12e   : > { %v2542_v35 = vcombine.high %v2540_v26, %v2540_v26  ;;  %v10038_v39 = vpop.f32.mrf.mxu0  ;;  %v3264_v48 = vcombine.low %v2541_v30, %v2540_v26  ;;  %v2543_v41 = vcombine.high %v2173_v32, %v2173_v32  ;;  %v2550_v42 = vrot.slane %v2173_v32, %v10752_v7  ;;  %10195 = vmatprep.mubr.msk.bf16.mxu0 %vm4215_vm5, %v10495_v37 }
 0x12f   : > { %4060 = vst.msk [vmem:[#allocation2 + $0x4c] sm:$0xf] %vm4039_vm2, %v9773_v29  ;;  %v3772_v43 = vsel %vm2929_vm6, %v3262_v34, 0.0  ;;  %v3271_v44 = vrot.slane %v3263_v31, %v10752_v7  ;;  %v2174_v46 = vmax.f32 %v2065_v36, 0.0  ;;  %v11248_v4 = vrot.slane %v4529_v56, 4 }
 0x130   : > { %v3286_v45 = vrot.slane %v2542_v35, %v10752_v7  ;;  %v2069_v47 = vpop.f32.mrf.mxu0  ;;  %v9775_v49 = vpack.c.bf16 %v3772_v43, %v3772_v43  ;;  %v3278_v50 = vrot.slane %v3264_v48, %v10752_v7  ;;  %v2557_v2 = vrot.slane %v2543_v41, %v10752_v7 }
 0x131   : > { %v2558_v52 = vcombine.high %v2550_v42, %v2550_v42  ;;  %v2560_v54 = vcombine.high %v2174_v46, %v2174_v46  ;;  %v2567_v55 = vrot.slane %v2174_v46, %v10752_v7  ;;  %v2070_v57 = vadd.f32 %v11055_v51, %v2069_v47 }
 0x132   : > { %v3774_v53 = vsel %vm2940_vm7, %v3286_v45, 0.0  ;;  %v10041_v58 = vpop.f32.mrf.mxu0  ;;  %4062 = vst.msk [vmem:[#allocation2 + $0x54] sm:$0xf] %vm4039_vm2, %v9775_v49  ;;  %v3279_v59 = vcombine.low %v3271_v44, %v3278_v50  ;;  %v2559_v61 = vcombine.high %v2557_v2, %v2557_v2  ;;  %v11252_v13 = vrot.slane %v4532_v23, 5 }
 0x133   : > { %v9777_v60 = vpack.c.bf16 %v3774_v53, %v3774_v53  ;;  %v3287_v62 = vcombine.low %v2550_v42, %v2558_v52  ;;  %v2574_v63 = vrot.slane %v2560_v54, %v10752_v7  ;;  %v2575_v0 = vcombine.high %v2567_v55, %v2567_v55 }
 0x134   : > { %v2175_v1 = vmax.f32 %v2070_v57, 0.0  ;;  %v2072_v3 = vpop.f32.mrf.mxu0  ;;  %v9776_v6 = vpack.c.bf16 %v3279_v59, %v3279_v59  ;;  %v3288_v10 = vcombine.low %v2557_v2, %v2559_v61  ;;  %v4543_v24 = vor.u32 %v11230_v38, %v11225_v40 }
 0x135   : > { %4064 = vst.msk [vmem:[#allocation2 + $0x5c] sm:$0x1] %vm4042_vm3, %v9777_v60  ;;  %v2073_v11 = vadd.f32 %v11055_v51, %v2072_v3  ;;  %v2576_v15 = vcombine.high %v2574_v63, %v2574_v63  ;;  %v3304_v16 = vcombine.low %v2567_v55, %v2575_v0  ;;  %v3295_v14 = vrot.slane %v3287_v62, %v10752_v7 }
 0x136   : > { %v2577_v17 = vcombine.high %v2175_v1, %v2175_v1  ;;  %v2584_v18 = vrot.slane %v2175_v1, %v10752_v7  ;;  %v10042_v19 = vpop.f32.mrf.mxu0  ;;  %v10496_v20 = vld [vmem:[#allocation2 + $0x48] sm:$0xff]   ;;  %4063 = vst.msk [vmem:[#allocation2 + $0x58] sm:$0xf] %vm4039_vm2, %v9776_v6  ;;  %v3302_v56 = vrot.slane %v3288_v10, %v10752_v7  ;;  %v4546_v46 = vshll.u32 %v4465_v33, 16 }
 0x137   : > { %v2176_v21 = vmax.f32 %v2073_v11, 0.0  ;;  %v10497_v22 = vld [vmem:[#allocation2 + $0x48] sm:$0xff]   ;;  %v3305_v23 = vcombine.low %v2574_v63, %v2576_v15  ;;  %v3312_v25 = vrot.slane %v3304_v16, %v10752_v7  ;;  %10097 = vmatprep.mubr.msk.bf16.mxu1 %vm4215_vm5, %v10496_v20  ;;  %v4525_v58 = vsel %vm11275_vm10, %v11170_v8, %v11172_v9  ;;  %v11298_v19 = vpop.f32.mrf.mxu1 }
 0x138   : > { %v2591_v26 = vrot.slane %v2577_v17, %v10752_v7  ;;  %v2592_v27 = vcombine.high %v2584_v18, %v2584_v18  ;;  %v2077_v28 = vpop.f32.mrf.mxu0  ;;  %v3303_v29 = vcombine.low %v3295_v14, %v3302_v56  ;;  %v3327_v30 = vrot.slane %v2584_v18, %v10752_v7  ;;  %10196 = vmatmul.mubr.msk.bf16.gmra.mxu0 %vm4215_vm5, %v10497_v22 }
 0x139   : > { %v2594_v31 = vcombine.high %v2176_v21, %v2176_v21  ;;  %v2601_v32 = vrot.slane %v2176_v21, %v10752_v7  ;;  %v3319_v34 = vrot.slane %v3305_v23, %v10752_v7  ;;  %v2078_v37 = vadd.f32 %v11055_v51, %v2077_v28 }
 0x13a   : > { %v3328_v35 = vcombine.low %v2592_v27, %v2591_v26  ;;  %v2593_v36 = vcombine.high %v2591_v26, %v2591_v26  ;;  %v10045_v39 = vpop.f32.mrf.mxu0  ;;  %v3775_v40 = vsel %vm2929_vm6, %v3303_v29, 0.0  ;;  %v3777_v48 = vsel %vm2940_vm7, %v3327_v30, 0.0  ;;  %v10077_v27 = vpop.f32.mrf.mxu1 }
 0x13b   : > { %v2608_v41 = vrot.slane %v2594_v31, %v10752_v7  ;;  %v2609_v42 = vcombine.high %v2601_v32, %v2601_v32  ;;  %v9778_v38 = vpack.c.bf16 %v3775_v40, %v3775_v40  ;;  %v3320_v43 = vcombine.low %v3312_v25, %v3319_v34 }
 0x13c   : > { %v9780_v44 = vpack.c.bf16 %v3777_v48, %v3777_v48  ;;  %v2080_v45 = vpop.f32.mrf.mxu0  ;;  %v3329_v47 = vcombine.low %v2593_v36, %v2601_v32  ;;  %v2177_v50 = vmax.f32 %v2078_v37, 0.0  ;;  %v4550_v59 = vshrl.u32 %v4465_v33, 16  ;;  %v2144_v37 = vpop.f32.mrf.mxu1 }
 0x13d   : > { %v3345_v49 = vcombine.low %v2609_v42, %v2608_v41  ;;  %v2610_v2 = vcombine.high %v2608_v41, %v2608_v41  ;;  %4065 = vst.msk [vmem:[#allocation2 + $0x60] sm:$0xf] %vm4039_vm2, %v9778_v38  ;;  %v9779_v53 = vpack.c.bf16 %v3320_v43, %v3320_v43  ;;  %v2081_v54 = vadd.f32 %v11055_v51, %v2080_v45  ;;  %v10498_v57 = vld [vmem:[#allocation2 + $0x54] sm:$0xff]   ;;  %v11345_v37 = vld [vmem:[%s13252_s2] ss:$0 sm:$0xff] }
 0x13e   : > { %4067 = vst.msk [vmem:[#allocation2 + $0x68] sm:$0x1] %vm4042_vm3, %v9780_v44  ;;  %v10046_v55 = vpop.f32.mrf.mxu0  ;;  %v3336_v60 = vrot.slane %v3328_v35, %v10752_v7  ;;  %v3343_v61 = vrot.slane %v3329_v47, %v10752_v7  ;;  %v2611_v62 = vcombine.high %v2177_v50, %v2177_v50  ;;  %v2618_v63 = vrot.slane %v2177_v50, %v10752_v7  ;;  %v10499_v0 = vld [vmem:[#allocation2 + $0x54] sm:$0xff]   ;;  %v10078_v47 = vpop.f32.mrf.mxu1 }
 0x13f   : > { %4066 = vst.msk [vmem:[#allocation2 + $0x64] sm:$0xf] %vm4039_vm2, %v9779_v53  ;;  %v3353_v1 = vrot.slane %v3345_v49, %v10752_v7  ;;  %v2178_v3 = vmax.f32 %v2081_v54, 0.0  ;;  %10098 = vmatmul.mubr.msk.bf16.gmra.mxu1 %vm4215_vm5, %v10498_v57  ;;  %v11292_v10 = vrot.slane %v4543_v24, 4  ;;  %v11294_v11 = vrot.slane %v4546_v46, 5  ;;  %10199 = vmatprep.mubr.msk.bf16.mxu0 %vm4215_vm5, %v10499_v0 }
 0x140   : > { %v2085_v6 = vpop.f32.mrf.mxu0  ;;  %v3344_v15 = vcombine.low %v3336_v60, %v3343_v61  ;;  %v2625_v16 = vrot.slane %v2611_v62, %v10752_v7  ;;  %v2626_v17 = vcombine.high %v2618_v63, %v2618_v63  ;;  %v3346_v18 = vcombine.low %v2610_v2, %v2618_v63  ;;  %v2149_v62 = vpop.f32.mrf.mxu1 }
 0x141   : > { %v2628_v20 = vcombine.high %v2178_v3, %v2178_v3  ;;  %v2635_v14 = vrot.slane %v2178_v3, %v10752_v7  ;;  %v2086_v56 = vadd.f32 %v11055_v51, %v2085_v6  ;;  %v11302_v22 = vrot.slane %v4550_v59, 4 }
 0x142   : > { %v10049_v21 = vpop.f32.mrf.mxu0  ;;  %v3778_v24 = vsel %vm2929_vm6, %v3344_v15, 0.0  ;;  %v2627_v23 = vcombine.high %v2625_v16, %v2625_v16  ;;  %v3360_v25 = vrot.slane %v3346_v18, %v10752_v7  ;;  %v3368_v26 = vrot.slane %v2626_v17, %v10752_v7 }
 0x143   : > { %v9781_v28 = vpack.c.bf16 %v3778_v24, %v3778_v24  ;;  %v2642_v29 = vrot.slane %v2628_v20, %v10752_v7  ;;  %v2643_v30 = vcombine.high %v2635_v14, %v2635_v14  ;;  %v2179_v31 = vmax.f32 %v2086_v56, 0.0  ;;  %v4466_v20 = vld [vmem:[#allocation2 + $0x14] sm:$0x1] }
 0x144   : > { %v2088_v32 = vpop.f32.mrf.mxu0  ;;  %v3361_v33 = vcombine.low %v3353_v1, %v3360_v25  ;;  %v3369_v34 = vcombine.low %v2625_v16, %v2627_v23  ;;  %v3780_v35 = vsel %vm2940_vm7, %v3368_v26, 0.0  ;;  %v4535_v46 = vsel %vm11275_vm10, %v11248_v4, %v11252_v13 }
 0x145   : > { %v2089_v36 = vadd.f32 %v11055_v51, %v2088_v32  ;;  %4068 = vst.msk [vmem:[#allocation2 + $0x6c] sm:$0xf] %vm4039_vm2, %v9781_v28  ;;  %v9783_v39 = vpack.c.bf16 %v3780_v35, %v3780_v35  ;;  %v2644_v40 = vcombine.high %v2642_v29, %v2642_v29  ;;  %v3370_v48 = vcombine.low %v2635_v14, %v2643_v30 }
 0x146   : > { %v2645_v41 = vcombine.high %v2179_v31, %v2179_v31  ;;  %v10050_v42 = vpop.f32.mrf.mxu0  ;;  %v9782_v38 = vpack.c.bf16 %v3361_v33, %v3361_v33  ;;  %v2652_v43 = vrot.slane %v2179_v31, %v10752_v7  ;;  %v10500_v45 = vld [vmem:[#allocation2 + $0x60] sm:$0xff]   ;;  %v3377_v49 = vrot.slane %v3369_v34, %v10752_v7 }
 0x147   : > { %v2180_v44 = vmax.f32 %v2089_v36, 0.0  ;;  %4070 = vst.msk [vmem:[#allocation2 + $0x74] sm:$0x1] %vm4042_vm3, %v9783_v39  ;;  %v3384_v50 = vrot.slane %v3370_v48, %v10752_v7  ;;  %v3386_v2 = vcombine.low %v2642_v29, %v2644_v40  ;;  %v10501_v55 = vld [vmem:[#allocation2 + $0x60] sm:$0xff]   ;;  %10101 = vmatprep.mubr.msk.bf16.mxu1 %vm4215_vm5, %v10500_v45  ;;  %v4553_v6 = vor.u32 %v11302_v22, %v11294_v11 }
 0x148   : > { %v2659_v53 = vrot.slane %v2645_v41, %v10752_v7  ;;  %v2093_v54 = vpop.f32.mrf.mxu0  ;;  %4069 = vst.msk [vmem:[#allocation2 + $0x70] sm:$0xf] %vm4039_vm2, %v9782_v38  ;;  %v2660_v57 = vcombine.high %v2652_v43, %v2652_v43  ;;  %10200 = vmatmul.mubr.msk.bf16.gmra.mxu0 %vm4215_vm5, %v10501_v55  ;;  %v4556_v33 = vshll.u32 %v4466_v20, 16  ;;  %v4549_v4 = vsel %vm11275_vm10, %v11292_v10, %v11294_v11 }
 0x149   : > { %v2662_v59 = vcombine.high %v2180_v44, %v2180_v44  ;;  %v2669_v60 = vrot.slane %v2180_v44, %v10752_v7  ;;  %v2094_v61 = vadd.f32 %v11055_v51, %v2093_v54  ;;  %v3385_v63 = vcombine.low %v3377_v49, %v3384_v50  ;;  %v10081_v51 = vpop.f32.mrf.mxu1 }
 0x14a   : > { %v3409_v0 = vrot.slane %v2659_v53, %v10752_v7  ;;  %v2661_v1 = vcombine.high %v2659_v53, %v2659_v53  ;;  %v10053_v3 = vpop.f32.mrf.mxu0  ;;  %v3387_v15 = vcombine.low %v2652_v43, %v2660_v57  ;;  %v3394_v14 = vrot.slane %v3386_v2, %v10752_v7  ;;  %v4467_v53 = vld [vmem:[#allocation2 + $0x18] sm:$0xf] }
 0x14b   : > { %v2676_v16 = vrot.slane %v2662_v59, %v10752_v7  ;;  %v2677_v17 = vcombine.high %v2669_v60, %v2669_v60  ;;  %v2181_v18 = vmax.f32 %v2094_v61, 0.0  ;;  %v3781_v56 = vsel %vm2929_vm6, %v3385_v63, 0.0  ;;  %v2152_v28 = vpop.f32.mrf.mxu1 }
 0x14c   : > { %v3783_v21 = vsel %vm2940_vm7, %v3409_v0, 0.0  ;;  %v3410_v24 = vcombine.low %v2661_v1, %v2669_v60  ;;  %v2096_v23 = vpop.f32.mrf.mxu0  ;;  %v9784_v25 = vpack.c.bf16 %v3781_v56, %v3781_v56  ;;  %v3401_v22 = vrot.slane %v3387_v15, %v10752_v7 }
 0x14d   : > { %v9786_v26 = vpack.c.bf16 %v3783_v21, %v3783_v21  ;;  %v3411_v27 = vcombine.low %v2677_v17, %v2676_v16  ;;  %v2678_v29 = vcombine.high %v2676_v16, %v2676_v16  ;;  %v2679_v30 = vcombine.high %v2181_v18, %v2181_v18  ;;  %v10082_v40 = vpop.f32.mrf.mxu1 }
 0x14e   : > { %v2686_v31 = vrot.slane %v2181_v18, %v10752_v7  ;;  %v10054_v32 = vpop.f32.mrf.mxu0  ;;  %4071 = vst.msk [vmem:[#allocation2 + $0x78] sm:$0xf] %vm4039_vm2, %v9784_v25  ;;  %v3402_v34 = vcombine.low %v3394_v14, %v3401_v22  ;;  %v3418_v35 = vrot.slane %v3410_v24, %v10752_v7  ;;  %v2097_v39 = vadd.f32 %v11345_v37, %v2096_v23 }
 0x14f   : > { %4073 = vst.msk [vmem:[#allocation2 + $0x80] sm:$0x1] %vm4042_vm3, %v9786_v26  ;;  %v3425_v36 = vrot.slane %v3411_v27, %v10752_v7  ;;  %v2693_v48 = vrot.slane %v2679_v30, %v10752_v7  ;;  %v10502_v43 = vld [vmem:[#allocation2 + $0x6c] sm:$0xff]   ;;  %v11349_v44 = vrot.slane %v4553_v6, 4  ;;  %v11354_v60 = vrot.slane %v4556_v33, 5 }
 0x150   : > { %v2694_v41 = vcombine.high %v2686_v31, %v2686_v31  ;;  %v3427_v42 = vcombine.low %v2678_v29, %v2686_v31  ;;  %v2101_v38 = vpop.f32.mrf.mxu0  ;;  %v9785_v45 = vpack.c.bf16 %v3402_v34, %v3402_v34  ;;  %v2182_v49 = vmax.f32 %v2097_v39, 0.0  ;;  %v10503_v2 = vld [vmem:[#allocation2 + $0x6c] sm:$0xff]   ;;  %10102 = vmatmul.mubr.msk.bf16.gmra.mxu1 %vm4215_vm5, %v10502_v43 }
 0x151   : > { %v3426_v47 = vcombine.low %v3418_v35, %v3425_v36  ;;  %v2102_v50 = vadd.f32 %v11345_v37, %v2101_v38  ;;  %v2695_v54 = vcombine.high %v2693_v48, %v2693_v48  ;;  %10203 = vmatprep.mubr.msk.bf16.mxu0 %vm4215_vm5, %v10503_v2  ;;  %v4561_v16 = vshrl.u32 %v4467_v53, 16 }
 0x152   : > { %v3428_v55 = vcombine.low %v2694_v41, %v2693_v48  ;;  %v3435_v57 = vrot.slane %v3427_v42, %v10752_v7  ;;  %v10057_v59 = vpop.f32.mrf.mxu0  ;;  %4072 = vst.msk [vmem:[#allocation2 + $0x7c] sm:$0xf] %vm4039_vm2, %v9785_v45  ;;  %v2696_v62 = vcombine.high %v2182_v49, %v2182_v49  ;;  %v2703_v63 = vrot.slane %v2182_v49, %v10752_v7 }
 0x153   : > { %v3784_v61 = vsel %vm2929_vm6, %v3426_v47, 0.0  ;;  %v2183_v0 = vmax.f32 %v2102_v50, 0.0  ;;  %v3450_v6 = vrot.slane %v2695_v54, %v10752_v7  ;;  %v4559_v23 = vsel %vm11275_vm10, %v11349_v44, %v11354_v60 }
 0x154   : > { %v9787_v1 = vpack.c.bf16 %v3784_v61, %v3784_v61  ;;  %v3442_v3 = vrot.slane %v3428_v55, %v10752_v7  ;;  %v2104_v15 = vpop.f32.mrf.mxu0  ;;  %v2710_v17 = vrot.slane %v2696_v62, %v10752_v7  ;;  %v2711_v18 = vcombine.high %v2703_v63, %v2703_v63 }
 0x155   : > { %v2713_v20 = vcombine.high %v2183_v0, %v2183_v0  ;;  %v2720_v51 = vrot.slane %v2183_v0, %v10752_v7  ;;  %v3786_v56 = vsel %vm2940_vm7, %v3450_v6, 0.0  ;;  %v2105_v21 = vadd.f32 %v11345_v37, %v2104_v15  ;;  %v11391_v0 = vld [vmem:[#allocation2 + $0x1c] sm:$0xf] }
 0x156   : > { %4074 = vst.msk [vmem:[#allocation2 + $0x84] sm:$0xf] %vm4039_vm2, %v9787_v1  ;;  %v3443_v14 = vcombine.low %v3435_v57, %v3442_v3  ;;  %v10058_v24 = vpop.f32.mrf.mxu0  ;;  %v9789_v25 = vpack.c.bf16 %v3786_v56, %v3786_v56  ;;  %v2712_v22 = vcombine.high %v2710_v17, %v2710_v17  ;;  %v3451_v26 = vcombine.low %v2703_v63, %v2711_v18 }
 0x157   : > { %v2727_v27 = vrot.slane %v2713_v20, %v10752_v7  ;;  %v2728_v29 = vcombine.high %v2720_v51, %v2720_v51  ;;  %v2184_v30 = vmax.f32 %v2105_v21, 0.0  ;;  %v4564_v32 = vshll.u32 %v4467_v53, 16 }
 0x158   : > { %v9788_v28 = vpack.c.bf16 %v3443_v14, %v3443_v14  ;;  %v2109_v31 = vpop.f32.mrf.mxu0  ;;  %4076 = vst.msk [vmem:[#allocation2 + $0x8c] sm:$0x1] %vm4042_vm3, %v9789_v25  ;;  %v3452_v33 = vcombine.low %v2710_v17, %v2712_v22  ;;  %v11376_v36 = vrot.slane %v4561_v16, 4  ;;  %v3459_v39 = vrot.slane %v3451_v26, %v10752_v7 }
 0x159   : > { %v2729_v34 = vcombine.high %v2727_v27, %v2727_v27  ;;  %v2110_v35 = vadd.f32 %v11345_v37, %v2109_v31  ;;  %v3468_v40 = vcombine.low %v2720_v51, %v2728_v29  ;;  %v2730_v48 = vcombine.high %v2184_v30, %v2184_v30  ;;  %v10504_v38 = vld [vmem:[#allocation2 + $0x78] sm:$0xff]  }
 0x15a   : > { %4075 = vst.msk [vmem:[#allocation2 + $0x88] sm:$0xf] %vm4039_vm2, %v9788_v28  ;;  %v2737_v41 = vrot.slane %v2184_v30, %v10752_v7  ;;  %v10061_v42 = vpop.f32.mrf.mxu0  ;;  %v3466_v43 = vrot.slane %v3452_v33, %v10752_v7  ;;  %v10505_v49 = vld [vmem:[#allocation2 + $0x78] sm:$0xff]   ;;  %v11382_v50 = vrot.slane %v4564_v32, 5  ;;  %10105 = vmatprep.mubr.msk.bf16.mxu1 %vm4215_vm5, %v10504_v38  ;;  %v4570_v25 = vshll.u32 %v11391_v0, 16 }
 0x15b   : > { %v3469_v45 = vcombine.low %v2727_v27, %v2729_v34  ;;  %v2185_v47 = vmax.f32 %v2110_v35, 0.0  ;;  %v3476_v2 = vrot.slane %v3468_v40, %v10752_v7  ;;  %v2744_v53 = vrot.slane %v2730_v48, %v10752_v7  ;;  %10204 = vmatmul.mubr.msk.bf16.gmra.mxu0 %vm4215_vm5, %v10505_v49 }
 0x15c   : > { %v2745_v54 = vcombine.high %v2737_v41, %v2737_v41  ;;  %v3491_v55 = vrot.slane %v2737_v41, %v10752_v7  ;;  %v2112_v57 = vpop.f32.mrf.mxu0  ;;  %v3467_v59 = vcombine.low %v3459_v39, %v3466_v43  ;;  %v11415_v35 = vcombine.low %v4525_v58, %v4535_v46 }
 0x15d   : > { %v3483_v61 = vrot.slane %v3469_v45, %v10752_v7  ;;  %v2747_v62 = vcombine.high %v2185_v47, %v2185_v47  ;;  %v2754_v63 = vrot.slane %v2185_v47, %v10752_v7  ;;  %v2746_v6 = vcombine.high %v2744_v53, %v2744_v53 }
 0x15e   : > { %v3492_v1 = vcombine.low %v2745_v54, %v2744_v53  ;;  %v3789_v3 = vsel %vm2940_vm7, %v3491_v55, 0.0  ;;  %v2113_v15 = vadd.f32 %v11345_v37, %v2112_v57  ;;  %v10062_v16 = vpop.f32.mrf.mxu0  ;;  %v3787_v17 = vsel %vm2929_vm6, %v3467_v59, 0.0  ;;  %v11445_v59 = vld [vmem:[#allocation2 + $0x20] sm:$0x1] }
 0x15f   : > { %v3484_v18 = vcombine.low %v3476_v2, %v3483_v61  ;;  %v9792_v20 = vpack.c.bf16 %v3789_v3, %v3789_v3  ;;  %v2761_v51 = vrot.slane %v2747_v62, %v10752_v7  ;;  %v9790_v14 = vpack.c.bf16 %v3787_v17, %v3787_v17 }
 0x160   : > { %v2762_v56 = vcombine.high %v2754_v63, %v2754_v63  ;;  %v3493_v21 = vcombine.low %v2746_v6, %v2754_v63  ;;  %v2117_v24 = vpop.f32.mrf.mxu0  ;;  %v2186_v26 = vmax.f32 %v2113_v15, 0.0  ;;  %v3500_v30 = vrot.slane %v3492_v1, %v10752_v7 }
 0x161   : > { %v9791_v22 = vpack.c.bf16 %v3484_v18, %v3484_v18  ;;  %4079 = vst.msk [vmem:[#allocation2 + $0x98] sm:$0x1] %vm4042_vm3, %v9792_v20  ;;  %v2763_v27 = vcombine.high %v2761_v51, %v2761_v51  ;;  %v2118_v28 = vadd.f32 %v11345_v37, %v2117_v24  ;;  %v10506_v29 = vld [vmem:[#allocation2 + $0x84] sm:$0xff]   ;;  %v11430_v8 = vcombine.low %v4549_v4, %v4559_v23 }
 0x162   : > { %4077 = vst.msk [vmem:[#allocation2 + $0x90] sm:$0xf] %vm4039_vm2, %v9790_v14  ;;  %v3507_v31 = vrot.slane %v3493_v21, %v10752_v7  ;;  %v3509_v32 = vcombine.low %v2762_v56, %v2761_v51  ;;  %v10065_v33 = vpop.f32.mrf.mxu0  ;;  %v10507_v34 = vld [vmem:[#allocation2 + $0x84] sm:$0xff]   ;;  %v2764_v39 = vcombine.high %v2186_v26, %v2186_v26  ;;  %v2771_v40 = vrot.slane %v2186_v26, %v10752_v7 }
 0x163   : > { %4078 = vst.msk [vmem:[#allocation2 + $0x94] sm:$0xf] %vm4039_vm2, %v9791_v22  ;;  %v2187_v48 = vmax.f32 %v2118_v28, 0.0  ;;  %10106 = vmatmul.mubr.msk.bf16.gmra.mxu1 %vm4215_vm5, %v10506_v29  ;;  %10207 = vmatprep.mubr.msk.bf16.mxu0 %vm4215_vm5, %v10507_v34  ;;  %v4567_v9 = vor.u32 %v11382_v50, %v11376_v36  ;;  %v11434_v58 = vrot.slane %v4570_v25, 5  ;;  %v4574_v61 = vshrl.u32 %v11391_v0, 16 }
 0x164   : > { %v3508_v13 = vcombine.low %v3500_v30, %v3507_v31  ;;  %v2120_v41 = vpop.f32.mrf.mxu0  ;;  %v2778_v46 = vrot.slane %v2764_v39, %v10752_v7  ;;  %v2779_v42 = vcombine.high %v2771_v40, %v2771_v40  ;;  %v3510_v10 = vcombine.low %v2763_v27, %v2771_v40 }
 0x165   : > { %v2781_v11 = vcombine.high %v2187_v48, %v2187_v48  ;;  %v3517_v38 = vrot.slane %v3509_v32, %v10752_v7  ;;  %v2788_v45 = vrot.slane %v2187_v48, %v10752_v7  ;;  %v2121_v44 = vadd.f32 %v11345_v37, %v2120_v41 }
 0x166   : > { %v3790_v43 = vsel %vm2929_vm6, %v3508_v13, 0.0  ;;  %v10066_v60 = vpop.f32.mrf.mxu0  ;;  %v2780_v47 = vcombine.high %v2778_v46, %v2778_v46  ;;  %v3524_v49 = vrot.slane %v3510_v10, %v10752_v7  ;;  %v3532_v2 = vrot.slane %v2779_v42, %v10752_v7 }
 0x167   : > { %v9793_v23 = vpack.c.bf16 %v3790_v43, %v3790_v43  ;;  %v2795_v53 = vrot.slane %v2781_v11, %v10752_v7  ;;  %v2796_v54 = vcombine.high %v2788_v45, %v2788_v45  ;;  %v2188_v55 = vmax.f32 %v2121_v44, 0.0 }
 0x168   : > { %v2125_v57 = vpop.f32.mrf.mxu0  ;;  %v3525_v62 = vcombine.low %v3517_v38, %v3524_v49  ;;  %v3533_v63 = vcombine.low %v2778_v46, %v2780_v47  ;;  %v3792_v1 = vsel %vm2940_vm7, %v3532_v2, 0.0  ;;  %v4580_v21 = vshll.u32 %v11445_v59, 16 }
 0x169   : > { %4080 = vst.msk [vmem:[#allocation2 + $0x9c] sm:$0xf] %vm4039_vm2, %v9793_v23  ;;  %v2126_v3 = vadd.f32 %v11345_v37, %v2125_v57  ;;  %v9795_v6 = vpack.c.bf16 %v3792_v1, %v3792_v1  ;;  %v2797_v15 = vcombine.high %v2795_v53, %v2795_v53  ;;  %v3534_v16 = vcombine.low %v2788_v45, %v2796_v54 }
 0x16a   : > { %v2798_v17 = vcombine.high %v2188_v55, %v2188_v55  ;;  %v10069_v18 = vpop.f32.mrf.mxu0  ;;  %v10508_v20 = vld [vmem:[#allocation2 + $0x90] sm:$0xff]   ;;  %v9794_v51 = vpack.c.bf16 %v3525_v62, %v3525_v62  ;;  %v2805_v14 = vrot.slane %v2188_v55, %v10752_v7  ;;  %v3541_v24 = vrot.slane %v3533_v63, %v10752_v7 }
 0x16b   : > { %v2189_v56 = vmax.f32 %v2126_v3, 0.0  ;;  %v10509_v0 = vld [vmem:[#allocation2 + $0x90] sm:$0xff]   ;;  %4082 = vst.msk [vmem:[#allocation2 + $0xa4] sm:$0x1] %vm4042_vm3, %v9795_v6  ;;  %v3548_v25 = vrot.slane %v3534_v16, %v10752_v7  ;;  %v3550_v22 = vcombine.low %v2795_v53, %v2797_v15  ;;  %10109 = vmatprep.mubr.msk.bf16.mxu1 %vm4215_vm5, %v10508_v20  ;;  %v4576_v40 = vrot.slane %v4574_v61, 4 }
 0x16c   : > { %v2812_v26 = vrot.slane %v2798_v17, %v10752_v7  ;;  %v2128_v27 = vpop.f32.mrf.mxu0  ;;  %4081 = vst.msk [vmem:[#allocation2 + $0xa0] sm:$0xf] %vm4039_vm2, %v9794_v51  ;;  %v2813_v28 = vcombine.high %v2805_v14, %v2805_v14  ;;  %10208 = vmatmul.mubr.msk.bf16.gmra.mxu0 %vm4215_vm5, %v10509_v0  ;;  %v4568_v6 = vrot.slane %v4567_v9, 4  ;;  %v4582_v0 = vrot.slane %v4580_v21, 5 }
 0x16d   : > { %v2815_v29 = vcombine.high %v2189_v56, %v2189_v56  ;;  %v2822_v30 = vrot.slane %v2189_v56, %v10752_v7  ;;  %v2129_v31 = vadd.f32 %v11345_v37, %v2128_v27  ;;  %v3549_v32 = vcombine.low %v3541_v24, %v3548_v25 }
 0x16e   : > { %v3573_v33 = vrot.slane %v2812_v26, %v10752_v7  ;;  %v2814_v34 = vcombine.high %v2812_v26, %v2812_v26  ;;  %v10070_v39 = vpop.f32.mrf.mxu0  ;;  %v3551_v48 = vcombine.low %v2805_v14, %v2813_v28  ;;  %v3558_v46 = vrot.slane %v3550_v22, %v10752_v7 }
 0x16f   : > { %v2829_v4 = vrot.slane %v2815_v29, %v10752_v7  ;;  %v2830_v13 = vcombine.high %v2822_v30, %v2822_v30  ;;  %v2190_v41 = vmax.f32 %v2129_v31, 0.0  ;;  %v3793_v42 = vsel %vm2929_vm6, %v3549_v32, 0.0  ;;  %v11494_v32 = vld [vmem:[#allocation2 + $0x10] sm:$0xf]  ;;  %v10534_v39 = vld [vmem:[%s13253_s3 + $0x4] sm:$0x3] }
 0x170   : > { %v3795_v10 = vsel %vm2940_vm7, %v3573_v33, 0.0  ;;  %v3574_v11 = vcombine.low %v2814_v34, %v2822_v30  ;;  %v2133_v38 = vpop.f32.mrf.mxu0  ;;  %v9796_v43 = vpack.c.bf16 %v3793_v42, %v3793_v42  ;;  %v3565_v45 = vrot.slane %v3551_v48, %v10752_v7  ;;  %v6748_v42 = vld [vmem:[#allocation2 + $0xc] sm:$0xe] }
 0x171   : > { %v9798_v44 = vpack.c.bf16 %v3795_v10, %v3795_v10  ;;  %v3575_v60 = vcombine.low %v2830_v13, %v2829_v4  ;;  %v2831_v23 = vcombine.high %v2829_v4, %v2829_v4  ;;  %v2832_v47 = vcombine.high %v2190_v41, %v2190_v41 }
 0x172   : > { %v2839_v49 = vrot.slane %v2190_v41, %v10752_v7  ;;  %v10073_v2 = vpop.f32.mrf.mxu0  ;;  %v4577_v53 = vor.u32 %v4576_v40, %v11434_v58  ;;  %4083 = vst.msk [vmem:[#allocation2 + $0xa8] sm:$0xf] %vm4039_vm2, %v9796_v43  ;;  %v3566_v54 = vcombine.low %v3558_v46, %v3565_v45  ;;  %v3582_v55 = vrot.slane %v3574_v11, %v10752_v7  ;;  %v4470_v45 = vld [vmem:[#allocation2 + $0x24] sm:$0xf] }
 0x173   : > { %4085 = vst.msk [vmem:[#allocation2 + $0xb0] sm:$0x1] %vm4042_vm3, %v9798_v44  ;;  %v3589_v57 = vrot.slane %v3575_v60, %v10752_v7  ;;  %v2134_v59 = vadd.f32 %v11345_v37, %v2133_v38  ;;  %v2846_v61 = vrot.slane %v2832_v47, %v10752_v7  ;;  %v10510_v3 = vld [vmem:[#allocation2 + $0x9c] sm:$0xff]   ;;  %v11503_v40 = vsel %vm4264_vm4, %v10534_v39, 0  ;;  %v9655_v44 = vld [vmem:[%s13253_s3 + $0xe] sm:$0x3] }
 0x174   : > { %v2847_v62 = vcombine.high %v2839_v49, %v2839_v49  ;;  %v3591_v63 = vcombine.low %v2831_v23, %v2839_v49  ;;  %v2136_v1 = vpop.f32.mrf.mxu0  ;;  %v9797_v15 = vpack.c.bf16 %v3566_v54, %v3566_v54  ;;  %v10511_v20 = vld [vmem:[#allocation2 + $0x9c] sm:$0xff]   ;;  %10110 = vmatmul.mubr.msk.bf16.gmra.mxu1 %vm4215_vm5, %v10510_v3  ;;  %v4578_v56 = vrot.slane %v4577_v53, 4  ;;  %v6024_v49 = vld [vmem:[#allocation2 + $0x14] sm:$0x1]  ;;  %v10535_v2 = vld [vmem:[%s13253_s3 + $0xa] sm:$0x3] }
 0x175   : > { %v3590_v16 = vcombine.low %v3582_v55, %v3589_v57  ;;  %v2191_v17 = vmax.f32 %v2134_v59, 0.0  ;;  %v2137_v18 = vadd.f32 %v11345_v37, %v2136_v1  ;;  %v2848_v51 = vcombine.high %v2846_v61, %v2846_v61  ;;  %10211 = vmatprep.mubr.msk.bf16.mxu0 %vm4215_vm5, %v10511_v20  ;;  %v4471_v53 = vld [vmem:[#allocation2 + $0x28] sm:$0xf]  ;;  %v4472_v3 = vld [vmem:[#allocation2 + $0x2c] sm:$0x1] }
 0x176   : > { %v3592_v14 = vcombine.low %v2847_v62, %v2846_v61  ;;  %v10074_v24 = vpop.f32.mrf.mxu0  ;;  %4084 = vst.msk [vmem:[#allocation2 + $0xac] sm:$0xf] %vm4039_vm2, %v9797_v15  ;;  %v3599_v26 = vrot.slane %v3591_v63, %v10752_v7  ;;  %v4583_v48 = vsel %vm11275_vm10, %v4578_v56, %v4582_v0  ;;  %v4573_v38 = vsel %vm11275_vm10, %v4568_v6, %v11434_v58 }
 0x177   : > { %v3796_v25 = vsel %vm2929_vm6, %v3590_v16, 0.0  ;;  %v2849_v36 = vcombine.high %v2191_v17, %v2191_v17  ;;  %v2856_v50 = vrot.slane %v2191_v17, %v10752_v7  ;;  %v2192_v9 = vmax.f32 %v2137_v18, 0.0 }
 0x178   : > { %v9799_v22 = vpack.c.bf16 %v3796_v25, %v3796_v25  ;;  %v3606_v27 = vrot.slane %v3592_v14, %v10752_v7  ;;  %v3614_v21 = vrot.slane %v2848_v51, %v10752_v7  ;;  %v6814_v43 = vrot.slane %v11494_v32, 5  ;;  %v4473_v51 = vld [vmem:[#allocation2 + $0x30] sm:$0xf] }
 0x179   : > { %v2863_v28 = vrot.slane %v2849_v36, %v10752_v7  ;;  %v2864_v29 = vcombine.high %v2856_v50, %v2856_v50  ;;  %v2866_v30 = vcombine.high %v2192_v9, %v2192_v9  ;;  %v2873_v31 = vrot.slane %v2192_v9, %v10752_v7  ;;  %v6749_v9 = vld [vmem:[#allocation2 + $0x18] sm:$0xe] }
 0x17a   : > { %4086 = vst.msk [vmem:[#allocation2 + $0xb4] sm:$0xf] %vm4039_vm2, %v9799_v22  ;;  %v3607_v33 = vcombine.low %v3599_v26, %v3606_v27  ;;  %v3798_v34 = vsel %vm2940_vm7, %v3614_v21, 0.0  ;;  %v7023_v58 = vsel %vm4264_vm4, %v10535_v2, 0  ;;  %v11522_v57 = vcombine.low %v4573_v38, %v4583_v48  ;;  %v4474_v27 = vld [vmem:[#allocation2 + $0x34] sm:$0xf] }
 0x17b   : > { %v9801_v4 = vpack.c.bf16 %v3798_v34, %v3798_v34  ;;  %v2865_v13 = vcombine.high %v2863_v28, %v2863_v28  ;;  %v3615_v41 = vcombine.low %v2856_v50, %v2864_v29  ;;  %v2880_v46 = vrot.slane %v2866_v30, %v10752_v7  ;;  %10254 = vmatpush3.bf16.msra.mxu0 %v7023_v58  ;;  %v6026_v34 = vld [vmem:[#allocation2 + $0x1c] sm:$0xf] }
 0x17c   : > { %v9800_v10 = vpack.c.bf16 %v3607_v33, %v3607_v33  ;;  %v2881_v11 = vcombine.high %v2873_v31, %v2873_v31  ;;  %v9573_v59 = vrot.slane %v6748_v42, 9  ;;  %v11526_v61 = vadd.f32 %v11345_v37, %v11298_v19  ;;  %10432 = vmatprep.subr.msk.bf16.mxu0 %vm4264_vm4, %v9655_v44  ;;  %v4475_v33 = vld [vmem:[#allocation2 + $0x38] sm:$0x1] }
 0x17d   : > { %4088 = vst.msk [vmem:[#allocation2 + $0xbc] sm:$0x1] %vm4042_vm3, %v9801_v4  ;;  %v3616_v60 = vcombine.low %v2863_v28, %v2865_v13  ;;  %v3623_v23 = vrot.slane %v3615_v41, %v10752_v7  ;;  %v2882_v47 = vcombine.high %v2880_v46, %v2880_v46  ;;  %v10512_v55 = vld [vmem:[#allocation2 + $0xa8] sm:$0xff]   ;;  %v4585_v6 = vshrl.u32 %v4470_v45, 16  ;;  %v6027_v41 = vld [vmem:[#allocation2 + $0x20] sm:$0x1] }
 0x17e   : > { %4087 = vst.msk [vmem:[#allocation2 + $0xb8] sm:$0xf] %vm4039_vm2, %v9800_v10  ;;  %v3632_v54 = vcombine.low %v2873_v31, %v2881_v11  ;;  %v10513_v1 = vld [vmem:[#allocation2 + $0xa8] sm:$0xff]   ;;  %v4588_v15 = vshll.u32 %v4470_v45, 16  ;;  %10113 = vmatprep.mubr.msk.bf16.mxu1 %vm4215_vm5, %v10512_v55  ;;  %v6817_v17 = vrot.slane %v6024_v49, 5  ;;  %v4594_v18 = vshll.u32 %v4471_v53, 16 }
 0x17f   : > { %v3630_v62 = vrot.slane %v3616_v60, %v10752_v7  ;;  %v3633_v63 = vcombine.low %v2880_v46, %v2882_v47  ;;  %v4598_v20 = vshrl.u32 %v4471_v53, 16  ;;  %10212 = vmatmul.mubr.msk.bf16.gmra.mxu0 %vm4215_vm5, %v10513_v1  ;;  %v6816_v37 = vrot.slane %v6814_v43, 4  ;;  %v6029_v53 = vld [vmem:[#allocation2 + $0x28] sm:$0xf]  ;;  %v6030_v1 = vld [vmem:[#allocation2 + $0x2c] sm:$0x1] }
 0x180   : > { %v3640_v16 = vrot.slane %v3632_v54, %v10752_v7  ;;  %v4587_v56 = vrot.slane %v4585_v6, 4  ;;  %v13262_v0 = vmov 0  ;;  %v4590_v24 = vrot.slane %v4588_v15, 5  ;;  %v4476_v54 = vld [vmem:[#allocation2 + $0x3c] sm:$0xf] }
 0x181   : > { %v3631_v14 = vcombine.low %v3623_v23, %v3630_v62  ;;  %v3647_v19 = vrot.slane %v3633_v63, %v10752_v7  ;;  %v13263_v0 = vsel %vm11536_vm13, 4294967295, %v13262_v0  ;;  %v4596_v25 = vrot.slane %v4594_v18, 5  ;;  %v6750_v23 = vld [vmem:[#allocation2 + $0x24] sm:$0xe] }
 0x182   : > { %13264 = vst [vmem:[#allocation3_spill] sm:$0xff] %v13263_v0  ;;  %v4600_v36 = vrot.slane %v4598_v20, 4  ;;  %v4604_v50 = vshll.u32 %v4472_v3, 16  ;;  %v4609_v21 = vshrl.u32 %v4473_v51, 16  ;;  %v4612_v28 = vshll.u32 %v4473_v51, 16 }
 0x183   : > { %v3799_v22 = vsel %vm2929_vm6, %v3631_v14, 0.0  ;;  %v3648_v26 = vcombine.low %v3640_v16, %v3647_v19  ;;  %v4591_v30 = vor.u32 %v4590_v24, %v4587_v56  ;;  %v11544_v4 = vsel %vm11536_vm13, %v9573_v59, %v6814_v43  ;;  %v4477_v3 = vld [vmem:[#allocation2 + $0x40] sm:$0xf]  ;;  %v4479_v19 = vld [vmem:[#allocation2 + $0x48] sm:$0xf] }
 0x184   : > { %v9802_v29 = vpack.c.bf16 %v3799_v22, %v3799_v22  ;;  %v4601_v31 = vor.u32 %v4600_v36, %v4596_v25  ;;  %v4606_v32 = vrot.slane %v4604_v50, 5  ;;  %v11548_v5 = vsel %vm11536_vm13, %v6816_v37, %v6817_v17  ;;  %v4478_v17 = vld [vmem:[#allocation2 + $0x44] sm:$0x1]  ;;  %v4480_v36 = vld [vmem:[#allocation2 + $0x4c] sm:$0xf] }
 0x185   : > { %v9803_v39 = vpack.c.bf16 %v3648_v26, %v3648_v26  ;;  %v10514_v48 = vld [vmem:[#allocation2 + $0xb4] sm:$0xff]   ;;  %v4611_v13 = vrot.slane %v4609_v21, 4  ;;  %v4592_v42 = vrot.slane %v4591_v30, 4  ;;  %v4614_v11 = vrot.slane %v4612_v28, 5 }
 0x186   : > { %4089 = vst.msk [vmem:[#allocation2 + $0xc0] sm:$0xf] %vm4039_vm2, %v9802_v29  ;;  %v10515_v46 = vld [vmem:[#allocation2 + $0xb4] sm:$0xff]   ;;  %v4602_v10 = vrot.slane %v4601_v31, 4  ;;  %v4618_v38 = vshll.u32 %v4474_v27, 16  ;;  %10114 = vmatmul.mubr.msk.bf16.gmra.mxu1 %vm4215_vm5, %v10514_v48  ;;  %v4622_v45 = vshrl.u32 %v4474_v27, 16  ;;  %v9590_v55 = vcombine.low %v11544_v4, %v11548_v5 }
 0x187   : > { %4090 = vst.msk [vmem:[#allocation2 + $0xc4] sm:$0xf] %vm4039_vm2, %v9803_v39  ;;  %v4628_v43 = vshll.u32 %v4475_v33, 16  ;;  %v9574_v44 = vrot.slane %v6749_v9, 9  ;;  %v6821_v60 = vrot.slane %v6026_v34, 5  ;;  %10215 = vmatprep.mubr.msk.bf16.mxu0 %vm4215_vm5, %v10515_v46  ;;  %10119 = vmatprep.mubr.msk.bf16.mxu1 %vm4215_vm5, %v11415_v35  ;;  %v4597_v47 = vsel %vm11275_vm10, %v4592_v42, %v4596_v25 }
 0x188   : > { %v4607_v49 = vsel %vm11275_vm10, %v4602_v10, %v4606_v32  ;;  %v4615_v2 = vor.u32 %v4614_v11, %v4611_v13  ;;  %v4620_v58 = vrot.slane %v4618_v38, 5  ;;  %v4624_v62 = vrot.slane %v4622_v45, 4  ;;  %v11579_v27 = vld [vmem:[%s13253_s3 + $0x8] sm:$0x3]  ;;  %v11593_v48 = vld [vmem:[#allocation2 + $0x50] sm:$0x1] }
 0x189   : > { %v11562_v59 = vcombine.low %v4597_v47, %v4607_v49  ;;  %v4630_v63 = vrot.slane %v4628_v43, 5  ;;  %v11566_v6 = vsel %vm11536_vm13, %v9574_v44, %v6821_v60  ;;  %v6823_v15 = vrot.slane %v6821_v60, 4  ;;  %v6751_v4 = vld [vmem:[#allocation2 + $0x30] sm:$0xe]  ;;  %v6032_v46 = vld [vmem:[#allocation2 + $0x34] sm:$0xf] }
 0x18a   : > { %v4616_v35 = vrot.slane %v4615_v2, 4  ;;  %v6824_v16 = vrot.slane %v6027_v41, 5  ;;  %v4625_v18 = vor.u32 %v4624_v62, %v4620_v58  ;;  %v9575_v20 = vrot.slane %v6750_v23, 9  ;;  %v6033_v42 = vld [vmem:[#allocation2 + $0x38] sm:$0x1] }
 0x18b   : > { %v6828_v51 = vrot.slane %v6029_v53, 5  ;;  %v4633_v14 = vshrl.u32 %v4476_v54, 16  ;;  %v6831_v56 = vrot.slane %v6030_v1, 5  ;;  %v4636_v24 = vshll.u32 %v4476_v54, 16  ;;  %v6752_v10 = vld [vmem:[#allocation2 + $0x3c] sm:$0xe] }
 0x18c   : > { %v11570_v37 = vsel %vm11536_vm13, %v6823_v15, %v6824_v16  ;;  %v4642_v25 = vshll.u32 %v4477_v3, 16  ;;  %v4621_v50 = vsel %vm11275_vm10, %v4616_v35, %v4620_v58  ;;  %v4626_v9 = vrot.slane %v4625_v18, 4  ;;  %v6035_v44 = vld [vmem:[#allocation2 + $0x40] sm:$0xf]  ;;  %v6036_v47 = vld [vmem:[#allocation2 + $0x44] sm:$0x1] }
 0x18d   : > { %v9591_v22 = vcombine.low %v11566_v6, %v11570_v37  ;;  %v6830_v26 = vrot.slane %v6828_v51, 4  ;;  %v11583_v28 = vsel %vm11536_vm13, %v9575_v20, %v6828_v51  ;;  %v4635_v29 = vrot.slane %v4633_v14, 4  ;;  %v4482_v49 = vld [vmem:[#allocation2 + $0x54] sm:$0xf]  ;;  %v11609_v14 = vld [vmem:[#allocation2 + $0x58] sm:$0xf] }
 0x18e   : > { %v10516_v21 = vld [vmem:[#allocation2 + $0xc0] sm:$0xff]   ;;  %v4638_v30 = vrot.slane %v4636_v24, 5  ;;  %v4644_v31 = vrot.slane %v4642_v25, 5  ;;  %10120 = vmatmul.mubr.msk.bf16.vlgmr.msra.gmra.mxu1 %vm4215_vm5, %v11430_v8  ;;  %v4631_v32 = vsel %vm11275_vm10, %v4626_v9, %v4630_v63  ;;  %v4646_v34 = vshrl.u32 %v4477_v3, 16 }
 0x18f   : > { %v11591_v33 = vsel %vm11536_vm13, %v6830_v26, %v6831_v56  ;;  %v4652_v39 = vshll.u32 %v4478_v17, 16  ;;  %10152 = vmatpush3.bf16.msra.mxu1 %v11503_v40  ;;  %10123 = vmatprep.mubr.msk.bf16.mxu1 %vm4215_vm5, %v11522_v57  ;;  %v9430_v5 = vcombine.low %v4621_v50, %v4631_v32  ;;  %v4657_v41 = vshrl.u32 %v4479_v19, 16  ;;  %v11628_v32 = vld [vmem:[#allocation2 + $0x68] sm:$0x1]  ;;  %v11635_v37 = vld [vmem:[#allocation2 + $0x64] sm:$0xf] }
 0x190   : > { %v9592_v8 = vcombine.low %v11583_v28, %v11591_v33  ;;  %v4639_v13 = vor.u32 %v4638_v30, %v4635_v29  ;;  %10216 = vmatmul.mubr.msk.bf16.gmra.mxu0 %vm4215_vm5, %v10516_v21  ;;  %v4648_v11 = vrot.slane %v4646_v34, 4  ;;  %v4660_v45 = vshll.u32 %v4479_v19, 16  ;;  %10429 = vmatprep.subr.msk.bf16.mxu1 %vm4264_vm4, %v11579_v27  ;;  %v11620_v21 = vld [vmem:[#allocation2 + $0x5c] sm:$0x1]  ;;  %v4485_v28 = vld [vmem:[#allocation2 + $0x60] sm:$0xf] }
 0x191   : > { %v4654_v38 = vrot.slane %v4652_v39, 5  ;;  %v4666_v43 = vshll.u32 %v4480_v36, 16  ;;  %10255 = vmatprep.mubr.msk.bf16.mxu0 %vm4215_vm5, %v9590_v55  ;;  %v4659_v57 = vrot.slane %v4657_v41, 4  ;;  %v4670_v60 = vshrl.u32 %v4480_v36, 16 }
 0x192   : > { %v4640_v40 = vrot.slane %v4639_v13, 4  ;;  %v4676_v23 = vshll.u32 %v11593_v48, 16  ;;  %v4649_v2 = vor.u32 %v4648_v11, %v4644_v31  ;;  %v4662_v58 = vrot.slane %v4660_v45, 5 }
 0x193   : > { %v4668_v53 = vrot.slane %v4666_v43, 5  ;;  %v9576_v54 = vrot.slane %v6751_v4, 9  ;;  %v4672_v63 = vrot.slane %v4670_v60, 4  ;;  %v6835_v3 = vrot.slane %v6032_v46, 5  ;;  %v6753_v4 = vld [vmem:[#allocation2 + $0x48] sm:$0xe] }
 0x194   : > { %v4645_v62 = vsel %vm11275_vm10, %v4640_v40, %v4644_v31  ;;  %v4678_v1 = vrot.slane %v4676_v23, 5  ;;  %v4650_v35 = vrot.slane %v4649_v2, 4  ;;  %v4663_v15 = vor.u32 %v4662_v58, %v4659_v57 }
 0x195   : > { %v6838_v55 = vrot.slane %v6033_v42, 5  ;;  %v9577_v16 = vrot.slane %v6752_v10, 9  ;;  %v4673_v17 = vor.u32 %v4672_v63, %v4668_v53  ;;  %v6836_v18 = vsel %vm11536_vm13, %v9576_v54, %v6835_v3  ;;  %v6754_v54 = vld [vmem:[#allocation2 + $0x54] sm:$0xe] }
 0x196   : > { %v6837_v20 = vrot.slane %v6835_v3, 4  ;;  %v6842_v51 = vrot.slane %v6035_v44, 5  ;;  %10124 = vmatmul.mubr.msk.bf16.gmra.mxu1 %vm4215_vm5, %v11562_v59  ;;  %v4655_v19 = vsel %vm11275_vm10, %v4650_v35, %v4654_v38  ;;  %v4664_v56 = vrot.slane %v4663_v15, 4  ;;  %v6041_v35 = vld [vmem:[#allocation2 + $0x58] sm:$0xf] }
 0x197   : > { %v6845_v24 = vrot.slane %v6036_v47, 5  ;;  %v4681_v25 = vshrl.u32 %v4482_v49, 16  ;;  %10127 = vmatprep.mubr.msk.bf16.mxu1 %vm4215_vm5, %v9430_v5  ;;  %v9431_v36 = vcombine.low %v4645_v62, %v4655_v19  ;;  %v4674_v50 = vrot.slane %v4673_v17, 4  ;;  %v6039_v47 = vld [vmem:[#allocation2 + $0x50] sm:$0x1] }
 0x198   : > { %v6839_v9 = vsel %vm11536_vm13, %v6837_v20, %v6838_v55  ;;  %v6843_v26 = vsel %vm11536_vm13, %v9577_v16, %v6842_v51  ;;  %10256 = vmatmul.mubr.msk.bf16.vlgmr.msra.gmra.mxu0 %vm4215_vm5, %v9591_v22  ;;  %v4669_v59 = vsel %vm11275_vm10, %v4664_v56, %v4668_v53  ;;  %v6844_v30 = vrot.slane %v6842_v51, 4  ;;  %v6038_v22 = vld [vmem:[#allocation2 + $0x4c] sm:$0xf] }
 0x199   : > { %v9593_v29 = vcombine.low %v6836_v18, %v6839_v9  ;;  %v4683_v31 = vrot.slane %v4681_v25, 4  ;;  %10259 = vmatprep.mubr.msk.bf16.mxu0 %vm4215_vm5, %v9592_v8  ;;  %v4679_v33 = vsel %vm11275_vm10, %v4674_v50, %v4678_v1  ;;  %v4684_v34 = vshll.u32 %v4482_v49, 16  ;;  %v6042_v18 = vld [vmem:[#allocation2 + $0x5c] sm:$0x1]  ;;  %v4488_v20 = vld [vmem:[#allocation2 + $0x6c] sm:$0xf] }
 0x19a   : > { %v4690_v39 = vshll.u32 %v11609_v14, 16  ;;  %v4694_v6 = vshrl.u32 %v11609_v14, 16  ;;  %v9432_v5 = vcombine.low %v4669_v59, %v4679_v33  ;;  %v6846_v13 = vsel %vm11536_vm13, %v6844_v30, %v6845_v24  ;;  %v11657_v30 = vld [vmem:[#allocation2 + $0x74] sm:$0x1] }
 0x19b   : > { %v4700_v41 = vshll.u32 %v11620_v21, 16  ;;  %v4705_v46 = vshrl.u32 %v4485_v28, 16  ;;  %v9594_v8 = vcombine.low %v6843_v26, %v6846_v13  ;;  %v4686_v42 = vrot.slane %v4684_v34, 5  ;;  %v11655_v26 = vld [vmem:[#allocation2 + $0x70] sm:$0xf] }
 0x19c   : > { %v4692_v10 = vrot.slane %v4690_v39, 5  ;;  %v4696_v11 = vrot.slane %v4694_v6, 4  ;;  %v4708_v43 = vshll.u32 %v4485_v28, 16  ;;  %v4714_v44 = vshll.u32 %v11635_v37, 16 }
 0x19d   : > { %v4702_v38 = vrot.slane %v4700_v41, 5  ;;  %v4707_v45 = vrot.slane %v4705_v46, 4  ;;  %v4687_v40 = vor.u32 %v4686_v42, %v4683_v31  ;;  %v4718_v60 = vshrl.u32 %v11635_v37, 16  ;;  %v11667_v46 = vld [vmem:[#allocation2 + $0x7c] sm:$0xf] }
 0x19e   : > { %v4697_v57 = vor.u32 %v4696_v11, %v4692_v10  ;;  %v4724_v23 = vshll.u32 %v11628_v32, 16  ;;  %10128 = vmatmul.mubr.msk.bf16.gmra.mxu1 %vm4215_vm5, %v9431_v36  ;;  %v4710_v49 = vrot.slane %v4708_v43, 5  ;;  %v4716_v2 = vrot.slane %v4714_v44, 5 }
 0x19f   : > { %v9578_v58 = vrot.slane %v6753_v4, 9  ;;  %v6849_v53 = vrot.slane %v6038_v22, 5  ;;  %10131 = vmatprep.mubr.msk.bf16.mxu1 %vm4215_vm5, %v9432_v5  ;;  %v4688_v62 = vrot.slane %v4687_v40, 4  ;;  %v4720_v1 = vrot.slane %v4718_v60, 4  ;;  %v4491_v22 = vld [vmem:[#allocation2 + $0x78] sm:$0xf] }
 0x1a0   : > { %v4698_v63 = vrot.slane %v4697_v57, 4  ;;  %v4726_v3 = vrot.slane %v4724_v23, 5  ;;  %10260 = vmatmul.mubr.msk.bf16.gmra.mxu0 %vm4215_vm5, %v9593_v29  ;;  %v4711_v15 = vor.u32 %v4710_v49, %v4707_v45  ;;  %v6852_v17 = vrot.slane %v6039_v47, 5  ;;  %v6045_v57 = vld [vmem:[#allocation2 + $0x68] sm:$0x1] }
 0x1a1   : > { %v6850_v55 = vsel %vm11536_vm13, %v9578_v58, %v6849_v53  ;;  %v6851_v16 = vrot.slane %v6849_v53, 4  ;;  %10263 = vmatprep.mubr.msk.bf16.mxu0 %vm4215_vm5, %v9594_v8  ;;  %v4693_v51 = vsel %vm11275_vm10, %v4688_v62, %v4692_v10  ;;  %v4721_v56 = vor.u32 %v4720_v1, %v4716_v2  ;;  %v6755_v60 = vld [vmem:[#allocation2 + $0x60] sm:$0xe]  ;;  %v6044_v58 = vld [vmem:[#allocation2 + $0x64] sm:$0xf] }
 0x1a2   : > { %v4703_v19 = vsel %vm11275_vm10, %v4698_v63, %v4702_v38  ;;  %v9579_v24 = vrot.slane %v6754_v54, 9  ;;  %v4712_v36 = vrot.slane %v4711_v15, 4  ;;  %v6856_v9 = vrot.slane %v6041_v35, 5  ;;  %v11673_v38 = vld [vmem:[#allocation2 + $0x80] sm:$0x1] }
 0x1a3   : > { %v9433_v25 = vcombine.low %v4693_v51, %v4703_v19  ;;  %v6853_v50 = vsel %vm11536_vm13, %v6851_v16, %v6852_v17  ;;  %v4722_v28 = vrot.slane %v4721_v56, 4  ;;  %v6859_v29 = vrot.slane %v6042_v18, 5  ;;  %v6756_v1 = vld [vmem:[#allocation2 + $0x6c] sm:$0xe]  ;;  %v6048_v16 = vld [vmem:[#allocation2 + $0x74] sm:$0x1] }
 0x1a4   : > { %v9595_v59 = vcombine.low %v6850_v55, %v6853_v50  ;;  %v4729_v31 = vshrl.u32 %v4488_v20, 16  ;;  %v4717_v33 = vsel %vm11275_vm10, %v4712_v36, %v4716_v2  ;;  %v6857_v34 = vsel %vm11536_vm13, %v9579_v24, %v6856_v9  ;;  %v6047_v19 = vld [vmem:[#allocation2 + $0x70] sm:$0xf]  ;;  %v4494_v50 = vld [vmem:[#allocation2 + $0x84] sm:$0xf] }
 0x1a5   : > { %v6858_v39 = vrot.slane %v6856_v9, 4  ;;  %v4732_v6 = vshll.u32 %v4488_v20, 16  ;;  %v4727_v4 = vsel %vm11275_vm10, %v4722_v28, %v4726_v3  ;;  %v4738_v13 = vshll.u32 %v11655_v26, 16 }
 0x1a6   : > { %v4731_v5 = vrot.slane %v4729_v31, 4  ;;  %v4742_v41 = vshrl.u32 %v11655_v26, 16  ;;  %10132 = vmatmul.mubr.msk.bf16.gmra.mxu1 %vm4215_vm5, %v9433_v25  ;;  %v9434_v8 = vcombine.low %v4717_v33, %v4727_v4  ;;  %v4748_v11 = vshll.u32 %v11657_v30, 16 }
 0x1a7   : > { %v6860_v42 = vsel %vm11536_vm13, %v6858_v39, %v6859_v29  ;;  %v4734_v10 = vrot.slane %v4732_v6, 5  ;;  %v4740_v43 = vrot.slane %v4738_v13, 5  ;;  %v4753_v40 = vshrl.u32 %v4491_v22, 16  ;;  %v11687_v6 = vld [vmem:[#allocation2 + $0x88] sm:$0xf] }
 0x1a8   : > { %v9596_v45 = vcombine.low %v6857_v34, %v6860_v42  ;;  %v4744_v44 = vrot.slane %v4742_v41, 4  ;;  %10135 = vmatprep.mubr.msk.bf16.mxu1 %vm4215_vm5, %v9434_v8  ;;  %10264 = vmatmul.mubr.msk.bf16.gmra.mxu0 %vm4215_vm5, %v9595_v59  ;;  %v4750_v47 = vrot.slane %v4748_v11, 5  ;;  %v4756_v49 = vshll.u32 %v4491_v22, 16 }
 0x1a9   : > { %v4735_v23 = vor.u32 %v4734_v10, %v4731_v5  ;;  %v4762_v2 = vshll.u32 %v11667_v46, 16  ;;  %v4755_v54 = vrot.slane %v4753_v40, 4  ;;  %v4766_v62 = vshrl.u32 %v11667_v46, 16  ;;  %v11691_v5 = vld [vmem:[#allocation2 + $0x8c] sm:$0x1] }
 0x1aa   : > { %10267 = vmatprep.mubr.msk.bf16.mxu0 %vm4215_vm5, %v9596_v45  ;;  %v4745_v53 = vor.u32 %v4744_v44, %v4740_v43  ;;  %v4772_v63 = vshll.u32 %v11673_v38, 16  ;;  %v4758_v35 = vrot.slane %v4756_v49, 5  ;;  %v9580_v55 = vrot.slane %v6755_v60, 9 }
 0x1ab   : > { %v4736_v3 = vrot.slane %v4735_v23, 4  ;;  %v4764_v15 = vrot.slane %v4762_v2, 5  ;;  %v4768_v18 = vrot.slane %v4766_v62, 4  ;;  %v6863_v51 = vrot.slane %v6044_v58, 5  ;;  %v11706_v2 = vld [vmem:[#allocation2 + $0x94] sm:$0xf] }
 0x1ac   : > { %v4746_v17 = vrot.slane %v4745_v53, 4  ;;  %v4774_v20 = vrot.slane %v4772_v63, 5  ;;  %v4759_v24 = vor.u32 %v4758_v35, %v4755_v54  ;;  %v6866_v25 = vrot.slane %v6045_v57, 5  ;;  %v4497_v57 = vld [vmem:[#allocation2 + $0x90] sm:$0xf] }
 0x1ad   : > { %v4741_v56 = vsel %vm11275_vm10, %v4736_v3, %v4740_v43  ;;  %v9581_v36 = vrot.slane %v6756_v1, 9  ;;  %v4769_v28 = vor.u32 %v4768_v18, %v4764_v15  ;;  %v6864_v59 = vsel %vm11536_vm13, %v9580_v55, %v6863_v51  ;;  %v11709_v63 = vld [vmem:[#allocation2 + $0x98] sm:$0x1]  ;;  %v6051_v55 = vld [vmem:[#allocation2 + $0x80] sm:$0x1] }
 0x1ae   : > { %v4751_v9 = vsel %vm11275_vm10, %v4746_v17, %v4750_v47  ;;  %v6865_v29 = vrot.slane %v6863_v51, 4  ;;  %v4760_v33 = vrot.slane %v4759_v24, 4  ;;  %v6870_v34 = vrot.slane %v6047_v19, 5  ;;  %v6757_v51 = vld [vmem:[#allocation2 + $0x78] sm:$0xe] }
 0x1af   : > { %v9435_v31 = vcombine.low %v4741_v56, %v4751_v9  ;;  %v6873_v39 = vrot.slane %v6048_v16, 5  ;;  %v4770_v22 = vrot.slane %v4769_v28, 4  ;;  %v4777_v13 = vshrl.u32 %v4494_v50, 16 }
 0x1b0   : > { %v6867_v4 = vsel %vm11536_vm13, %v6865_v29, %v6866_v25  ;;  %v4780_v41 = vshll.u32 %v4494_v50, 16  ;;  %v4765_v8 = vsel %vm11275_vm10, %v4760_v33, %v4764_v15  ;;  %v6871_v10 = vsel %vm11536_vm13, %v9581_v36, %v6870_v34  ;;  %v6050_v25 = vld [vmem:[#allocation2 + $0x7c] sm:$0xf]  ;;  %v6758_v29 = vld [vmem:[#allocation2 + $0x84] sm:$0xe] }
 0x1b1   : > { %10136 = vmatmul.mubr.msk.bf16.gmra.mxu1 %vm4215_vm5, %v9435_v31  ;;  %v9597_v42 = vcombine.low %v6864_v59, %v6867_v4  ;;  %v6872_v11 = vrot.slane %v6870_v34, 4  ;;  %v4775_v45 = vsel %vm11275_vm10, %v4770_v22, %v4774_v20  ;;  %v4779_v43 = vrot.slane %v4777_v13, 4  ;;  %v6054_v59 = vld [vmem:[#allocation2 + $0x8c] sm:$0x1]  ;;  %v6053_v22 = vld [vmem:[#allocation2 + $0x88] sm:$0xf] }
 0x1b2   : > { %v4782_v44 = vrot.slane %v4780_v41, 5  ;;  %v4786_v40 = vshll.u32 %v11687_v6, 16  ;;  %v9436_v60 = vcombine.low %v4765_v8, %v4775_v45  ;;  %v4790_v47 = vshrl.u32 %v11687_v6, 16 }
 0x1b3   : > { %10268 = vmatmul.mubr.msk.bf16.gmra.mxu0 %vm4215_vm5, %v9597_v42  ;;  %v6874_v23 = vsel %vm11536_vm13, %v6872_v11, %v6873_v39  ;;  %v4796_v49 = vshll.u32 %v11691_v5, 16  ;;  %v2193_v62 = vmax.f32 %v11526_v61, 0.0  ;;  %v4801_v35 = vshrl.u32 %v4497_v57, 16  ;;  %v4500_v42 = vld [vmem:[#allocation2 + $0x9c] sm:$0xf] }
 0x1b4   : > { %v9598_v58 = vcombine.low %v6871_v10, %v6874_v23  ;;  %v4783_v53 = vor.u32 %v4782_v44, %v4779_v43  ;;  %v4788_v54 = vrot.slane %v4786_v40, 5  ;;  %10139 = vmatprep.mubr.msk.bf16.mxu1 %vm4215_vm5, %v9436_v60  ;;  %v4792_v1 = vrot.slane %v4790_v47, 4  ;;  %v11724_v43 = vld [vmem:[#allocation2 + $0xa0] sm:$0xf] }
 0x1b5   : > { %v4798_v3 = vrot.slane %v4796_v49, 5  ;;  %v4804_v15 = vshll.u32 %v4497_v57, 16  ;;  %v2890_v17 = vrot.slane %v2193_v62, %v10752_v7  ;;  %v4810_v18 = vshll.u32 %v11706_v2, 16 }
 0x1b6   : > { %10271 = vmatprep.mubr.msk.bf16.mxu0 %vm4215_vm5, %v9598_v58  ;;  %v4784_v16 = vrot.slane %v4783_v53, 4  ;;  %v4814_v20 = vshrl.u32 %v11706_v2, 16  ;;  %v4793_v61 = vor.u32 %v4792_v1, %v4788_v54  ;;  %v4803_v19 = vrot.slane %v4801_v35, 4 }
 0x1b7   : > { %v4806_v56 = vrot.slane %v4804_v15, 5  ;;  %v4820_v24 = vshll.u32 %v11709_v63, 16  ;;  %v3655_v50 = vrot.slane %v2890_v17, %v10752_v7  ;;  %v4812_v9 = vrot.slane %v4810_v18, 5  ;;  %v11741_v17 = vld [vmem:[#allocation2 + $0xac] sm:$0xf] }
 0x1b8   : > { %v4789_v36 = vsel %vm11275_vm10, %v4784_v16, %v4788_v54  ;;  %v4816_v28 = vrot.slane %v4814_v20, 4  ;;  %v4794_v31 = vrot.slane %v4793_v61, 4  ;;  %v9582_v39 = vrot.slane %v6757_v51, 9  ;;  %v11736_v54 = vld [vmem:[#allocation2 + $0xa4] sm:$0x1] }
 0x1b9   : > { %v4807_v33 = vor.u32 %v4806_v56, %v4803_v19  ;;  %v4822_v34 = vrot.slane %v4820_v24, 5  ;;  %v3801_v4 = vsel %vm2940_vm7, %v3655_v50, 0.0  ;;  %v6877_v41 = vrot.slane %v6050_v25, 5  ;;  %v11749_v24 = vld [vmem:[#allocation2 + $0xb0] sm:$0x1] }
 0x1ba   : > { %v4817_v13 = vor.u32 %v4816_v28, %v4812_v9  ;;  %v6880_v8 = vrot.slane %v6051_v55, 5  ;;  %v4799_v10 = vsel %vm11275_vm10, %v4794_v31, %v4798_v3  ;;  %v9804_v7 = vpack.c.bf16 %v3801_v4, %v3801_v4  ;;  %v4503_v3 = vld [vmem:[#allocation2 + $0xa8] sm:$0xf]  ;;  %v6057_v50 = vld [vmem:[#allocation2 + $0x98] sm:$0x1] }
 0x1bb   : > { %v4808_v11 = vrot.slane %v4807_v33, 4  ;;  %v9583_v45 = vrot.slane %v6758_v29, 9  ;;  %v9437_v44 = vcombine.low %v4789_v36, %v4799_v10  ;;  %v6878_v57 = vsel %vm11536_vm13, %v9582_v39, %v6877_v41  ;;  %v6056_v31 = vld [vmem:[#allocation2 + $0x94] sm:$0xf]  ;;  %v6759_v33 = vld [vmem:[#allocation2 + $0x90] sm:$0xe] }
 0x1bc   : > { %v4818_v40 = vrot.slane %v4817_v13, 4  ;;  %v6879_v60 = vrot.slane %v6877_v41, 4  ;;  %4091 = vst.msk [vmem:[#allocation2 + $0xc8] sm:$0x1] %vm4042_vm3, %v9804_v7  ;;  %v6884_v23 = vrot.slane %v6053_v22, 5  ;;  %v6887_v47 = vrot.slane %v6054_v59, 5 }
 0x1bd   : > { %v4813_v12 = vsel %vm11275_vm10, %v4808_v11, %v4812_v9  ;;  %v4825_v49 = vshrl.u32 %v4500_v42, 16  ;;  %10140 = vmatmul.mubr.msk.bf16.gmra.mxu1 %vm4215_vm5, %v9437_v44  ;;  %v4828_v62 = vshll.u32 %v4500_v42, 16  ;;  %v4834_v1 = vshll.u32 %v11724_v43, 16  ;;  %v6760_v13 = vld [vmem:[#allocation2 + $0x9c] sm:$0xe] }
 0x1be   : > { %v4823_v58 = vsel %vm11275_vm10, %v4818_v40, %v4822_v34  ;;  %v6881_v53 = vsel %vm11536_vm13, %v6879_v60, %v6880_v8  ;;  %v6885_v55 = vsel %vm11536_vm13, %v9583_v45, %v6884_v23  ;;  %v6886_v16 = vrot.slane %v6884_v23, 4  ;;  %v6060_v7 = vld [vmem:[#allocation2 + $0xa4] sm:$0x1] }
 0x1bf   : > { %v9438_v35 = vcombine.low %v4813_v12, %v4823_v58  ;;  %v9599_v15 = vcombine.low %v6878_v57, %v6881_v53  ;;  %v4827_v18 = vrot.slane %v4825_v49, 4  ;;  %v4830_v20 = vrot.slane %v4828_v62, 5  ;;  %v6059_v57 = vld [vmem:[#allocation2 + $0xa0] sm:$0xf] }
 0x1c0   : > { %v4836_v51 = vrot.slane %v4834_v1, 5  ;;  %v4838_v61 = vshrl.u32 %v11724_v43, 16  ;;  %v6888_v19 = vsel %vm11536_vm13, %v6886_v16, %v6887_v47  ;;  %v4844_v56 = vshll.u32 %v11736_v54, 16  ;;  %v4506_v1 = vld [vmem:[#allocation2 + $0xb4] sm:$0xf] }
 0x1c1   : > { %10143 = vmatprep.mubr.msk.bf16.mxu1 %vm4215_vm5, %v9438_v35  ;;  %10272 = vmatmul.mubr.msk.bf16.gmra.mxu0 %vm4215_vm5, %v9599_v15  ;;  %v4849_v25 = vshrl.u32 %v4503_v3, 16  ;;  %v4852_v36 = vshll.u32 %v4503_v3, 16  ;;  %v9600_v9 = vcombine.low %v6885_v55, %v6888_v19  ;;  %v4831_v28 = vor.u32 %v4830_v20, %v4827_v18  ;;  %v11761_v16 = vld [vmem:[#allocation2 + $0xb8] sm:$0xf]  ;;  %v11767_v19 = vld [vmem:[#allocation2 + $0xbc] sm:$0x1] }
 0x1c2   : > { %v4840_v59 = vrot.slane %v4838_v61, 4  ;;  %v4858_v29 = vshll.u32 %v11741_v17, 16  ;;  %v4846_v34 = vrot.slane %v4844_v56, 5  ;;  %v4862_v4 = vshrl.u32 %v11741_v17, 16 }
 0x1c3   : > { %v4851_v39 = vrot.slane %v4849_v25, 4  ;;  %v4854_v22 = vrot.slane %v4852_v36, 5  ;;  %10275 = vmatprep.mubr.msk.bf16.mxu0 %vm4215_vm5, %v9600_v9  ;;  %v4832_v41 = vrot.slane %v4831_v28, 4  ;;  %v4868_v10 = vshll.u32 %v11749_v24, 16 }
 0x1c4   : > { %v4841_v8 = vor.u32 %v4840_v59, %v4836_v51  ;;  %v4860_v42 = vrot.slane %v4858_v29, 5  ;;  %v4864_v45 = vrot.slane %v4862_v4, 4  ;;  %v9584_v44 = vrot.slane %v6759_v33, 9  ;;  %v6063_v4 = vld [vmem:[#allocation2 + $0xb0] sm:$0x1] }
 0x1c5   : > { %v4855_v11 = vor.u32 %v4854_v22, %v4851_v39  ;;  %v6891_v40 = vrot.slane %v6056_v31, 5  ;;  %v4837_v60 = vsel %vm11275_vm10, %v4832_v41, %v4836_v51  ;;  %v4870_v23 = vrot.slane %v4868_v10, 5  ;;  %v6062_v31 = vld [vmem:[#allocation2 + $0xac] sm:$0xf] }
 0x1c6   : > { %v4842_v12 = vrot.slane %v4841_v8, 4  ;;  %v6894_v47 = vrot.slane %v6057_v50, 5  ;;  %v4865_v58 = vor.u32 %v4864_v45, %v4860_v42  ;;  %v9585_v35 = vrot.slane %v6760_v13, 9  ;;  %v6761_v13 = vld [vmem:[#allocation2 + $0xa8] sm:$0xe] }
 0x1c7   : > { %v4856_v49 = vrot.slane %v4855_v11, 4  ;;  %v6892_v53 = vsel %vm11536_vm13, %v9584_v44, %v6891_v40  ;;  %v6893_v62 = vrot.slane %v6891_v40, 4  ;;  %v6898_v15 = vrot.slane %v6059_v57, 5  ;;  %v6762_v45 = vld [vmem:[#allocation2 + $0xb4] sm:$0xe] }
 0x1c8   : > { %v4847_v3 = vsel %vm11275_vm10, %v4842_v12, %v4846_v34  ;;  %v6901_v55 = vrot.slane %v6060_v7, 5  ;;  %v4866_v51 = vrot.slane %v4865_v58, 4  ;;  %v4873_v50 = vshrl.u32 %v4506_v1, 16  ;;  %v6065_v7 = vld [vmem:[#allocation2 + $0xb8] sm:$0xf] }
 0x1c9   : > { %v9439_v18 = vcombine.low %v4837_v60, %v4847_v3  ;;  %v4861_v20 = vsel %vm11275_vm10, %v4856_v49, %v4860_v42  ;;  %v6895_v61 = vsel %vm11536_vm13, %v6893_v62, %v6894_v47  ;;  %v6899_v25 = vsel %vm11536_vm13, %v9585_v35, %v6898_v15  ;;  %v6066_v60 = vld [vmem:[#allocation2 + $0xbc] sm:$0x1]  ;;  %v5190_v12 = vld [vmem:[#allocation2] sm:$0xe] }
 0x1ca   : > { %v9601_v56 = vcombine.low %v6892_v53, %v6895_v61  ;;  %v6900_v36 = vrot.slane %v6898_v15, 4  ;;  %v4871_v9 = vsel %vm11275_vm10, %v4866_v51, %v4870_v23  ;;  %v4876_v28 = vshll.u32 %v4506_v1, 16 }
 0x1cb   : > { %10144 = vmatmul.mubr.msk.bf16.gmra.mxu1 %vm4215_vm5, %v9439_v18  ;;  %v4882_v59 = vshll.u32 %v11761_v16, 16  ;;  %v4886_v29 = vshrl.u32 %v11761_v16, 16  ;;  %v9440_v33 = vcombine.low %v4861_v20, %v4871_v9  ;;  %v4875_v39 = vrot.slane %v4873_v50, 4  ;;  %v5191_v20 = vld [vmem:[#allocation2 + $0xc] sm:$0xe] }
 0x1cc   : > { %10276 = vmatmul.mubr.msk.bf16.gmra.mxu0 %vm4215_vm5, %v9601_v56  ;;  %v6902_v34 = vsel %vm11536_vm13, %v6900_v36, %v6901_v55  ;;  %v4892_v22 = vshll.u32 %v11767_v19, 16  ;;  %v4878_v8 = vrot.slane %v4876_v28, 5  ;;  %v6905_v11 = vrot.slane %v6062_v31, 5  ;;  %v5192_v50 = vld [vmem:[#allocation2 + $0x18] sm:$0xe] }
 0x1cd   : > { %v9602_v41 = vcombine.low %v6899_v25, %v6902_v34  ;;  %v4884_v42 = vrot.slane %v4882_v59, 5  ;;  %v4888_v10 = vrot.slane %v4886_v29, 4  ;;  %10147 = vmatprep.mubr.msk.bf16.mxu1 %vm4215_vm5, %v9440_v33  ;;  %v9586_v57 = vrot.slane %v6761_v13, 9  ;;  %v10536_v25 = vld [vmem:[#allocation2 + $0x4] sm:$0xf] }
 0x1ce   : > { %v4879_v44 = vor.u32 %v4878_v8, %v4875_v39  ;;  %v4894_v23 = vrot.slane %v4892_v22, 5  ;;  %v6907_v47 = vrot.slane %v6905_v11, 4  ;;  %v6908_v49 = vrot.slane %v6063_v4, 5  ;;  %v10537_v29 = vld [vmem:[#allocation2 + $0x8] sm:$0x1] }
 0x1cf   : > { %10279 = vmatprep.mubr.msk.bf16.mxu0 %vm4215_vm5, %v9602_v41  ;;  %v4889_v40 = vor.u32 %v4888_v10, %v4884_v42  ;;  %v6912_v58 = vrot.slane %v6065_v7, 5  ;;  %v6906_v1 = vsel %vm11536_vm13, %v9586_v57, %v6905_v11  ;;  %v9587_v3 = vrot.slane %v6762_v45, 9  ;;  %v6763_v33 = vld [vmem:[#allocation2 + $0xc0] sm:$0xe]  ;;  %v6068_v13 = vld [vmem:[#allocation2 + $0xc4] sm:$0xf] }
 0x1d0   : > { %v4880_v53 = vrot.slane %v4879_v44, 4  ;;  %v6909_v35 = vsel %vm11536_vm13, %v6907_v47, %v6908_v49  ;;  %v6915_v55 = vrot.slane %v6066_v60, 5  ;;  %v9458_v18 = vrot.slane %v5190_v12, 9  ;;  %v7577_v41 = vld [vmem:[#allocation2 + $0x18] sm:$0xf] }
 0x1d1   : > { %v4890_v62 = vrot.slane %v4889_v40, 4  ;;  %v6914_v15 = vrot.slane %v6912_v58, 4  ;;  %v9603_v56 = vcombine.low %v6906_v1, %v6909_v35  ;;  %v5259_v36 = vrot.slane %v10536_v25, 5  ;;  %v10538_v8 = vld [vmem:[#allocation2 + $0x10] sm:$0xf] }
 0x1d2   : > { %v4885_v51 = vsel %vm11275_vm10, %v4880_v53, %v4884_v42  ;;  %v6913_v28 = vsel %vm11536_vm13, %v9587_v3, %v6912_v58  ;;  %v5262_v31 = vrot.slane %v10537_v29, 5  ;;  %v9459_v4 = vrot.slane %v5191_v20, 9  ;;  %v10539_v10 = vld [vmem:[#allocation2 + $0x14] sm:$0x1]  ;;  %v6069_v44 = vld [vmem:[#allocation2 + $0xc8] sm:$0x1] }
 0x1d3   : > { %v4895_v61 = vsel %vm11275_vm10, %v4890_v62, %v4894_v23  ;;  %v6916_v59 = vsel %vm11536_vm13, %v6914_v15, %v6915_v55  ;;  %v5260_v39 = vsel %vm11536_vm13, %v9458_v18, %v5259_v36  ;;  %v5261_v22 = vrot.slane %v5259_v36, 4  ;;  %v10540_v57 = vld [vmem:[#allocation2 + $0x1c] sm:$0xf]  ;;  %v10541_v12 = vld [vmem:[#allocation2 + $0x20] sm:$0x1] }
 0x1d4   : > { %v9441_v9 = vcombine.low %v4885_v51, %v4895_v61  ;;  %10280 = vmatmul.mubr.msk.bf16.gmra.mxu0 %vm4215_vm5, %v9603_v56  ;;  %v9604_v34 = vcombine.low %v6913_v28, %v6916_v59  ;;  %v5266_v42 = vrot.slane %v10538_v8, 5  ;;  %v5269_v7 = vrot.slane %v10539_v10, 5  ;;  %v7578_v1 = vld [vmem:[#allocation2 + $0x1c] sm:$0xf]  ;;  %v7579_v51 = vld [vmem:[#allocation2 + $0x20] sm:$0x1] }
 0x1d5   : > { %v6553_v11 = vsel %vm4264_vm4, %v11579_v27, 0  ;;  %v9460_v45 = vrot.slane %v5192_v50, 9  ;;  %v5263_v40 = vsel %vm11536_vm13, %v5261_v22, %v5262_v31  ;;  %v5273_v60 = vrot.slane %v10540_v57, 5  ;;  %v10544_v57 = vld [vmem:[#allocation2 + $0x2c] sm:$0x1] }
 0x1d6   : > { %10148 = vmatmul.mubr.msk.bf16.gmra.mxu1 %vm4215_vm5, %v9441_v9  ;;  %10283 = vmatprep.mubr.msk.bf16.mxu0 %vm4215_vm5, %v9604_v34  ;;  %v5276_v23 = vrot.slane %v10541_v12, 5  ;;  %v9588_v47 = vrot.slane %v6763_v33, 9  ;;  %v9475_v49 = vcombine.low %v5260_v39, %v5263_v40  ;;  %v5267_v58 = vsel %vm11536_vm13, %v9459_v4, %v5266_v42  ;;  %v5193_v9 = vld [vmem:[#allocation2 + $0x24] sm:$0xe]  ;;  %v5194_v33 = vld [vmem:[#allocation2 + $0x30] sm:$0xe] }
 0x1d7   : > { %v5268_v53 = vrot.slane %v5266_v42, 4  ;;  %v6919_v62 = vrot.slane %v6068_v13, 5  ;;  %v5274_v27 = vsel %vm11536_vm13, %v9460_v45, %v5273_v60  ;;  %v5275_v3 = vrot.slane %v5273_v60, 4  ;;  %v10542_v4 = vld [vmem:[%s13253_s3 + $0xe] sm:$0x3] }
 0x1d8   : > { %v6922_v35 = vrot.slane %v6069_v44, 5  ;;  %v7626_v15 = vshrl.u32 %v7577_v41, 16  ;;  %10153 = vmatprep.mubr.msk.bf16.mxu1 %vm4215_vm5, %v9475_v49  ;;  %v7629_v61 = vshll.u32 %v7577_v41, 16  ;;  %v7635_v50 = vshll.u32 %v7578_v1, 16  ;;  %v11823_v41 = vld [vmem:[%s13253_s3 + $0xc] sm:$0x3] }
 0x1d9   : > { %v5270_v55 = vsel %vm11536_vm13, %v5268_v53, %v5269_v7  ;;  %v6920_v18 = vsel %vm11536_vm13, %v9588_v47, %v6919_v62  ;;  %v6921_v20 = vrot.slane %v6919_v62, 4  ;;  %v5277_v25 = vsel %vm11536_vm13, %v5275_v3, %v5276_v23  ;;  %v10543_v7 = vld [vmem:[#allocation2 + $0x28] sm:$0xf]  ;;  %v7580_v44 = vld [vmem:[#allocation2 + $0x24] sm:$0xf] }
 0x1da   : > { %v9476_v56 = vcombine.low %v5267_v58, %v5270_v55  ;;  %v7628_v36 = vrot.slane %v7626_v15, 4  ;;  %v9477_v28 = vcombine.low %v5274_v27, %v5277_v25  ;;  %v7631_v29 = vrot.slane %v7629_v61, 5  ;;  %v10545_v23 = vld [vmem:[#allocation2 + $0x34] sm:$0xf]  ;;  %v10546_v3 = vld [vmem:[#allocation2 + $0x38] sm:$0x1] }
 0x1db   : > { %v6923_v59 = vsel %vm11536_vm13, %v6921_v20, %v6922_v35  ;;  %v7639_v31 = vshrl.u32 %v7578_v1, 16  ;;  %v7637_v39 = vrot.slane %v7635_v50, 5  ;;  %v7645_v22 = vshll.u32 %v7579_v51, 16  ;;  %v7581_v1 = vld [vmem:[#allocation2 + $0x28] sm:$0xf] }
 0x1dc   : > { %v9605_v34 = vcombine.low %v6920_v18, %v6923_v59  ;;  %v8108_v13 = vsel %vm4264_vm4, %v10542_v4, 0  ;;  %v7632_v8 = vor.u32 %v7631_v29, %v7628_v36  ;;  %v9461_v10 = vrot.slane %v5193_v9, 9  ;;  %v7582_v51 = vld [vmem:[#allocation2 + $0x2c] sm:$0x1] }
 0x1dd   : > { %v7641_v42 = vrot.slane %v7639_v31, 4  ;;  %10322 = vmatpush3.bf16.msra.mxu0 %v8108_v13  ;;  %v5280_v45 = vrot.slane %v10543_v7, 5  ;;  %v7647_v40 = vrot.slane %v7645_v22, 5  ;;  %v5283_v60 = vrot.slane %v10544_v57, 5 }
 0x1de   : > { %10154 = vmatmul.mubr.msk.bf16.vlgmr.msra.gmra.mxu1 %vm4215_vm5, %v9476_v56  ;;  %v9462_v12 = vrot.slane %v5194_v33, 9  ;;  %v5287_v47 = vrot.slane %v10545_v23, 5  ;;  %10284 = vmatmul.mubr.msk.bf16.gmra.mxu0 %vm4215_vm5, %v9605_v34  ;;  %v7633_v49 = vrot.slane %v7632_v8, 4  ;;  %v5290_v35 = vrot.slane %v10546_v3, 5  ;;  %v7583_v56 = vld [vmem:[#allocation2 + $0x30] sm:$0xf] }
 0x1df   : > { %10220 = vmatpush3.bf16.msra.mxu1 %v6553_v11  ;;  %10157 = vmatprep.mubr.msk.bf16.mxu1 %vm4215_vm5, %v9477_v28  ;;  %v7642_v58 = vor.u32 %v7641_v42, %v7637_v39  ;;  %v5281_v53 = vsel %vm11536_vm13, %v9461_v10, %v5280_v45  ;;  %v5282_v62 = vrot.slane %v5280_v45, 4  ;;  %v7650_v15 = vshrl.u32 %v7580_v44, 16  ;;  %v7584_v28 = vld [vmem:[#allocation2 + $0x34] sm:$0xf]  ;;  %v7585_v34 = vld [vmem:[#allocation2 + $0x38] sm:$0x1] }
 0x1e0   : > { %10431 = vmatprep.subr.msk.bf16.mxu1 %vm4264_vm4, %v11823_v41  ;;  %v5288_v11 = vsel %vm11536_vm13, %v9462_v12, %v5287_v47  ;;  %v5289_v27 = vrot.slane %v5287_v47, 4  ;;  %v7638_v55 = vsel %vm11275_vm10, %v7633_v49, %v7637_v39  ;;  %v7653_v61 = vshll.u32 %v7580_v44, 16  ;;  %v11842_v39 = vpop.f32.mrf.mxu1  ;;  %v5195_v49 = vld [vmem:[#allocation2 + $0x3c] sm:$0xe]  ;;  %v5196_v3 = vld [vmem:[#allocation2 + $0x48] sm:$0xe] }
 0x1e1   : > { %v7643_v18 = vrot.slane %v7642_v58, 4  ;;  %v5284_v20 = vsel %vm11536_vm13, %v5282_v62, %v5283_v60  ;;  %v7652_v50 = vrot.slane %v7650_v15, 4  ;;  %v7659_v9 = vshll.u32 %v7581_v1, 16 }
 0x1e2   : > { %v9478_v25 = vcombine.low %v5281_v53, %v5284_v20  ;;  %v5291_v36 = vsel %vm11536_vm13, %v5289_v27, %v5290_v35  ;;  %v7655_v31 = vrot.slane %v7653_v61, 5  ;;  %v7663_v33 = vshrl.u32 %v7581_v1, 16  ;;  %v11847_v58 = vpop.f32.mrf.mxu1 }
 0x1e3   : > { %v7648_v59 = vsel %vm11275_vm10, %v7643_v18, %v7647_v40  ;;  %v9479_v29 = vcombine.low %v5288_v11, %v5291_v36  ;;  %v7661_v4 = vrot.slane %v7659_v9, 5  ;;  %v7669_v13 = vshll.u32 %v7582_v51, 16  ;;  %v10547_v18 = vld [vmem:[#allocation2 + $0x40] sm:$0xf]  ;;  %v10549_v36 = vld [vmem:[#allocation2 + $0x4c] sm:$0xf] }
 0x1e4   : > { %v9656_v22 = vcombine.low %v7638_v55, %v7648_v59  ;;  %v7674_v8 = vshrl.u32 %v7583_v56, 16  ;;  %v7656_v42 = vor.u32 %v7655_v31, %v7652_v50  ;;  %v7665_v10 = vrot.slane %v7663_v33, 4  ;;  %v7586_v9 = vld [vmem:[#allocation2 + $0x3c] sm:$0xf] }
 0x1e5   : > { %v7677_v7 = vshll.u32 %v7583_v56, 16  ;;  %v7683_v45 = vshll.u32 %v7584_v28, 16  ;;  %v7687_v40 = vshrl.u32 %v7584_v28, 16  ;;  %v7693_v57 = vshll.u32 %v7585_v34, 16  ;;  %v10548_v56 = vld [vmem:[#allocation2 + $0x44] sm:$0x1]  ;;  %v11853_v28 = vpop.f32.mrf.mxu1 }
 0x1e6   : > { %10158 = vmatmul.mubr.msk.bf16.gmra.mxu1 %vm4215_vm5, %v9478_v25  ;;  %10323 = vmatprep.mubr.msk.bf16.mxu0 %vm4215_vm5, %v9656_v22  ;;  %v7676_v44 = vrot.slane %v7674_v8, 4  ;;  %v7657_v60 = vrot.slane %v7656_v42, 4  ;;  %v7666_v12 = vor.u32 %v7665_v10, %v7661_v4  ;;  %v7671_v1 = vrot.slane %v7669_v13, 5  ;;  %v7587_v8 = vld [vmem:[#allocation2 + $0x40] sm:$0xf] }
 0x1e7   : > { %10161 = vmatprep.mubr.msk.bf16.mxu1 %vm4215_vm5, %v9479_v29  ;;  %v7679_v23 = vrot.slane %v7677_v7, 5  ;;  %v7685_v47 = vrot.slane %v7683_v45, 5  ;;  %v7689_v53 = vrot.slane %v7687_v40, 4  ;;  %v7695_v27 = vrot.slane %v7693_v57, 5  ;;  %v7588_v45 = vld [vmem:[#allocation2 + $0x44] sm:$0x1] }
 0x1e8   : > { %v7667_v62 = vrot.slane %v7666_v12, 4  ;;  %v7662_v35 = vsel %vm11275_vm10, %v7657_v60, %v7661_v4  ;;  %v9463_v55 = vrot.slane %v5195_v49, 9  ;;  %v5294_v20 = vrot.slane %v10547_v18, 5  ;;  %v7589_v40 = vld [vmem:[#allocation2 + $0x48] sm:$0xf] }
 0x1e9   : > { %v7680_v11 = vor.u32 %v7679_v23, %v7676_v44  ;;  %v7690_v15 = vor.u32 %v7689_v53, %v7685_v47  ;;  %v5297_v25 = vrot.slane %v10548_v56, 5  ;;  %v5301_v50 = vrot.slane %v10549_v36, 5  ;;  %v7590_v23 = vld [vmem:[#allocation2 + $0x4c] sm:$0xf]  ;;  %v5197_v56 = vld [vmem:[#allocation2 + $0x54] sm:$0xe] }
 0x1ea   : > { %v7672_v51 = vsel %vm11275_vm10, %v7667_v62, %v7671_v1  ;;  %v5296_v31 = vrot.slane %v5294_v20, 4  ;;  %v9464_v33 = vrot.slane %v5196_v3, 9  ;;  %v5295_v22 = vsel %vm11536_vm13, %v9463_v55, %v5294_v20  ;;  %v7591_v3 = vld [vmem:[#allocation2 + $0x50] sm:$0x1] }
 0x1eb   : > { %v7681_v61 = vrot.slane %v7680_v11, 4  ;;  %v9657_v59 = vcombine.low %v7662_v35, %v7672_v51  ;;  %v7691_v29 = vrot.slane %v7690_v15, 4  ;;  %v5303_v4 = vrot.slane %v5301_v50, 4 }
 0x1ec   : > { %v5304_v13 = vrot.slane %v11593_v48, 5  ;;  %v5298_v10 = vsel %vm11536_vm13, %v5296_v31, %v5297_v25  ;;  %v5302_v7 = vsel %vm11536_vm13, %v9464_v33, %v5301_v50  ;;  %v7698_v44 = vshrl.u32 %v7586_v9, 16 }
 0x1ed   : > { %v7686_v34 = vsel %vm11275_vm10, %v7681_v61, %v7685_v47  ;;  %10324 = vmatmul.mubr.msk.bf16.vlgmr.msra.gmra.mxu0 %vm4215_vm5, %v9657_v59  ;;  %v7696_v42 = vsel %vm11275_vm10, %v7691_v29, %v7695_v27  ;;  %v9480_v60 = vcombine.low %v5295_v22, %v5298_v10  ;;  %v7701_v12 = vshll.u32 %v7586_v9, 16  ;;  %v11869_v47 = vpop.f32.mrf.mxu1 }
 0x1ee   : > { %v9658_v57 = vcombine.low %v7686_v34, %v7696_v42  ;;  %v5305_v48 = vsel %vm11536_vm13, %v5303_v4, %v5304_v13  ;;  %13265 = vst [vmem:[#allocation4_spill] sm:$0xff] %v11869_v47  ;;  %v7700_v53 = vrot.slane %v7698_v44, 4  ;;  %v7707_v62 = vshll.u32 %v7587_v8, 16 }
 0x1ef   : > { %v9481_v49 = vcombine.low %v5302_v7, %v5305_v48  ;;  %v7711_v1 = vshrl.u32 %v7587_v8, 16  ;;  %10162 = vmatmul.mubr.msk.bf16.gmra.mxu1 %vm4215_vm5, %v9480_v60  ;;  %v7703_v11 = vrot.slane %v7701_v12, 5  ;;  %v7717_v27 = vshll.u32 %v7588_v45, 16  ;;  %v11873_v55 = vpop.f32.mrf.mxu1  ;;  %v5198_v8 = vld [vmem:[#allocation2 + $0x60] sm:$0xe] }
 0x1f0   : > { %10327 = vmatprep.mubr.msk.bf16.mxu0 %vm4215_vm5, %v9658_v57  ;;  %v7722_v35 = vshrl.u32 %v7589_v40, 16  ;;  %v7725_v15 = vshll.u32 %v7589_v40, 16  ;;  %v7709_v18 = vrot.slane %v7707_v62, 5  ;;  %v7731_v51 = vshll.u32 %v7590_v23, 16  ;;  %v7592_v12 = vld [vmem:[#allocation2 + $0x54] sm:$0xf] }
 0x1f1   : > { %10165 = vmatprep.mubr.msk.bf16.mxu1 %vm4215_vm5, %v9481_v49  ;;  %v7713_v20 = vrot.slane %v7711_v1, 4  ;;  %v7735_v61 = vshrl.u32 %v7590_v23, 16  ;;  %v7704_v25 = vor.u32 %v7703_v11, %v7700_v53  ;;  %v7719_v36 = vrot.slane %v7717_v27, 5  ;;  %v11877_v42 = vpop.f32.mrf.mxu1  ;;  %v7593_v62 = vld [vmem:[#allocation2 + $0x58] sm:$0xf] }
 0x1f2   : > { %v7724_v50 = vrot.slane %v7722_v35, 4  ;;  %v7727_v9 = vrot.slane %v7725_v15, 5  ;;  %v7733_v29 = vrot.slane %v7731_v51, 5  ;;  %v7741_v33 = vshll.u32 %v7591_v3, 16  ;;  %v7594_v3 = vld [vmem:[#allocation2 + $0x5c] sm:$0x1] }
 0x1f3   : > { %v7714_v59 = vor.u32 %v7713_v20, %v7709_v18  ;;  %v7737_v31 = vrot.slane %v7735_v61, 4  ;;  %v7705_v34 = vrot.slane %v7704_v25, 4  ;;  %v9465_v4 = vrot.slane %v5197_v56, 9  ;;  %v7595_v35 = vld [vmem:[#allocation2 + $0x60] sm:$0xf]  ;;  %v11892_v15 = vpop.f32.mrf.mxu1 }
 0x1f4   : > { %v7728_v22 = vor.u32 %v7727_v9, %v7724_v50  ;;  %v5308_v13 = vrot.slane %v11609_v14, 5  ;;  %v7743_v45 = vrot.slane %v7741_v33, 5  ;;  %v5311_v44 = vrot.slane %v11620_v21, 5  ;;  %v7596_v50 = vld [vmem:[#allocation2 + $0x64] sm:$0xf] }
 0x1f5   : > { %v7715_v10 = vrot.slane %v7714_v59, 4  ;;  %v7738_v7 = vor.u32 %v7737_v31, %v7733_v29  ;;  %v7710_v40 = vsel %vm11275_vm10, %v7705_v34, %v7709_v18  ;;  %v9466_v49 = vrot.slane %v5198_v8, 9 }
 0x1f6   : > { %v7729_v57 = vrot.slane %v7728_v22, 4  ;;  %v5309_v60 = vsel %vm11536_vm13, %v9465_v4, %v5308_v13  ;;  %v5310_v48 = vrot.slane %v5308_v13, 4  ;;  %v5315_v53 = vrot.slane %v11635_v37, 5  ;;  %v11903_v13 = vpop.f32.mrf.mxu1 }
 0x1f7   : > { %v7720_v14 = vsel %vm11275_vm10, %v7715_v10, %v7719_v36  ;;  %v7739_v23 = vrot.slane %v7738_v7, 4  ;;  %v5318_v27 = vrot.slane %v11628_v32, 5  ;;  %v7746_v56 = vshrl.u32 %v7592_v12, 16  ;;  %13266 = vst [vmem:[#allocation5_spill] sm:$0xff] %v11903_v13 }
 0x1f8   : > { %v9659_v1 = vcombine.low %v7710_v40, %v7720_v14  ;;  %v7734_v21 = vsel %vm11275_vm10, %v7729_v57, %v7733_v29  ;;  %v5312_v11 = vsel %vm11536_vm13, %v5310_v48, %v5311_v44  ;;  %v5316_v37 = vsel %vm11536_vm13, %v9466_v49, %v5315_v53  ;;  %v7597_v29 = vld [vmem:[#allocation2 + $0x68] sm:$0x1]  ;;  %v5199_v14 = vld [vmem:[#allocation2 + $0x6c] sm:$0xe] }
 0x1f9   : > { %v7744_v18 = vsel %vm11275_vm10, %v7739_v23, %v7743_v45  ;;  %v9482_v20 = vcombine.low %v5309_v60, %v5312_v11  ;;  %v5317_v51 = vrot.slane %v5315_v53, 4  ;;  %v7749_v25 = vshll.u32 %v7592_v12, 16  ;;  %v11906_v12 = vpop.f32.mrf.mxu1 }
 0x1fa   : > { %10328 = vmatmul.mubr.msk.bf16.gmra.mxu0 %vm4215_vm5, %v9659_v1  ;;  %v9660_v61 = vcombine.low %v7734_v21, %v7744_v18  ;;  %v7755_v36 = vshll.u32 %v7593_v62, 16  ;;  %v7759_v9 = vshrl.u32 %v7593_v62, 16  ;;  %v7765_v59 = vshll.u32 %v7594_v3, 16  ;;  %v5200_v1 = vld [vmem:[#allocation2 + $0x78] sm:$0xe] }
 0x1fb   : > { %10166 = vmatmul.mubr.msk.bf16.gmra.mxu1 %vm4215_vm5, %v9482_v20  ;;  %v5319_v32 = vsel %vm11536_vm13, %v5317_v51, %v5318_v27  ;;  %v7770_v31 = vshrl.u32 %v7595_v35, 16  ;;  %v7748_v34 = vrot.slane %v7746_v56, 4  ;;  %v7751_v22 = vrot.slane %v7749_v25, 5  ;;  %v7598_v51 = vld [vmem:[#allocation2 + $0x6c] sm:$0xf]  ;;  %v11914_v25 = vpop.f32.mrf.mxu1 }
 0x1fc   : > { %10331 = vmatprep.mubr.msk.bf16.mxu0 %vm4215_vm5, %v9660_v61  ;;  %v9483_v33 = vcombine.low %v5316_v37, %v5319_v32  ;;  %v7757_v4 = vrot.slane %v7755_v36, 5  ;;  %v7761_v8 = vrot.slane %v7759_v9, 4  ;;  %v7773_v7 = vshll.u32 %v7595_v35, 16 }
 0x1fd   : > { %v7772_v10 = vrot.slane %v7770_v31, 4  ;;  %v7752_v45 = vor.u32 %v7751_v22, %v7748_v34  ;;  %v7779_v44 = vshll.u32 %v7596_v50, 16  ;;  %v7783_v40 = vshrl.u32 %v7596_v50, 16  ;;  %v7600_v34 = vld [vmem:[#allocation2 + $0x74] sm:$0x1] }
 0x1fe   : > { %10169 = vmatprep.mubr.msk.bf16.mxu1 %vm4215_vm5, %v9483_v33  ;;  %v7789_v57 = vshll.u32 %v7597_v29, 16  ;;  %v7762_v60 = vor.u32 %v7761_v8, %v7757_v4  ;;  %v7775_v48 = vrot.slane %v7773_v7, 5  ;;  %v7767_v49 = vrot.slane %v7765_v59, 5  ;;  %v7599_v29 = vld [vmem:[#allocation2 + $0x70] sm:$0xf] }
 0x1ff   : > { %v7753_v23 = vrot.slane %v7752_v45, 4  ;;  %v7781_v53 = vrot.slane %v7779_v44, 5  ;;  %v7785_v62 = vrot.slane %v7783_v40, 4  ;;  %v5322_v3 = vrot.slane %v11655_v26, 5  ;;  %v11929_v44 = vpop.f32.mrf.mxu1 }
 0x200   : > { %v7763_v21 = vrot.slane %v7762_v60, 4  ;;  %v7776_v11 = vor.u32 %v7775_v48, %v7772_v10  ;;  %v7791_v27 = vrot.slane %v7789_v57, 5  ;;  %v9467_v20 = vrot.slane %v5199_v14, 9 }
 0x201   : > { %v7758_v35 = vsel %vm11275_vm10, %v7753_v23, %v7757_v4  ;;  %v7786_v18 = vor.u32 %v7785_v62, %v7781_v53  ;;  %v5325_v37 = vrot.slane %v11657_v30, 5  ;;  %v5324_v36 = vrot.slane %v5322_v3, 4  ;;  %v7601_v4 = vld [vmem:[#allocation2 + $0x78] sm:$0xf] }
 0x202   : > { %v7768_v61 = vsel %vm11275_vm10, %v7763_v21, %v7767_v49  ;;  %v7777_v56 = vrot.slane %v7776_v11, 4  ;;  %v9468_v50 = vrot.slane %v5200_v1, 9  ;;  %v5323_v26 = vsel %vm11536_vm13, %v9467_v20, %v5322_v3  ;;  %v7603_v49 = vld [vmem:[#allocation2 + $0x80] sm:$0x1] }
 0x203   : > { %v9661_v32 = vcombine.low %v7758_v35, %v7768_v61  ;;  %v7787_v9 = vrot.slane %v7786_v18, 4  ;;  %v5329_v59 = vrot.slane %v11667_v46, 5  ;;  %v5326_v31 = vsel %vm11536_vm13, %v5324_v36, %v5325_v37  ;;  %v5202_v36 = vld [vmem:[#allocation2 + $0x90] sm:$0xe] }
 0x204   : > { %v7782_v30 = vsel %vm11275_vm10, %v7777_v56, %v7781_v53  ;;  %v5332_v33 = vrot.slane %v11673_v38, 5  ;;  %v7794_v22 = vshrl.u32 %v7598_v51, 16  ;;  %v9484_v10 = vcombine.low %v5323_v26, %v5326_v31  ;;  %v7602_v38 = vld [vmem:[#allocation2 + $0x7c] sm:$0xf]  ;;  %v11936_v56 = vpop.f32.mrf.mxu1 }
 0x205   : > { %10332 = vmatmul.mubr.msk.bf16.gmra.mxu0 %vm4215_vm5, %v9661_v32  ;;  %v7792_v8 = vsel %vm11275_vm10, %v7787_v9, %v7791_v27  ;;  %v5330_v46 = vsel %vm11536_vm13, %v9468_v50, %v5329_v59  ;;  %v5331_v7 = vrot.slane %v5329_v59, 4  ;;  %v7797_v57 = vshll.u32 %v7598_v51, 16  ;;  %v5201_v27 = vld [vmem:[#allocation2 + $0x84] sm:$0xe]  ;;  %13267 = vst [vmem:[#allocation6_spill] sm:$0xff] %v11936_v56 }
 0x206   : > { %v9662_v45 = vcombine.low %v7782_v30, %v7792_v8  ;;  %v7796_v40 = vrot.slane %v7794_v22, 4  ;;  %v7803_v60 = vshll.u32 %v7599_v29, 16  ;;  %10170 = vmatmul.mubr.msk.bf16.gmra.mxu1 %vm4215_vm5, %v9484_v10  ;;  %v7807_v14 = vshrl.u32 %v7599_v29, 16 }
 0x207   : > { %v5333_v48 = vsel %vm11536_vm13, %v5331_v7, %v5332_v33  ;;  %v7813_v23 = vshll.u32 %v7600_v34, 16  ;;  %v7818_v53 = vshrl.u32 %v7601_v4, 16  ;;  %v7799_v1 = vrot.slane %v7797_v57, 5  ;;  %v11938_v33 = vpop.f32.mrf.mxu1 }
 0x208   : > { %10335 = vmatprep.mubr.msk.bf16.mxu0 %vm4215_vm5, %v9662_v45  ;;  %v9485_v62 = vcombine.low %v5330_v46, %v5333_v48  ;;  %v7805_v21 = vrot.slane %v7803_v60, 5  ;;  %v7821_v11 = vshll.u32 %v7601_v4, 16  ;;  %v7809_v3 = vrot.slane %v7807_v14, 4  ;;  %v7605_v48 = vld [vmem:[#allocation2 + $0x88] sm:$0xf] }
 0x209   : > { %v7820_v35 = vrot.slane %v7818_v53, 4  ;;  %v7827_v18 = vshll.u32 %v7602_v38, 16  ;;  %v7800_v20 = vor.u32 %v7799_v1, %v7796_v40  ;;  %v7831_v51 = vshrl.u32 %v7602_v38, 16  ;;  %v7604_v40 = vld [vmem:[#allocation2 + $0x84] sm:$0xf] }
 0x20a   : > { %10173 = vmatprep.mubr.msk.bf16.mxu1 %vm4215_vm5, %v9485_v62  ;;  %v7823_v37 = vrot.slane %v7821_v11, 5  ;;  %v7837_v61 = vshll.u32 %v7603_v49, 16  ;;  %v7810_v50 = vor.u32 %v7809_v3, %v7805_v21  ;;  %v7815_v32 = vrot.slane %v7813_v23, 5  ;;  %v7606_v1 = vld [vmem:[#allocation2 + $0x8c] sm:$0x1] }
 0x20b   : > { %v7829_v9 = vrot.slane %v7827_v18, 5  ;;  %v9469_v26 = vrot.slane %v5201_v27, 9  ;;  %v7801_v59 = vrot.slane %v7800_v20, 4  ;;  %v7833_v30 = vrot.slane %v7831_v51, 4  ;;  %v7607_v18 = vld [vmem:[#allocation2 + $0x90] sm:$0xf] }
 0x20c   : > { %v7824_v29 = vor.u32 %v7823_v37, %v7820_v35  ;;  %v7839_v31 = vrot.slane %v7837_v61, 5  ;;  %v7811_v34 = vrot.slane %v7810_v50, 4  ;;  %v5336_v22 = vrot.slane %v11687_v6, 5  ;;  %v7608_v20 = vld [vmem:[#allocation2 + $0x94] sm:$0xf] }
 0x20d   : > { %v5339_v4 = vrot.slane %v11691_v5, 5  ;;  %v9470_v8 = vrot.slane %v5202_v36, 9  ;;  %v7806_v10 = vsel %vm11275_vm10, %v7801_v59, %v7805_v21  ;;  %v7834_v7 = vor.u32 %v7833_v30, %v7829_v9  ;;  %v7609_v50 = vld [vmem:[#allocation2 + $0x98] sm:$0x1] }
 0x20e   : > { %v7825_v46 = vrot.slane %v7824_v29, 4  ;;  %v5343_v45 = vrot.slane %v11706_v2, 5  ;;  %v7816_v57 = vsel %vm11275_vm10, %v7811_v34, %v7815_v32  ;;  %v5337_v60 = vsel %vm11536_vm13, %v9469_v26, %v5336_v22  ;;  %v11954_v2 = vpop.f32.mrf.mxu1 }
 0x20f   : > { %v5338_v38 = vrot.slane %v5336_v22, 4  ;;  %v5346_v6 = vrot.slane %v11709_v63, 5  ;;  %v9663_v5 = vcombine.low %v7806_v10, %v7816_v57  ;;  %v7835_v23 = vrot.slane %v7834_v7, 4  ;;  %v5203_v57 = vld [vmem:[#allocation2 + $0x9c] sm:$0xe] }
 0x210   : > { %v7830_v14 = vsel %vm11275_vm10, %v7825_v46, %v7829_v9  ;;  %v5344_v49 = vsel %vm11536_vm13, %v9470_v8, %v5343_v45  ;;  %v5345_v62 = vrot.slane %v5343_v45, 4  ;;  %v7842_v21 = vshrl.u32 %v7604_v40, 16  ;;  %v11964_v29 = vpop.f32.mrf.mxu1 }
 0x211   : > { %v5340_v53 = vsel %vm11536_vm13, %v5338_v38, %v5339_v4  ;;  %v7845_v11 = vshll.u32 %v7604_v40, 16  ;;  %10336 = vmatmul.mubr.msk.bf16.gmra.mxu0 %vm4215_vm5, %v9663_v5  ;;  %v7840_v63 = vsel %vm11275_vm10, %v7835_v23, %v7839_v31  ;;  %v7851_v3 = vshll.u32 %v7605_v48, 16 }
 0x212   : > { %v9486_v27 = vcombine.low %v5337_v60, %v5340_v53  ;;  %v7855_v35 = vshrl.u32 %v7605_v48, 16  ;;  %v9664_v37 = vcombine.low %v7830_v14, %v7840_v63  ;;  %v5347_v51 = vsel %vm11536_vm13, %v5345_v62, %v5346_v6  ;;  %v5204_v48 = vld [vmem:[#allocation2 + $0xa8] sm:$0xe]  ;;  %v11968_v5 = vpop.f32.mrf.mxu1  ;;  %v7610_v63 = vld [vmem:[#allocation2 + $0x9c] sm:$0xf] }
 0x213   : > { %v7844_v61 = vrot.slane %v7842_v21, 4  ;;  %v7847_v36 = vrot.slane %v7845_v11, 5  ;;  %v9487_v32 = vcombine.low %v5344_v49, %v5347_v51  ;;  %v7853_v9 = vrot.slane %v7851_v3, 5  ;;  %13268 = vst [vmem:[#allocation7_spill] sm:$0xff] %v11968_v5 }
 0x214   : > { %10174 = vmatmul.mubr.msk.bf16.gmra.mxu1 %vm4215_vm5, %v9486_v27  ;;  %v7857_v26 = vrot.slane %v7855_v35, 4  ;;  %v7861_v59 = vshll.u32 %v7606_v1, 16  ;;  %10339 = vmatprep.mubr.msk.bf16.mxu0 %vm4215_vm5, %v9664_v37  ;;  %v7866_v31 = vshrl.u32 %v7607_v18, 16  ;;  %v7869_v34 = vshll.u32 %v7607_v18, 16  ;;  %v11976_v27 = vpop.f32.mrf.mxu1 }
 0x215   : > { %v7848_v30 = vor.u32 %v7847_v36, %v7844_v61  ;;  %v7875_v22 = vshll.u32 %v7608_v20, 16  ;;  %10177 = vmatprep.mubr.msk.bf16.mxu1 %vm4215_vm5, %v9487_v32  ;;  %v7879_v8 = vshrl.u32 %v7608_v20, 16  ;;  %v7885_v10 = vshll.u32 %v7609_v50, 16  ;;  %v7611_v36 = vld [vmem:[#allocation2 + $0xa0] sm:$0xf] }
 0x216   : > { %v7858_v4 = vor.u32 %v7857_v26, %v7853_v9  ;;  %v7868_v7 = vrot.slane %v7866_v31, 4  ;;  %v7871_v45 = vrot.slane %v7869_v34, 5  ;;  %v7863_v38 = vrot.slane %v7861_v59, 5  ;;  %v7612_v32 = vld [vmem:[#allocation2 + $0xa4] sm:$0x1]  ;;  %v11991_v34 = vpop.f32.mrf.mxu1 }
 0x217   : > { %v7849_v46 = vrot.slane %v7848_v30, 4  ;;  %v7877_v40 = vrot.slane %v7875_v22, 5  ;;  %v7881_v6 = vrot.slane %v7879_v8, 4  ;;  %v7887_v49 = vrot.slane %v7885_v10, 5  ;;  %v7613_v59 = vld [vmem:[#allocation2 + $0xa8] sm:$0xf] }
 0x218   : > { %v7859_v60 = vrot.slane %v7858_v4, 4  ;;  %v7872_v23 = vor.u32 %v7871_v45, %v7868_v7  ;;  %v5350_v53 = vrot.slane %v11724_v43, 5  ;;  %v9471_v21 = vrot.slane %v5203_v57, 9  ;;  %v7615_v57 = vld [vmem:[#allocation2 + $0xb0] sm:$0x1] }
 0x219   : > { %v7854_v14 = vsel %vm11275_vm10, %v7849_v46, %v7853_v9  ;;  %v7882_v1 = vor.u32 %v7881_v6, %v7877_v40  ;;  %v5353_v11 = vrot.slane %v11736_v54, 5  ;;  %v9472_v20 = vrot.slane %v5204_v48, 9  ;;  %v7614_v46 = vld [vmem:[#allocation2 + $0xac] sm:$0xf] }
 0x21a   : > { %v7864_v62 = vsel %vm11275_vm10, %v7859_v60, %v7863_v38  ;;  %v7873_v35 = vrot.slane %v7872_v23, 4  ;;  %v5352_v18 = vrot.slane %v5350_v53, 4  ;;  %v5351_v51 = vsel %vm11536_vm13, %v9471_v21, %v5350_v53 }
 0x21b   : > { %v9665_v3 = vcombine.low %v7854_v14, %v7864_v62  ;;  %v7883_v37 = vrot.slane %v7882_v1, 4  ;;  %v5357_v43 = vrot.slane %v11741_v17, 5  ;;  %v5360_v61 = vrot.slane %v11749_v24, 5  ;;  %v11997_v62 = vpop.f32.mrf.mxu1 }
 0x21c   : > { %v7878_v54 = vsel %vm11275_vm10, %v7873_v35, %v7877_v40  ;;  %v5354_v50 = vsel %vm11536_vm13, %v5352_v18, %v5353_v11  ;;  %v7890_v9 = vshrl.u32 %v7610_v63, 16  ;;  %v7893_v26 = vshll.u32 %v7610_v63, 16 }
 0x21d   : > { %10340 = vmatmul.mubr.msk.bf16.gmra.mxu0 %vm4215_vm5, %v9665_v3  ;;  %v7888_v30 = vsel %vm11275_vm10, %v7883_v37, %v7887_v49  ;;  %v9488_v31 = vcombine.low %v5351_v51, %v5354_v50  ;;  %v5358_v17 = vsel %vm11536_vm13, %v9472_v20, %v5357_v43  ;;  %v5359_v24 = vrot.slane %v5357_v43, 4  ;;  %v5205_v3 = vld [vmem:[#allocation2 + $0xb4] sm:$0xe]  ;;  %v6022_v37 = vld [vmem:[#allocation2 + $0xc] sm:$0xf] }
 0x21e   : > { %v9666_v22 = vcombine.low %v7878_v54, %v7888_v30  ;;  %v7892_v4 = vrot.slane %v7890_v9, 4  ;;  %v7895_v8 = vrot.slane %v7893_v26, 5  ;;  %v7899_v10 = vshll.u32 %v7611_v36, 16  ;;  %v12004_v26 = vpop.f32.mrf.mxu1 }
 0x21f   : > { %10178 = vmatmul.mubr.msk.bf16.gmra.mxu1 %vm4215_vm5, %v9488_v31  ;;  %v5361_v7 = vsel %vm11536_vm13, %v5359_v24, %v5360_v61  ;;  %v7903_v45 = vshrl.u32 %v7611_v36, 16  ;;  %v7909_v40 = vshll.u32 %v7612_v32, 16  ;;  %v7914_v60 = vshrl.u32 %v7613_v59, 16  ;;  %13269 = vst [vmem:[#allocation8_spill] sm:$0xff] %v12004_v26 }
 0x220   : > { %10343 = vmatprep.mubr.msk.bf16.mxu0 %vm4215_vm5, %v9666_v22  ;;  %v9489_v38 = vcombine.low %v5358_v17, %v5361_v7  ;;  %v7896_v6 = vor.u32 %v7895_v8, %v7892_v4  ;;  %v7901_v48 = vrot.slane %v7899_v10, 5  ;;  %v7917_v14 = vshll.u32 %v7613_v59, 16  ;;  %v10550_v8 = vld [vmem:[#allocation2 + $0x10] sm:$0xf] }
 0x221   : > { %v7905_v23 = vrot.slane %v7903_v45, 4  ;;  %v7916_v49 = vrot.slane %v7914_v60, 4  ;;  %v7923_v53 = vshll.u32 %v7614_v46, 16  ;;  %v7927_v11 = vshrl.u32 %v7614_v46, 16  ;;  %v7616_v46 = vld [vmem:[#allocation2 + $0xb4] sm:$0xf] }
 0x222   : > { %10181 = vmatprep.mubr.msk.bf16.mxu1 %vm4215_vm5, %v9489_v38  ;;  %v7897_v1 = vrot.slane %v7896_v6, 4  ;;  %v7919_v21 = vrot.slane %v7917_v14, 5  ;;  %v7933_v63 = vshll.u32 %v7615_v57, 16  ;;  %v7911_v18 = vrot.slane %v7909_v40, 5 }
 0x223   : > { %v7906_v35 = vor.u32 %v7905_v23, %v7901_v48  ;;  %v7925_v20 = vrot.slane %v7923_v53, 5  ;;  %v7929_v61 = vrot.slane %v7927_v11, 4  ;;  %v9473_v50 = vrot.slane %v5205_v3, 9  ;;  %v12010_v7 = vpop.f32.mrf.mxu1 }
 0x224   : > { %v7902_v51 = vsel %vm11275_vm10, %v7897_v1, %v7901_v48  ;;  %v7920_v43 = vor.u32 %v7919_v21, %v7916_v49  ;;  %v7935_v36 = vrot.slane %v7933_v63, 5  ;;  %v5364_v32 = vrot.slane %v11761_v16, 5  ;;  %v7617_v48 = vld [vmem:[#allocation2 + $0xb8] sm:$0xf]  ;;  %v10551_v49 = vld [vmem:[#allocation2 + $0x14] sm:$0x1] }
 0x225   : > { %v7907_v54 = vrot.slane %v7906_v35, 4  ;;  %v5367_v9 = vrot.slane %v11767_v19, 5  ;;  %v7930_v30 = vor.u32 %v7929_v61, %v7925_v20  ;;  %v6071_v31 = vshrl.u32 %v6022_v37, 16  ;;  %v7618_v1 = vld [vmem:[#allocation2 + $0xbc] sm:$0x1] }
 0x226   : > { %v7921_v59 = vrot.slane %v7920_v43, 4  ;;  %v6074_v17 = vshll.u32 %v6022_v37, 16  ;;  %v5365_v22 = vsel %vm11536_vm13, %v9473_v50, %v5364_v32  ;;  %v5366_v4 = vrot.slane %v5364_v32, 4 }
 0x227   : > { %v7912_v24 = vsel %vm11275_vm10, %v7907_v54, %v7911_v18  ;;  %v6080_v10 = vshll.u32 %v10550_v8, 16  ;;  %v7931_v45 = vrot.slane %v7930_v30, 4  ;;  %v6073_v40 = vrot.slane %v6071_v31, 4  ;;  %v6025_v18 = vld [vmem:[#allocation2 + $0x18] sm:$0xf] }
 0x228   : > { %v9667_v16 = vcombine.low %v7902_v51, %v7912_v24  ;;  %v7926_v19 = vsel %vm11275_vm10, %v7921_v59, %v7925_v20  ;;  %v5368_v57 = vsel %vm11536_vm13, %v5366_v4, %v5367_v9  ;;  %v6076_v60 = vrot.slane %v6074_v17, 5  ;;  %v12019_v20 = vpop.f32.mrf.mxu1 }
 0x229   : > { %v6082_v38 = vrot.slane %v6080_v10, 5  ;;  %v6084_v6 = vshrl.u32 %v10550_v8, 16  ;;  %v7936_v14 = vsel %vm11275_vm10, %v7931_v45, %v7935_v36  ;;  %v9490_v23 = vcombine.low %v5365_v22, %v5368_v57 }
 0x22a   : > { %10344 = vmatmul.mubr.msk.bf16.gmra.mxu0 %vm4215_vm5, %v9667_v16  ;;  %v6090_v53 = vshll.u32 %v10551_v49, 16  ;;  %v7938_v21 = vshrl.u32 %v7616_v46, 16  ;;  %v9668_v11 = vcombine.low %v7926_v19, %v7936_v14  ;;  %v6077_v63 = vor.u32 %v6076_v60, %v6073_v40  ;;  %v12025_v4 = vpop.f32.mrf.mxu1  ;;  %v10552_v16 = vld [vmem:[#allocation2 + $0x1c] sm:$0xf] }
 0x22b   : > { %v6086_v3 = vrot.slane %v6084_v6, 4  ;;  %v7941_v35 = vshll.u32 %v7616_v46, 16  ;;  %10182 = vmatmul.mubr.msk.bf16.gmra.mxu1 %vm4215_vm5, %v9490_v23  ;;  %v7947_v51 = vshll.u32 %v7617_v48, 16  ;;  %v7951_v43 = vshrl.u32 %v7617_v48, 16  ;;  %v6028_v6 = vld [vmem:[#allocation2 + $0x24] sm:$0xf] }
 0x22c   : > { %v7940_v37 = vrot.slane %v7938_v21, 4  ;;  %10347 = vmatprep.mubr.msk.bf16.mxu0 %vm4215_vm5, %v9668_v11  ;;  %v6078_v61 = vrot.slane %v6077_v63, 4  ;;  %v7957_v50 = vshll.u32 %v7618_v1, 16  ;;  %v6095_v59 = vshrl.u32 %v6025_v18, 16  ;;  %v10553_v1 = vld [vmem:[#allocation2 + $0x20] sm:$0x1]  ;;  %v12031_v11 = vpop.f32.mrf.mxu1 }
 0x22d   : > { %v6087_v36 = vor.u32 %v6086_v3, %v6082_v38  ;;  %v7943_v54 = vrot.slane %v7941_v35, 5  ;;  %v7949_v32 = vrot.slane %v7947_v51, 5  ;;  %v7953_v9 = vrot.slane %v7951_v43, 4  ;;  %13270 = vst [vmem:[#allocation9_spill] sm:$0xff] %v12031_v11 }
 0x22e   : > { %v6098_v30 = vshll.u32 %v6025_v18, 16  ;;  %v6083_v31 = vsel %vm11275_vm10, %v6078_v61, %v6082_v38  ;;  %v6092_v24 = vrot.slane %v6090_v53, 5  ;;  %v6097_v10 = vrot.slane %v6095_v59, 4  ;;  %v10554_v61 = vld [vmem:[#allocation2 + $0x28] sm:$0xf] }
 0x22f   : > { %v6088_v17 = vrot.slane %v6087_v36, 4  ;;  %v7944_v22 = vor.u32 %v7943_v54, %v7940_v37  ;;  %v7954_v8 = vor.u32 %v7953_v9, %v7949_v32  ;;  %v6104_v19 = vshll.u32 %v10552_v16, 16  ;;  %v12039_v37 = vld [vmem:[%s13254_s4] ss:$0 sm:$0xff]  ;;  %v10555_v59 = vld [vmem:[#allocation2 + $0x2c] sm:$0x1] }
 0x230   : > { %v6100_v46 = vrot.slane %v6098_v30, 5  ;;  %v7959_v57 = vrot.slane %v7957_v50, 5  ;;  %v6108_v60 = vshrl.u32 %v10552_v16, 16  ;;  %v6114_v21 = vshll.u32 %v10553_v1, 16 }
 0x231   : > { %v6093_v45 = vsel %vm11275_vm10, %v6088_v17, %v6092_v24  ;;  %v7945_v40 = vrot.slane %v7944_v22, 4  ;;  %v7955_v14 = vrot.slane %v7954_v8, 4  ;;  %v6106_v23 = vrot.slane %v6104_v19, 5 }
 0x232   : > { %v9541_v48 = vcombine.low %v6083_v31, %v6093_v45  ;;  %v6101_v38 = vor.u32 %v6100_v46, %v6097_v10  ;;  %v6110_v53 = vrot.slane %v6108_v60, 4  ;;  %v6119_v35 = vshrl.u32 %v6028_v6, 16  ;;  %v6031_v31 = vld [vmem:[#allocation2 + $0x30] sm:$0xf] }
 0x233   : > { %v7950_v49 = vsel %vm11275_vm10, %v7945_v40, %v7949_v32  ;;  %v7960_v63 = vsel %vm11275_vm10, %v7955_v14, %v7959_v57  ;;  %v6122_v18 = vshll.u32 %v6028_v6, 16  ;;  %v6128_v36 = vshll.u32 %v10554_v61, 16  ;;  %v6034_v6 = vld [vmem:[#allocation2 + $0x3c] sm:$0xf] }
 0x234   : > { %10221 = vmatprep.mubr.msk.bf16.mxu1 %vm4215_vm5, %v9541_v48  ;;  %v6102_v3 = vrot.slane %v6101_v38, 4  ;;  %v9669_v51 = vcombine.low %v7950_v49, %v7960_v63  ;;  %v6111_v43 = vor.u32 %v6110_v53, %v6106_v23  ;;  %v6132_v54 = vshrl.u32 %v10554_v61, 16  ;;  %v12041_v50 = vpop.f32.mrf.mxu1  ;;  %v10556_v49 = vld [vmem:[#allocation2 + $0x34] sm:$0xf]  ;;  %v10557_v63 = vld [vmem:[#allocation2 + $0x38] sm:$0x1] }
 0x235   : > { %v6121_v32 = vrot.slane %v6119_v35, 4  ;;  %v6124_v9 = vrot.slane %v6122_v18, 5  ;;  %v6138_v30 = vshll.u32 %v10555_v59, 16  ;;  %v6116_v24 = vrot.slane %v6114_v21, 5 }
 0x236   : > { %10348 = vmatmul.mubr.msk.bf16.gmra.mxu0 %vm4215_vm5, %v9669_v51  ;;  %v6112_v17 = vrot.slane %v6111_v43, 4  ;;  %v6130_v22 = vrot.slane %v6128_v36, 5  ;;  %v6134_v8 = vrot.slane %v6132_v54, 4  ;;  %v12046_v10 = vadd.f32 %v11842_v39, %v12039_v37  ;;  %v12054_v48 = vpop.f32.mrf.mxu1 }
 0x237   : > { %v6107_v46 = vsel %vm11275_vm10, %v6102_v3, %v6106_v23  ;;  %v7382_v16 = vsel %vm4264_vm4, %v11823_v41, 0  ;;  %v6125_v19 = vor.u32 %v6124_v9, %v6121_v32  ;;  %v6140_v57 = vrot.slane %v6138_v30, 5  ;;  %v12059_v3 = vld [vmem:[%s13253_s3 + $0x10] sm:$0x3]  ;;  %v7619_v9 = vld [vmem:[#allocation2 + $0xc0] sm:$0xf] }
 0x238   : > { %v6117_v45 = vsel %vm11275_vm10, %v6112_v17, %v6116_v24  ;;  %v6135_v40 = vor.u32 %v6134_v8, %v6130_v22  ;;  %v6143_v60 = vshrl.u32 %v6031_v31, 16  ;;  %v6146_v39 = vshll.u32 %v6031_v31, 16  ;;  %v12066_v59 = vpop.f32.mrf.mxu1  ;;  %v10558_v24 = vld [vmem:[#allocation2 + $0x40] sm:$0xf] }
 0x239   : > { %v9542_v14 = vcombine.low %v6107_v46, %v6117_v45  ;;  %v6126_v38 = vrot.slane %v6125_v19, 4  ;;  %v6152_v53 = vshll.u32 %v10556_v49, 16  ;;  %v6156_v21 = vshrl.u32 %v10556_v49, 16  ;;  %13271 = vst [vmem:[#allocation10_spill] sm:$0xff] %v12066_v59  ;;  %v10559_v19 = vld [vmem:[#allocation2 + $0x44] sm:$0x1] }
 0x23a   : > { %v6136_v1 = vrot.slane %v6135_v40, 4  ;;  %v6145_v23 = vrot.slane %v6143_v60, 4  ;;  %v6162_v41 = vshll.u32 %v10557_v63, 16  ;;  %v6148_v18 = vrot.slane %v6146_v39, 5  ;;  %v7620_v40 = vld [vmem:[#allocation2 + $0xc4] sm:$0xf] }
 0x23b   : > { %10222 = vmatmul.mubr.msk.bf16.vlgmr.msra.gmra.mxu1 %vm4215_vm5, %v9542_v14  ;;  %v6131_v35 = vsel %vm11275_vm10, %v6126_v38, %v6130_v22  ;;  %v6154_v51 = vrot.slane %v6152_v53, 5  ;;  %v6167_v43 = vshrl.u32 %v6034_v6, 16  ;;  %v6158_v36 = vrot.slane %v6156_v21, 4 }
 0x23c   : > { %10288 = vmatpush3.bf16.msra.mxu1 %v7382_v16  ;;  %v6141_v61 = vsel %vm11275_vm10, %v6136_v1, %v6140_v57  ;;  %v6164_v54 = vrot.slane %v6162_v41, 5  ;;  %v6170_v32 = vshll.u32 %v6034_v6, 16  ;;  %v6149_v31 = vor.u32 %v6148_v18, %v6145_v23  ;;  %v7621_v1 = vld [vmem:[#allocation2 + $0xc8] sm:$0x1]  ;;  %v12071_v23 = vpop.f32.mrf.mxu1 }
 0x23d   : > { %v9543_v30 = vcombine.low %v6131_v35, %v6141_v61  ;;  %v6169_v17 = vrot.slane %v6167_v43, 4  ;;  %v6176_v8 = vshll.u32 %v10558_v24, 16  ;;  %10433 = vmatprep.subr.msk.bf16.mxu1 %vm4264_vm4, %v12059_v3  ;;  %v6159_v22 = vor.u32 %v6158_v36, %v6154_v51  ;;  %13272 = vst [vmem:[#allocation11_spill] sm:$0xff] %v12071_v23  ;;  %v6037_v18 = vld [vmem:[#allocation2 + $0x48] sm:$0xf] }
 0x23e   : > { %v6172_v46 = vrot.slane %v6170_v32, 5  ;;  %v6180_v16 = vshrl.u32 %v10558_v24, 16  ;;  %v6186_v45 = vshll.u32 %v10559_v19, 16  ;;  %v6150_v57 = vrot.slane %v6149_v31, 4 }
 0x23f   : > { %10225 = vmatprep.mubr.msk.bf16.mxu1 %vm4215_vm5, %v9543_v30  ;;  %v6178_v60 = vrot.slane %v6176_v8, 5  ;;  %v7962_v6 = vshrl.u32 %v7619_v9, 16  ;;  %v7965_v14 = vshll.u32 %v7619_v9, 16  ;;  %v6160_v38 = vrot.slane %v6159_v22, 4 }
 0x240   : > { %v6173_v39 = vor.u32 %v6172_v46, %v6169_v17  ;;  %v6182_v49 = vrot.slane %v6180_v16, 4  ;;  %v6188_v53 = vrot.slane %v6186_v45, 5  ;;  %v6155_v21 = vsel %vm11275_vm10, %v6150_v57, %v6154_v51 }
 0x241   : > { %v7964_v63 = vrot.slane %v7962_v6, 4  ;;  %v7967_v41 = vrot.slane %v7965_v14, 5  ;;  %v7971_v35 = vshll.u32 %v7620_v40, 16  ;;  %v6165_v43 = vsel %vm11275_vm10, %v6160_v38, %v6164_v54  ;;  %v6040_v6 = vld [vmem:[#allocation2 + $0x54] sm:$0xf] }
 0x242   : > { %v6174_v61 = vrot.slane %v6173_v39, 4  ;;  %v6183_v36 = vor.u32 %v6182_v49, %v6178_v60  ;;  %v7975_v32 = vshrl.u32 %v7620_v40, 16  ;;  %v9544_v30 = vcombine.low %v6155_v21, %v6165_v43  ;;  %v10560_v40 = vld [vmem:[#allocation2 + $0x4c] sm:$0xf] }
 0x243   : > { %v7968_v31 = vor.u32 %v7967_v41, %v7964_v63  ;;  %v7973_v17 = vrot.slane %v7971_v35, 5  ;;  %v7981_v24 = vshll.u32 %v7621_v1, 16  ;;  %v6191_v46 = vshrl.u32 %v6037_v18, 16 }
 0x244   : > { %v6179_v8 = vsel %vm11275_vm10, %v6174_v61, %v6178_v60  ;;  %v6184_v51 = vrot.slane %v6183_v36, 4  ;;  %v7977_v22 = vrot.slane %v7975_v32, 4  ;;  %10226 = vmatmul.mubr.msk.bf16.gmra.mxu1 %vm4215_vm5, %v9544_v30  ;;  %v6194_v45 = vshll.u32 %v6037_v18, 16  ;;  %v10561_v18 = vld [vmem:[#allocation2 + $0x50] sm:$0x1] }
 0x245   : > { %v7969_v54 = vrot.slane %v7968_v31, 4  ;;  %v7983_v19 = vrot.slane %v7981_v24, 5  ;;  %v6200_v57 = vshll.u32 %v10560_v40, 16  ;;  %v6193_v39 = vrot.slane %v6191_v46, 4  ;;  %v10562_v31 = vld [vmem:[#allocation2 + $0x58] sm:$0xf] }
 0x246   : > { %v12077_v9 = vpop.f32.mrf.mxu1  ;;  %v6189_v14 = vsel %vm11275_vm10, %v6184_v51, %v6188_v53  ;;  %v7978_v38 = vor.u32 %v7977_v22, %v7973_v17  ;;  %v6204_v49 = vshrl.u32 %v10560_v40, 16  ;;  %v6196_v63 = vrot.slane %v6194_v45, 5 }
 0x247   : > { %13273 = vst [vmem:[#allocation12_spill] sm:$0xff] %v12077_v9  ;;  %v9545_v1 = vcombine.low %v6179_v8, %v6189_v14  ;;  %v7974_v21 = vsel %vm11275_vm10, %v7969_v54, %v7973_v17  ;;  %v6202_v41 = vrot.slane %v6200_v57, 5  ;;  %v6210_v61 = vshll.u32 %v10561_v18, 16 }
 0x248   : > { %v12081_v16 = vpop.f32.mrf.mxu1  ;;  %v7979_v35 = vrot.slane %v7978_v38, 4  ;;  %v6206_v43 = vrot.slane %v6204_v49, 4  ;;  %v6215_v36 = vshrl.u32 %v6040_v6, 16  ;;  %v6197_v53 = vor.u32 %v6196_v63, %v6193_v39  ;;  %v6043_v38 = vld [vmem:[#allocation2 + $0x60] sm:$0xf] }
 0x249   : > { %13274 = vst [vmem:[#allocation13_spill] sm:$0xff] %v12081_v16  ;;  %10229 = vmatprep.mubr.msk.bf16.mxu1 %vm4215_vm5, %v9545_v1  ;;  %v6218_v30 = vshll.u32 %v6040_v6, 16  ;;  %v6224_v24 = vshll.u32 %v10562_v31, 16  ;;  %v6228_v51 = vshrl.u32 %v10562_v31, 16  ;;  %v12095_v8 = vadd.f32 %v12039_v37, %v11847_v58  ;;  %v10563_v1 = vld [vmem:[#allocation2 + $0x5c] sm:$0x1] }
 0x24a   : > { %v12086_v60 = vpop.f32.mrf.mxu1  ;;  %v7984_v17 = vsel %vm11275_vm10, %v7979_v35, %v7983_v19  ;;  %v6207_v22 = vor.u32 %v6206_v43, %v6202_v41  ;;  %v6217_v46 = vrot.slane %v6215_v36, 4  ;;  %v6198_v40 = vrot.slane %v6197_v53, 4  ;;  %v6046_v53 = vld [vmem:[#allocation2 + $0x6c] sm:$0xf] }
 0x24b   : > { %13275 = vst [vmem:[#allocation14_spill] sm:$0xff] %v12086_v60  ;;  %v9670_v45 = vcombine.low %v7974_v21, %v7984_v17  ;;  %v6220_v57 = vrot.slane %v6218_v30, 5  ;;  %v6226_v14 = vrot.slane %v6224_v24, 5  ;;  %v6212_v39 = vrot.slane %v6210_v61, 5 }
 0x24c   : > { %v12090_v32 = vpop.f32.mrf.mxu1  ;;  %v6208_v6 = vrot.slane %v6207_v22, 4  ;;  %v6230_v49 = vrot.slane %v6228_v51, 4  ;;  %v6234_v63 = vshll.u32 %v10563_v1, 16  ;;  %v12105_v58 = vadd.f32 %v11853_v28, %v12039_v37  ;;  %v10564_v51 = vld [vmem:[#allocation2 + $0x64] sm:$0xf] }
 0x24d   : > { %13276 = vst [vmem:[#allocation15_spill] sm:$0xff] %v12090_v32  ;;  %v12109_v19 = vadd.f32 %v11873_v55, %v12039_v37  ;;  %v12113_v21 = vadd.f32 %v12039_v37, %v11877_v42  ;;  %10351 = vmatprep.mubr.msk.bf16.mxu0 %vm4215_vm5, %v9670_v45  ;;  %v6221_v35 = vor.u32 %v6220_v57, %v6217_v46  ;;  %v6239_v28 = vshrl.u32 %v6043_v38, 16  ;;  %v6052_v32 = vld [vmem:[#allocation2 + $0x84] sm:$0xf] }
 0x24e   : > { %v12099_v54 = vpop.f32.mrf.mxu1  ;;  %v6203_v43 = vsel %vm11275_vm10, %v6198_v40, %v6202_v41  ;;  %v6213_v61 = vsel %vm11275_vm10, %v6208_v6, %v6212_v39  ;;  %v6231_v36 = vor.u32 %v6230_v49, %v6226_v14  ;;  %v6242_v24 = vshll.u32 %v6043_v38, 16  ;;  %v10565_v6 = vld [vmem:[#allocation2 + $0x68] sm:$0x1] }
 0x24f   : > { %v9546_v55 = vcombine.low %v6203_v43, %v6213_v61  ;;  %v6222_v31 = vrot.slane %v6221_v35, 4  ;;  %v6248_v42 = vshll.u32 %v10564_v51, 16  ;;  %v6236_v22 = vrot.slane %v6234_v63, 5  ;;  %v6049_v63 = vld [vmem:[#allocation2 + $0x78] sm:$0xf] }
 0x250   : > { %v12101_v18 = vpop.f32.mrf.mxu1  ;;  %v6232_v17 = vrot.slane %v6231_v36, 4  ;;  %v6241_v45 = vrot.slane %v6239_v28, 4  ;;  %v6252_v46 = vshrl.u32 %v10564_v51, 16  ;;  %v6244_v41 = vrot.slane %v6242_v24, 5 }
 0x251   : > { %10230 = vmatmul.mubr.msk.bf16.gmra.mxu1 %vm4215_vm5, %v9546_v55  ;;  %v6250_v40 = vrot.slane %v6248_v42, 5  ;;  %v6258_v39 = vshll.u32 %v10565_v6, 16  ;;  %v6263_v49 = vshrl.u32 %v6046_v53, 16  ;;  %v6227_v1 = vsel %vm11275_vm10, %v6222_v31, %v6226_v14  ;;  %v10566_v55 = vld [vmem:[#allocation2 + $0x70] sm:$0xf]  ;;  %v12131_v42 = vpop.f32.mrf.mxu0 }
 0x252   : > { %v12120_v30 = vpop.f32.mrf.mxu1  ;;  %v6237_v38 = vsel %vm11275_vm10, %v6232_v17, %v6236_v22  ;;  %v6254_v35 = vrot.slane %v6252_v46, 4  ;;  %v6266_v43 = vshll.u32 %v6046_v53, 16  ;;  %v6245_v28 = vor.u32 %v6244_v41, %v6241_v45  ;;  %13278 = vst [vmem:[#allocation17_spill] sm:$0xff] %v12131_v42  ;;  %v10567_v46 = vld [vmem:[#allocation2 + $0x74] sm:$0x1] }
 0x253   : > { %v9547_v36 = vcombine.low %v6227_v1, %v6237_v38  ;;  %v6265_v51 = vrot.slane %v6263_v49, 4  ;;  %v6272_v24 = vshll.u32 %v10566_v55, 16  ;;  %v12135_v6 = vadd.f32 %v11892_v15, %v12039_v37  ;;  %v10575_v42 = vld [vmem:[#allocation2 + $0xa4] sm:$0x1] }
 0x254   : > { %v12122_v57 = vpop.f32.mrf.mxu1  ;;  %v6255_v14 = vor.u32 %v6254_v35, %v6250_v40  ;;  %v6268_v31 = vrot.slane %v6266_v43, 5  ;;  %v6276_v56 = vshrl.u32 %v10566_v55, 16  ;;  %v6246_v53 = vrot.slane %v6245_v28, 4  ;;  %v10568_v55 = vld [vmem:[#allocation2 + $0x7c] sm:$0xf] }
 0x255   : > { %13277 = vst [vmem:[#allocation16_spill] sm:$0xff] %v12122_v57  ;;  %10233 = vmatprep.mubr.msk.bf16.mxu1 %vm4215_vm5, %v9547_v36  ;;  %v6274_v22 = vrot.slane %v6272_v24, 5  ;;  %v6282_v45 = vshll.u32 %v10567_v46, 16  ;;  %v6287_v41 = vshrl.u32 %v6049_v63, 16  ;;  %v6260_v1 = vrot.slane %v6258_v39, 5  ;;  %v12144_v36 = vpop.f32.mrf.mxu0 }
 0x256   : > { %v12129_v61 = vpop.f32.mrf.mxu1  ;;  %v6256_v49 = vrot.slane %v6255_v14, 4  ;;  %v6269_v38 = vor.u32 %v6268_v31, %v6265_v51  ;;  %v6278_v13 = vrot.slane %v6276_v56, 4  ;;  %v6251_v15 = vsel %vm11275_vm10, %v6246_v53, %v6250_v40  ;;  %13279 = vst [vmem:[#allocation18_spill] sm:$0xff] %v12144_v36 }
 0x257   : > { %v6289_v35 = vrot.slane %v6287_v41, 4  ;;  %v6290_v43 = vshll.u32 %v6049_v63, 16  ;;  %v6296_v47 = vshll.u32 %v10568_v55, 16  ;;  %v6300_v39 = vshrl.u32 %v10568_v55, 16  ;;  %v10569_v63 = vld [vmem:[#allocation2 + $0x80] sm:$0x1] }
 0x258   : > { %v12137_v17 = vpop.f32.mrf.mxu1  ;;  %v6261_v28 = vsel %vm11275_vm10, %v6256_v49, %v6260_v1  ;;  %v6270_v24 = vrot.slane %v6269_v38, 4  ;;  %v6279_v14 = vor.u32 %v6278_v13, %v6274_v22  ;;  %v6284_v31 = vrot.slane %v6282_v45, 5  ;;  %v10570_v38 = vld [vmem:[#allocation2 + $0x88] sm:$0xf] }
 0x259   : > { %v9548_v56 = vcombine.low %v6251_v15, %v6261_v28  ;;  %v6292_v46 = vrot.slane %v6290_v43, 5  ;;  %v6298_v23 = vrot.slane %v6296_v47, 5  ;;  %v6302_v53 = vrot.slane %v6300_v39, 4  ;;  %v12155_v15 = vpop.f32.mrf.mxu0 }
 0x25a   : > { %v12140_v57 = vpop.f32.mrf.mxu1  ;;  %v6280_v40 = vrot.slane %v6279_v14, 4  ;;  %v6306_v41 = vshll.u32 %v10569_v63, 16  ;;  %v6311_v11 = vshrl.u32 %v6052_v32, 16  ;;  %v6275_v49 = vsel %vm11275_vm10, %v6270_v24, %v6274_v22  ;;  %13281 = vst [vmem:[#allocation20_spill] sm:$0xff] %v12155_v15  ;;  %v6055_v14 = vld [vmem:[#allocation2 + $0x90] sm:$0xf] }
 0x25b   : > { %10234 = vmatmul.mubr.msk.bf16.gmra.mxu1 %vm4215_vm5, %v9548_v56  ;;  %v6293_v13 = vor.u32 %v6292_v46, %v6289_v35  ;;  %v6314_v1 = vshll.u32 %v6052_v32, 16  ;;  %v6320_v55 = vshll.u32 %v10570_v38, 16  ;;  %v6303_v45 = vor.u32 %v6302_v53, %v6298_v23  ;;  %v10571_v24 = vld [vmem:[#allocation2 + $0x8c] sm:$0x1] }
 0x25c   : > { %v12148_v51 = vpop.f32.mrf.mxu1  ;;  %v6285_v47 = vsel %vm11275_vm10, %v6280_v40, %v6284_v31  ;;  %v6313_v43 = vrot.slane %v6311_v11, 4  ;;  %v6324_v28 = vshrl.u32 %v10570_v38, 16  ;;  %v6308_v35 = vrot.slane %v6306_v41, 5 }
 0x25d   : > { %13280 = vst [vmem:[#allocation19_spill] sm:$0xff] %v12148_v51  ;;  %v9549_v63 = vcombine.low %v6275_v49, %v6285_v47  ;;  %v6294_v56 = vrot.slane %v6293_v13, 4  ;;  %v6316_v51 = vrot.slane %v6314_v1, 5  ;;  %v6322_v5 = vrot.slane %v6320_v55, 5  ;;  %v12172_v49 = vpop.f32.mrf.mxu0 }
 0x25e   : > { %v12150_v26 = vpop.f32.mrf.mxu1  ;;  %v6304_v22 = vrot.slane %v6303_v45, 4  ;;  %v6326_v32 = vrot.slane %v6324_v28, 4  ;;  %v6330_v46 = vshll.u32 %v10571_v24, 16  ;;  %v12165_v31 = vadd.f32 %v11906_v12, %v12039_v37  ;;  %13282 = vst [vmem:[#allocation21_spill] sm:$0xff] %v12172_v49  ;;  %v6058_v12 = vld [vmem:[#allocation2 + $0x9c] sm:$0xf] }
 0x25f   : > { %v12169_v11 = vadd.f32 %v12039_v37, %v11914_v25  ;;  %10237 = vmatprep.mubr.msk.bf16.mxu1 %vm4215_vm5, %v9549_v63  ;;  %v6317_v40 = vor.u32 %v6316_v51, %v6313_v43  ;;  %v6335_v53 = vshrl.u32 %v6055_v14, 16  ;;  %v6299_v41 = vsel %vm11275_vm10, %v6294_v56, %v6298_v23  ;;  %v10572_v28 = vld [vmem:[#allocation2 + $0x94] sm:$0xf]  ;;  %v12180_v51 = vpop.f32.mrf.mxu0 }
 0x260   : > { %v12159_v39 = vpop.f32.mrf.mxu1  ;;  %v6309_v13 = vsel %vm11275_vm10, %v6304_v22, %v6308_v35  ;;  %v6327_v1 = vor.u32 %v6326_v32, %v6322_v5  ;;  %v6338_v38 = vshll.u32 %v6055_v14, 16  ;;  %v6344_v63 = vshll.u32 %v10572_v28, 16  ;;  %13284 = vst [vmem:[#allocation23_spill] sm:$0xff] %v12180_v51  ;;  %v10573_v14 = vld [vmem:[#allocation2 + $0x98] sm:$0x1] }
 0x261   : > { %v9550_v47 = vcombine.low %v6299_v41, %v6309_v13  ;;  %v6318_v25 = vrot.slane %v6317_v40, 4  ;;  %v6337_v45 = vrot.slane %v6335_v53, 4  ;;  %v6332_v24 = vrot.slane %v6330_v46, 5 }
 0x262   : > { %v12161_v36 = vpop.f32.mrf.mxu1  ;;  %v6328_v43 = vrot.slane %v6327_v1, 4  ;;  %v6340_v49 = vrot.slane %v6338_v38, 5  ;;  %v6348_v15 = vshrl.u32 %v10572_v28, 16  ;;  %v6346_v56 = vrot.slane %v6344_v63, 5  ;;  %v12191_v63 = vpop.f32.mrf.mxu0 }
 0x263   : > { %10238 = vmatmul.mubr.msk.bf16.gmra.mxu1 %vm4215_vm5, %v9550_v47  ;;  %v6354_v22 = vshll.u32 %v10573_v14, 16  ;;  %v6359_v35 = vshrl.u32 %v6058_v12, 16  ;;  %v6362_v32 = vshll.u32 %v6058_v12, 16  ;;  %v6323_v40 = vsel %vm11275_vm10, %v6318_v25, %v6322_v5  ;;  %13285 = vst [vmem:[#allocation24_spill] sm:$0xff] %v12191_v63  ;;  %v6061_v5 = vld [vmem:[#allocation2 + $0xa8] sm:$0xf] }
 0x264   : > { %v12178_v55 = vpop.f32.mrf.mxu1  ;;  %v6333_v53 = vsel %vm11275_vm10, %v6328_v43, %v6332_v24  ;;  %v6341_v41 = vor.u32 %v6340_v49, %v6337_v45  ;;  %v6350_v13 = vrot.slane %v6348_v15, 4  ;;  %v6378_v0 = vshll.u32 %v10575_v42, 16  ;;  %v12208_v63 = vpop.f32.mrf.mxu0 }
 0x265   : > { %13283 = vst [vmem:[#allocation22_spill] sm:$0xff] %v12178_v55  ;;  %v9551_v1 = vcombine.low %v6323_v40, %v6333_v53  ;;  %v6361_v38 = vrot.slane %v6359_v35, 4  ;;  %v6364_v28 = vrot.slane %v6362_v32, 5  ;;  %v10574_v55 = vld [vmem:[#allocation2 + $0xa0] sm:$0xf]  ;;  %v12197_v15 = vadd.f32 %v11929_v44, %v12039_v37  ;;  %13287 = vst [vmem:[#allocation26_spill] sm:$0xff] %v12208_v63 }
 0x266   : > { %v12182_v23 = vpop.f32.mrf.mxu1  ;;  %v6368_v47 = vshll.u32 %v10574_v55, 16  ;;  %v6342_v14 = vrot.slane %v6341_v41, 4  ;;  %v6351_v51 = vor.u32 %v6350_v13, %v6346_v56  ;;  %v6372_v12 = vshrl.u32 %v10574_v55, 16  ;;  %v10576_v41 = vld [vmem:[#allocation2 + $0xac] sm:$0xf] }
 0x267   : > { %v12201_v49 = vadd.f32 %v11938_v33, %v12039_v37  ;;  %10241 = vmatprep.mubr.msk.bf16.mxu1 %vm4215_vm5, %v9551_v1  ;;  %v6365_v45 = vor.u32 %v6364_v28, %v6361_v38  ;;  %v6356_v42 = vrot.slane %v6354_v22, 5  ;;  %v6383_v53 = vshrl.u32 %v6061_v5, 16 }
 0x268   : > { %v12189_v46 = vpop.f32.mrf.mxu1  ;;  %v6370_v43 = vrot.slane %v6368_v47, 5  ;;  %v6347_v55 = vsel %vm11275_vm10, %v6342_v14, %v6346_v56  ;;  %v6352_v24 = vrot.slane %v6351_v51, 4  ;;  %v6374_v35 = vrot.slane %v6372_v12, 4  ;;  %v6064_v47 = vld [vmem:[#allocation2 + $0xb4] sm:$0xf] }
 0x269   : > { %v6366_v40 = vrot.slane %v6365_v45, 4  ;;  %v6386_v44 = vshll.u32 %v6061_v5, 16  ;;  %v6392_v13 = vshll.u32 %v10576_v41, 16  ;;  %v6380_v38 = vrot.slane %v6378_v0, 5  ;;  %v10577_v14 = vld [vmem:[#allocation2 + $0xb0] sm:$0x1] }
 0x26a   : > { %v12193_v25 = vpop.f32.mrf.mxu1  ;;  %v6357_v33 = vsel %vm11275_vm10, %v6352_v24, %v6356_v42  ;;  %v6375_v1 = vor.u32 %v6374_v35, %v6370_v43  ;;  %v6396_v28 = vshrl.u32 %v10576_v41, 16  ;;  %v6385_v51 = vrot.slane %v6383_v53, 4  ;;  %v10578_v35 = vld [vmem:[#allocation2 + $0xb8] sm:$0xf] }
 0x26b   : > { %v9552_v56 = vcombine.low %v6347_v55, %v6357_v33  ;;  %v6388_v22 = vrot.slane %v6386_v44, 5  ;;  %v6402_v12 = vshll.u32 %v10577_v14, 16  ;;  %v6371_v45 = vsel %vm11275_vm10, %v6366_v40, %v6370_v43  ;;  %v12217_v55 = vpop.f32.mrf.mxu0  ;;  %v10579_v43 = vld [vmem:[#allocation2 + $0xbc] sm:$0x1] }
 0x26c   : > { %v12206_v32 = vpop.f32.mrf.mxu1  ;;  %v6376_v5 = vrot.slane %v6375_v1, 4  ;;  %v6398_v60 = vrot.slane %v6396_v28, 4  ;;  %v6407_v42 = vshrl.u32 %v6064_v47, 16  ;;  %v6410_v0 = vshll.u32 %v6064_v47, 16  ;;  %13288 = vst [vmem:[#allocation27_spill] sm:$0xff] %v12217_v55 }
 0x26d   : > { %13286 = vst [vmem:[#allocation25_spill] sm:$0xff] %v12206_v32  ;;  %v6394_v32 = vrot.slane %v6392_v13, 5  ;;  %10242 = vmatmul.mubr.msk.bf16.gmra.mxu1 %vm4215_vm5, %v9552_v56  ;;  %v6389_v24 = vor.u32 %v6388_v22, %v6385_v51  ;;  %v6416_v41 = vshll.u32 %v10578_v35, 16  ;;  %v6420_v33 = vshrl.u32 %v10578_v35, 16  ;;  %v6067_v13 = vld [vmem:[#allocation2 + $0xc0] sm:$0xf]  ;;  %v12223_v22 = vpop.f32.mrf.mxu0 }
 0x26e   : > { %v6381_v53 = vsel %vm11275_vm10, %v6376_v5, %v6380_v38  ;;  %v6426_v40 = vshll.u32 %v10579_v43, 16  ;;  %v6409_v56 = vrot.slane %v6407_v42, 4  ;;  %v6412_v51 = vrot.slane %v6410_v0, 5  ;;  %13289 = vst [vmem:[#allocation28_spill] sm:$0xff] %v12223_v22  ;;  %v10580_v0 = vld [vmem:[#allocation2 + $0xc4] sm:$0xf] }
 0x26f   : > { %v6399_v44 = vor.u32 %v6398_v60, %v6394_v32  ;;  %v9553_v28 = vcombine.low %v6371_v45, %v6381_v53  ;;  %v6390_v14 = vrot.slane %v6389_v24, 4  ;;  %v6404_v63 = vrot.slane %v6402_v12, 5  ;;  %v12230_v22 = vpop.f32.mrf.mxu0 }
 0x270   : > { %v6418_v9 = vrot.slane %v6416_v41, 5  ;;  %v6422_v55 = vrot.slane %v6420_v33, 4  ;;  %v6413_v38 = vor.u32 %v6412_v51, %v6409_v56  ;;  %v6428_v5 = vrot.slane %v6426_v40, 5 }
 0x271   : > { %v12214_v16 = vpop.f32.mrf.mxu1  ;;  %v6400_v47 = vrot.slane %v6399_v44, 4  ;;  %10245 = vmatprep.mubr.msk.bf16.mxu1 %vm4215_vm5, %v9553_v28  ;;  %v6395_v60 = vsel %vm11275_vm10, %v6390_v14, %v6394_v32  ;;  %v6431_v35 = vshrl.u32 %v6067_v13, 16  ;;  %v6434_v42 = vshll.u32 %v6067_v13, 16  ;;  %v10581_v14 = vld [vmem:[#allocation2 + $0xc8] sm:$0x1] }
 0x272   : > { %v6423_v24 = vor.u32 %v6422_v55, %v6418_v9  ;;  %v6440_v53 = vshll.u32 %v10580_v0, 16  ;;  %v6414_v12 = vrot.slane %v6413_v38, 4  ;;  %v6444_v33 = vshrl.u32 %v10580_v0, 16 }
 0x273   : > { %v12221_v1 = vpop.f32.mrf.mxu1  ;;  %v6405_v45 = vsel %vm11275_vm10, %v6400_v47, %v6404_v63  ;;  %v6433_v41 = vrot.slane %v6431_v35, 4  ;;  %v6436_v59 = vrot.slane %v6434_v42, 5  ;;  %v6450_v40 = vshll.u32 %v10581_v14, 16 }
 0x274   : > { %v9554_v44 = vcombine.low %v6395_v60, %v6405_v45  ;;  %v6424_v28 = vrot.slane %v6423_v24, 4  ;;  %v6442_v32 = vrot.slane %v6440_v53, 5  ;;  %v4441_v56 = vadd.f32 %v12039_v37, %v11954_v2  ;;  %v12251_v24 = vpop.f32.mrf.mxu0  ;;  %v12318_v53 = vld [vmem:[#allocation2 + $0xd0] sm:$0xf] }
 0x275   : > { %v10138_v43 = vpop.f32.mrf.mxu1  ;;  %v4444_v63 = vadd.f32 %v11964_v29, %v12039_v37  ;;  %v4447_v55 = vadd.f32 %v11976_v27, %v12039_v37  ;;  %v6446_v13 = vrot.slane %v6444_v33, 4  ;;  %v4445_v47 = vadd.f32 %v12039_v37, %v11991_v34 }
 0x276   : > { %10246 = vmatmul.mubr.msk.bf16.gmra.mxu1 %vm4215_vm5, %v9554_v44  ;;  %v6419_v60 = vsel %vm11275_vm10, %v6414_v12, %v6418_v9  ;;  %v6429_v2 = vsel %vm11275_vm10, %v6424_v28, %v6428_v5  ;;  %v6437_v38 = vor.u32 %v6436_v59, %v6433_v41  ;;  %v6452_v45 = vrot.slane %v6450_v40, 5 }
 0x277   : > { %v12239_v51 = vpop.f32.mrf.mxu1  ;;  %v9555_v35 = vcombine.low %v6419_v60, %v6429_v2  ;;  %v6447_v29 = vor.u32 %v6446_v13, %v6442_v32  ;;  %v12249_v27 = vadd.f32 %v12099_v54, %v12046_v10  ;;  %v4448_v42 = vadd.f32 %v11997_v62, %v12039_v37  ;;  %v10518_v13 = vld [vmem:[#allocation2 + $0x24] sm:$0xff]  }
 0x278   : > { %v6438_v34 = vrot.slane %v6437_v38, 4  ;;  %v12257_v9 = vadd.f32 %v12101_v18, %v12095_v8  ;;  %v12261_v59 = vadd.f32 %v12120_v30, %v12105_v58  ;;  %v12266_v10 = vadd.f32 %v12129_v61, %v12109_v19 }
 0x279   : > { %10249 = vmatprep.mubr.msk.bf16.mxu1 %vm4215_vm5, %v9555_v35  ;;  %v6448_v5 = vrot.slane %v6447_v29, 4  ;;  %v12270_v54 = vadd.f32 %v12137_v17, %v12113_v21  ;;  %v12274_v62 = vadd.f32 %v12140_v57, %v12135_v6  ;;  %v4451_v18 = vadd.f32 %v12010_v7, %v12039_v37  ;;  %v12300_v6 = vpop.f32.mrf.mxu0  ;;  %v10519_v35 = vld [vmem:[#allocation2 + $0x30] sm:$0xff]  }
 0x27a   : > { %v6443_v58 = vsel %vm11275_vm10, %v6438_v34, %v6442_v32  ;;  %v12282_v30 = vadd.f32 %v12150_v26, %v12165_v31  ;;  %v12286_v19 = vadd.f32 %v12159_v39, %v12169_v11  ;;  %v4449_v21 = vadd.f32 %v12039_v37, %v12019_v20  ;;  %13290 = vst [vmem:[#allocation29_spill] sm:$0xff] %v12300_v6  ;;  %v7622_v11 = vld [vmem:[#allocation2 + $0xcc] sm:$0xf]  ;;  %v10584_v6 = vld [vmem:[#allocation2 + $0x28] sm:$0xf] }
 0x27b   : > { %v6453_v57 = vsel %vm11275_vm10, %v6448_v5, %v6452_v45  ;;  %v12294_v7 = vadd.f32 %v12161_v36, %v12197_v15  ;;  %v12298_v61 = vadd.f32 %v12182_v23, %v12201_v49  ;;  %v4452_v17 = vadd.f32 %v12025_v4, %v12039_v37  ;;  %v10517_v36 = vld [vmem:[#allocation2 + $0x18] sm:$0xff]   ;;  %v12320_v4 = vld [vmem:[#allocation2 + $0xd4] sm:$0x1] }
 0x27c   : > { %v9556_v39 = vcombine.low %v6443_v58, %v6453_v57  ;;  %v12305_v20 = vadd.f32 %v12189_v46, %v4441_v56  ;;  %v12308_v31 = vadd.f32 %v12193_v25, %v4444_v63  ;;  %v12311_v15 = vadd.f32 %v12214_v16, %v4447_v55  ;;  %v12322_v46 = vpop.f32.mrf.mxu0  ;;  %v13291_v58 = vld [vmem:[#allocation10_spill] sm:$0xff] }
 0x27d   : > { %v10141_v8 = vpop.f32.mrf.mxu1  ;;  %v12314_v23 = vadd.f32 %v12221_v1, %v4445_v47  ;;  %v12316_v49 = vadd.f32 %v10138_v43, %v4448_v42  ;;  %v7986_v1 = vshrl.u32 %v7622_v11, 16  ;;  %v7989_v43 = vshll.u32 %v7622_v11, 16 }
 0x27e   : > { %10250 = vmatmul.mubr.msk.bf16.gmra.mxu1 %vm4215_vm5, %v9556_v39  ;;  %v12325_v25 = vadd.f32 %v10141_v8, %v4451_v18  ;;  %v7995_v12 = vshll.u32 %v12318_v53, 16  ;;  %v7999_v41 = vshrl.u32 %v12318_v53, 16  ;;  %v8005_v33 = vshll.u32 %v12320_v4, 16  ;;  %v12335_v14 = vpop.f32.mrf.mxu0 }
 0x27f   : > { %v5111_v26 = vpop.f32.mrf.mxu1  ;;  %10289 = vmatprep.mubr.msk.bf16.mxu1 %vm4215_vm5, %v10517_v36  ;;  %v7988_v28 = vrot.slane %v7986_v1, 4  ;;  %v7991_v32 = vrot.slane %v7989_v43, 5  ;;  %v8578_v47 = vsel %vm4264_vm4, %v12059_v3, 0  ;;  %v4455_v38 = vadd.f32 %v12041_v50, %v12039_v37  ;;  %v10520_v36 = vld [vmem:[#allocation2 + $0x3c] sm:$0xff]  }
 0x280   : > { %v12327_v44 = vadd.f32 %v5111_v26, %v4449_v21  ;;  %v7997_v56 = vrot.slane %v7995_v12, 5  ;;  %v8001_v63 = vrot.slane %v7999_v41, 4  ;;  %v8007_v2 = vrot.slane %v8005_v33, 5  ;;  %v12343_v45 = vpop.f32.mrf.mxu0  ;;  %v13293_v43 = vld [vmem:[#allocation12_spill] sm:$0xff]  ;;  %v13294_v33 = vld [vmem:[#allocation13_spill] sm:$0xff] }
 0x281   : > { %v10142_v0 = vpop.f32.mrf.mxu1  ;;  %v7992_v55 = vor.u32 %v7991_v32, %v7988_v28  ;;  %v4453_v5 = vadd.f32 %v12039_v37, %v12054_v48  ;;  %v4456_v21 = vadd.f32 %v13291_v58, %v12039_v37  ;;  %v4459_v12 = vadd.f32 %v13293_v43, %v12039_v37 }
 0x282   : > { %v12329_v16 = vadd.f32 %v10142_v0, %v4452_v17  ;;  %v8002_v60 = vor.u32 %v8001_v63, %v7997_v56  ;;  %v12359_v17 = vpop.f32.mrf.mxu0  ;;  %v10521_v0 = vld [vmem:[#allocation2 + $0x48] sm:$0xff]   ;;  %v4457_v28 = vadd.f32 %v12039_v37, %v13294_v33  ;;  %v8474_v43 = vrot.slane %v12318_v53, 5 }
 0x283   : > { %v12337_v40 = vpop.f32.mrf.mxu1  ;;  %v7993_v29 = vrot.slane %v7992_v55, 4  ;;  %v13295_v55 = vld [vmem:[#allocation14_spill] sm:$0xff] }
 0x284   : > { %v8003_v34 = vrot.slane %v8002_v60, 4  ;;  %v12364_v11 = vpop.f32.mrf.mxu0 }
 0x285   : > { %v7998_v8 = vsel %vm11275_vm10, %v7993_v29, %v7997_v56 }
 0x286   : > { %10290 = vmatmul.mubr.msk.bf16.vlgmr.msra.gmra.mxu1 %vm4215_vm5, %v10518_v13  ;;  %v8008_v18 = vsel %vm11275_vm10, %v8003_v34, %v8007_v2  ;;  %v12370_v52 = vpop.f32.mrf.mxu0  ;;  %v4460_v13 = vadd.f32 %v13295_v55, %v12039_v37  ;;  %v10523_v2 = vld [vmem:[#allocation2 + $0x60] sm:$0xff]  }
 0x287   : > { %10356 = vmatpush3.bf16.msra.mxu1 %v8578_v47  ;;  %10293 = vmatprep.mubr.msk.bf16.mxu1 %vm4215_vm5, %v10519_v35  ;;  %v9671_v26 = vcombine.low %v7998_v8, %v8008_v18  ;;  %v10522_v47 = vld [vmem:[#allocation2 + $0x54] sm:$0xff]   ;;  %v10524_v18 = vld [vmem:[#allocation2 + $0x6c] sm:$0xff]  }
 0x288   : > { %v12378_v63 = vpop.f32.mrf.mxu0 }
 0x289   : > { %10352 = vmatmul.mubr.msk.bf16.gmra.mxu0 %vm4215_vm5, %v9671_v26 }
 0x28b   : > { %v10145_v42 = vpop.f32.mrf.mxu1 }
 0x28c   : > { %v12349_v3 = vadd.f32 %v10145_v42, %v4455_v38  ;;  %v12390_v42 = vpop.f32.mrf.mxu0 }
 0x28d   : > { %v5127_v50 = vpop.f32.mrf.mxu1 }
 0x28e   : > { %v12357_v57 = vadd.f32 %v5127_v50, %v4453_v5  ;;  %10294 = vmatmul.mubr.msk.bf16.gmra.mxu1 %vm4215_vm5, %v10520_v36  ;;  %v12392_v5 = vpop.f32.mrf.mxu0  ;;  %v8318_v50 = vld [vmem:[#allocation2 + $0xcc] sm:$0xe] }
 0x28f   : > { %v10146_v48 = vpop.f32.mrf.mxu1  ;;  %10297 = vmatprep.mubr.msk.bf16.mxu1 %vm4215_vm5, %v10521_v0  ;;  %v9703_v0 = vrot.slane %v8318_v50, 9 }
 0x290   : > { %v12361_v39 = vadd.f32 %v10146_v48, %v4456_v21  ;;  %v10525_v21 = vld [vmem:[#allocation2 + $0x78] sm:$0xff]   ;;  %v12400_v48 = vpop.f32.mrf.mxu0 }
 0x291   : > { %v12366_v1 = vpop.f32.mrf.mxu1  ;;  %13297 = vst [vmem:[#allocation13_spill] sm:$0xff] %v12400_v48  ;;  %v12413_v33 = vsel %vm11536_vm13, %v9703_v0, %v8474_v43 }
 0x292   : > { %13292 = vst [vmem:[#allocation10_spill] sm:$0xff] %v12366_v1 }
 0x296   : > { %v10149_v41 = vpop.f32.mrf.mxu1  ;;  %10298 = vmatmul.mubr.msk.bf16.gmra.mxu1 %vm4215_vm5, %v10522_v47  ;;  %v10526_v47 = vld [vmem:[#allocation2 + $0x84] sm:$0xff]  }
 0x297   : > { %v12376_v32 = vadd.f32 %v10149_v41, %v4459_v12  ;;  %10301 = vmatprep.mubr.msk.bf16.mxu1 %vm4215_vm5, %v10523_v2  ;;  %v8477_v12 = vrot.slane %v12320_v4, 5  ;;  %v10527_v2 = vld [vmem:[#allocation2 + $0x90] sm:$0xff]  }
 0x298   : > { %v5143_v56 = vpop.f32.mrf.mxu1  ;;  %v13324_v41 = vld [vmem:[#allocation18_spill] sm:$0xff] }
 0x299   : > { %v12382_v60 = vadd.f32 %v5143_v56, %v4457_v28  ;;  %v8476_v28 = vrot.slane %v8474_v43, 4  ;;  %v12415_v56 = vpop.f32.mrf.mxu0 }
 0x29a   : > { %v10150_v38 = vpop.f32.mrf.mxu1  ;;  %13300 = vst [vmem:[#allocation3_spill] sm:$0xff] %v12415_v56 }
 0x29b   : > { %v12385_v35 = vadd.f32 %v10150_v38, %v4460_v13  ;;  %v12422_v13 = vsel %vm11536_vm13, %v8476_v28, %v8477_v12  ;;  %v10582_v28 = vld [vmem:[#allocation2 + $0x1c] sm:$0xf] }
 0x29c   : > { %v12388_v29 = vpop.f32.mrf.mxu1 }
 0x29d   : > { %13296 = vst [vmem:[#allocation12_spill] sm:$0xff] %v12388_v29 }
 0x29e   : > { %v10155_v34 = vpop.f32.mrf.mxu1  ;;  %10302 = vmatmul.mubr.msk.bf16.gmra.mxu1 %vm4215_vm5, %v10524_v18  ;;  %v10528_v18 = vld [vmem:[#allocation2 + $0x9c] sm:$0xff]  }
 0x29f   : > { %v12395_v37 = vadd.f32 %v10155_v34, %v12249_v27  ;;  %10305 = vmatprep.mubr.msk.bf16.mxu1 %vm4215_vm5, %v10525_v21  ;;  %v12429_v34 = vpop.f32.mrf.mxu0  ;;  %v10529_v21 = vld [vmem:[#allocation2 + $0xa8] sm:$0xff]  }
 0x2a0   : > { %v5504_v8 = vpop.f32.mrf.mxu1  ;;  %13301 = vst [vmem:[#allocation30_spill] sm:$0xff] %v12429_v34 }
 0x2a1   : > { %v12398_v58 = vadd.f32 %v5504_v8, %v12257_v9  ;;  %v12436_v8 = vpop.f32.mrf.mxu0 }
 0x2a2   : > { %v10156_v26 = vpop.f32.mrf.mxu1  ;;  %13302 = vst [vmem:[#allocation31_spill] sm:$0xff] %v12436_v8 }
 0x2a3   : > { %v12404_v36 = vadd.f32 %v10156_v26, %v12261_v59 }
 0x2a4   : > { %v12407_v27 = vpop.f32.mrf.mxu1 }
 0x2a5   : > { %13298 = vst [vmem:[#allocation14_spill] sm:$0xff] %v12407_v27 }
 0x2a6   : > { %v10159_v9 = vpop.f32.mrf.mxu1  ;;  %10306 = vmatmul.mubr.msk.bf16.gmra.mxu1 %vm4215_vm5, %v10526_v47 }
 0x2a7   : > { %v12418_v59 = vadd.f32 %v10159_v9, %v12266_v10  ;;  %10309 = vmatprep.mubr.msk.bf16.mxu1 %vm4215_vm5, %v10527_v2 }
 0x2a8   : > { %v5520_v55 = vpop.f32.mrf.mxu1 }
 0x2a9   : > { %v12425_v53 = vadd.f32 %v5520_v55, %v12270_v54  ;;  %v12440_v54 = vpop.f32.mrf.mxu0  ;;  %v8369_v55 = vrot.slane %v10582_v28, 5 }
 0x2aa   : > { %v10160_v38 = vpop.f32.mrf.mxu1  ;;  %13304 = vst [vmem:[#allocation33_spill] sm:$0xff] %v12440_v54 }
 0x2ab   : > { %v12433_v10 = vadd.f32 %v10160_v38, %v12274_v62  ;;  %v12447_v43 = vpop.f32.mrf.mxu0  ;;  %v10530_v38 = vld [vmem:[#allocation2 + $0xb4] sm:$0xff]  }
 0x2ac   : > { %v12438_v50 = vpop.f32.mrf.mxu1  ;;  %13305 = vst [vmem:[#allocation34_spill] sm:$0xff] %v12447_v43 }
 0x2ad   : > { %13303 = vst [vmem:[#allocation32_spill] sm:$0xff] %v12438_v50  ;;  %v12455_v2 = vpop.f32.mrf.mxu0 }
 0x2ae   : > { %10310 = vmatmul.mubr.msk.bf16.gmra.mxu1 %vm4215_vm5, %v10528_v18  ;;  %13306 = vst [vmem:[#allocation35_spill] sm:$0xff] %v12455_v2 }
 0x2af   : > { %v10163_v26 = vpop.f32.mrf.mxu1  ;;  %10313 = vmatprep.mubr.msk.bf16.mxu1 %vm4215_vm5, %v10529_v21  ;;  %v8371_v21 = vrot.slane %v8369_v55, 4 }
 0x2b0   : > { %v12444_v0 = vadd.f32 %v10163_v26, %v12282_v30  ;;  %v10531_v30 = vld [vmem:[#allocation2 + $0xc0] sm:$0xff]   ;;  %v12459_v26 = vpop.f32.mrf.mxu0 }
 0x2b1   : > { %v5536_v62 = vpop.f32.mrf.mxu1  ;;  %13308 = vst [vmem:[#allocation37_spill] sm:$0xff] %v12459_v26 }
 0x2b2   : > { %v12450_v12 = vadd.f32 %v5536_v62, %v12286_v19  ;;  %v8303_v19 = vld [vmem:[#allocation2 + $0x18] sm:$0xe]  ;;  %v10583_v62 = vld [vmem:[#allocation2 + $0x20] sm:$0x1]  ;;  %v12466_v50 = vpop.f32.mrf.mxu0 }
 0x2b3   : > { %v10164_v9 = vpop.f32.mrf.mxu1  ;;  %v8372_v4 = vrot.slane %v10583_v62, 5  ;;  %13309 = vst [vmem:[#allocation38_spill] sm:$0xff] %v12466_v50  ;;  %v9688_v27 = vrot.slane %v8303_v19, 9  ;;  %v10586_v19 = vld [vmem:[#allocation2 + $0x2c] sm:$0x1] }
 0x2b4   : > { %v12453_v47 = vadd.f32 %v10164_v9, %v12294_v7  ;;  %v8376_v7 = vrot.slane %v10584_v6, 5  ;;  %v12478_v50 = vpop.f32.mrf.mxu0 }
 0x2b5   : > { %v12457_v18 = vpop.f32.mrf.mxu1  ;;  %v8373_v26 = vsel %vm11536_vm13, %v8371_v21, %v8372_v4  ;;  %v8370_v62 = vsel %vm11536_vm13, %v9688_v27, %v8369_v55  ;;  %13310 = vst [vmem:[#allocation39_spill] sm:$0xff] %v12478_v50  ;;  %v8304_v4 = vld [vmem:[#allocation2 + $0x24] sm:$0xe] }
 0x2b6   : > { %13307 = vst [vmem:[#allocation36_spill] sm:$0xff] %v12457_v18  ;;  %10314 = vmatmul.mubr.msk.bf16.gmra.mxu1 %vm4215_vm5, %v10530_v38  ;;  %v10532_v18 = vld [vmem:[#allocation2 + $0xcc] sm:$0xff]   ;;  %v10585_v38 = vld [vmem:[#allocation2 + $0x34] sm:$0xf]  ;;  %v9705_v43 = vcombine.low %v8370_v62, %v8373_v26  ;;  %v9689_v27 = vrot.slane %v8304_v4, 9 }
 0x2b7   : > { %10317 = vmatprep.mubr.msk.bf16.mxu1 %vm4215_vm5, %v10531_v30  ;;  %v8383_v29 = vrot.slane %v10585_v38, 5  ;;  %v10587_v38 = vld [vmem:[#allocation2 + $0x38] sm:$0x1]  ;;  %v10588_v26 = vld [vmem:[#allocation2 + $0x40] sm:$0xf] }
 0x2b8   : > { %v8386_v54 = vrot.slane %v10587_v38, 5 }
 0x2b9   : > { %v8385_v21 = vrot.slane %v8383_v29, 4 }
 0x2bb   : > { %v10167_v28 = vpop.f32.mrf.mxu1  ;;  %v8387_v50 = vsel %vm11536_vm13, %v8385_v21, %v8386_v54  ;;  %v10590_v21 = vld [vmem:[#allocation2 + $0x44] sm:$0x1] }
 0x2bc   : > { %v12464_v9 = vadd.f32 %v10167_v28, %v12298_v61  ;;  %v8378_v61 = vrot.slane %v8376_v7, 4 }
 0x2bd   : > { %v5552_v2 = vpop.f32.mrf.mxu1 }
 0x2be   : > { %v12471_v30 = vadd.f32 %v5552_v2, %v12305_v20  ;;  %10318 = vmatmul.mubr.msk.bf16.gmra.mxu1 %vm4215_vm5, %v10532_v18  ;;  %v8379_v20 = vrot.slane %v10586_v19, 5  ;;  %v8305_v2 = vld [vmem:[#allocation2 + $0x30] sm:$0xe]  ;;  %v8377_v19 = vsel %vm11536_vm13, %v9689_v27, %v8376_v7  ;;  %v8393_v7 = vrot.slane %v10590_v21, 5  ;;  %v8307_v27 = vld [vmem:[#allocation2 + $0x48] sm:$0xe] }
 0x2bf   : > { %v10168_v6 = vpop.f32.mrf.mxu1  ;;  %10357 = vmatprep.mubr.msk.bf16.mxu1 %vm4215_vm5, %v9705_v43  ;;  %v9690_v18 = vrot.slane %v8305_v2, 9  ;;  %v10589_v43 = vld [vmem:[#allocation2 + $0x4c] sm:$0xf]  ;;  %v8306_v2 = vld [vmem:[#allocation2 + $0x3c] sm:$0xe] }
 0x2c0   : > { %v12476_v28 = vadd.f32 %v10168_v6, %v12308_v31  ;;  %v8380_v55 = vsel %vm11536_vm13, %v8378_v61, %v8379_v20  ;;  %v8390_v31 = vrot.slane %v10588_v26, 5  ;;  %v12486_v6 = vpop.f32.mrf.mxu0  ;;  %v8397_v8 = vrot.slane %v10589_v43, 5  ;;  %v10591_v43 = vld [vmem:[#allocation2 + $0x50] sm:$0x1]  ;;  %v10593_v21 = vld [vmem:[#allocation2 + $0x64] sm:$0xf] }
 0x2c1   : > { %v12484_v62 = vpop.f32.mrf.mxu1  ;;  %13311 = vst [vmem:[#allocation40_spill] sm:$0xff] %v12486_v6  ;;  %v9706_v38 = vcombine.low %v8377_v19, %v8380_v55  ;;  %v8384_v4 = vsel %vm11536_vm13, %v9690_v18, %v8383_v29  ;;  %v8400_v29 = vrot.slane %v10591_v43, 5  ;;  %v9691_v18 = vrot.slane %v8306_v2, 9 }
 0x2c2   : > { %v9707_v61 = vcombine.low %v8384_v4, %v8387_v50  ;;  %v8392_v20 = vrot.slane %v8390_v31, 4  ;;  %v12494_v1 = vpop.f32.mrf.mxu0  ;;  %v8399_v6 = vrot.slane %v8397_v8, 4  ;;  %v8411_v34 = vrot.slane %v10593_v21, 5  ;;  %v8309_v21 = vld [vmem:[#allocation2 + $0x60] sm:$0xe] }
 0x2c3   : > { %13312 = vst [vmem:[#allocation41_spill] sm:$0xff] %v12494_v1 }
 0x2c4   : > { %v8394_v19 = vsel %vm11536_vm13, %v8392_v20, %v8393_v7 }
 0x2c6   : > { %v10171_v26 = vpop.f32.mrf.mxu1  ;;  %10358 = vmatmul.mubr.msk.bf16.vlgmr.msra.gmra.mxu1 %vm4215_vm5, %v9706_v38  ;;  %v10592_v38 = vld [vmem:[#allocation2 + $0x58] sm:$0xf] }
 0x2c7   : > { %v12498_v54 = vadd.f32 %v10171_v26, %v12311_v15  ;;  %10361 = vmatprep.mubr.msk.bf16.mxu1 %vm4215_vm5, %v9707_v61  ;;  %v8404_v4 = vrot.slane %v10592_v38, 5  ;;  %v12506_v15 = vpop.f32.mrf.mxu0  ;;  %v9692_v26 = vrot.slane %v8307_v27, 9  ;;  %v8401_v61 = vsel %vm11536_vm13, %v8399_v6, %v8400_v29  ;;  %v8308_v27 = vld [vmem:[#allocation2 + $0x54] sm:$0xe] }
 0x2c8   : > { %v5568_v55 = vpop.f32.mrf.mxu1  ;;  %v8413_v6 = vrot.slane %v8411_v34, 4 }
 0x2c9   : > { %v12502_v50 = vadd.f32 %v5568_v55, %v12314_v23  ;;  %v8391_v23 = vsel %vm11536_vm13, %v9691_v18, %v8390_v31  ;;  %v8398_v20 = vsel %vm11536_vm13, %v9692_v26, %v8397_v8  ;;  %v8406_v55 = vrot.slane %v8404_v4, 4  ;;  %v12517_v38 = vpop.f32.mrf.mxu0  ;;  %v10595_v31 = vld [vmem:[#allocation2 + $0x68] sm:$0x1]  ;;  %v10596_v26 = vld [vmem:[#allocation2 + $0x70] sm:$0xf] }
 0x2ca   : > { %v10172_v1 = vpop.f32.mrf.mxu1  ;;  %v9708_v2 = vcombine.low %v8391_v23, %v8394_v19  ;;  %v9709_v7 = vcombine.low %v8398_v20, %v8401_v61  ;;  %13313 = vst [vmem:[#allocation42_spill] sm:$0xff] %v12517_v38  ;;  %v8414_v18 = vrot.slane %v10595_v31, 5  ;;  %v9693_v19 = vrot.slane %v8308_v27, 9  ;;  %v10597_v38 = vld [vmem:[#allocation2 + $0x7c] sm:$0xf] }
 0x2cb   : > { %v12511_v43 = vadd.f32 %v10172_v1, %v12316_v49  ;;  %v10594_v49 = vld [vmem:[#allocation2 + $0x5c] sm:$0x1]  ;;  %v8418_v61 = vrot.slane %v10596_v26, 5  ;;  %v12525_v23 = vpop.f32.mrf.mxu0  ;;  %v8425_v56 = vrot.slane %v10597_v38, 5 }
 0x2cc   : > { %v12520_v29 = vpop.f32.mrf.mxu1  ;;  %v8407_v1 = vrot.slane %v10594_v49, 5  ;;  %13314 = vst [vmem:[#allocation43_spill] sm:$0xff] %v12525_v23  ;;  %v8415_v20 = vsel %vm11536_vm13, %v8413_v6, %v8414_v18  ;;  %v8405_v49 = vsel %vm11536_vm13, %v9693_v19, %v8404_v4  ;;  %v8310_v19 = vld [vmem:[#allocation2 + $0x6c] sm:$0xe] }
 0x2cd   : > { %v8420_v38 = vrot.slane %v8418_v61, 4  ;;  %v8427_v26 = vrot.slane %v8425_v56, 4 }
 0x2ce   : > { %10362 = vmatmul.mubr.msk.bf16.gmra.mxu1 %vm4215_vm5, %v9708_v2  ;;  %v8408_v8 = vsel %vm11536_vm13, %v8406_v55, %v8407_v1  ;;  %v9694_v2 = vrot.slane %v8309_v21, 9  ;;  %v8934_v55 = vld [vmem:[%s13255_s5] sm:$0x3] }
 0x2cf   : > { %10365 = vmatprep.mubr.msk.bf16.mxu1 %vm4215_vm5, %v9709_v7  ;;  %v9710_v27 = vcombine.low %v8405_v49, %v8408_v8  ;;  %10434 = vmatprep.subr.msk.bf16.mxu0 %vm4264_vm4, %v8934_v55  ;;  %v8991_v4 = vsel %vm4264_vm4, %v8934_v55, 0 }
 0x2d0   : > { %v8412_v1 = vsel %vm11536_vm13, %v9694_v2, %v8411_v34  ;;  %10390 = vmatpush3.bf16.msra.mxu0 %v8991_v4  ;;  %v10598_v34 = vld [vmem:[#allocation2 + $0x74] sm:$0x1] }
 0x2d1   : > { %v9711_v6 = vcombine.low %v8412_v1, %v8415_v20  ;;  %v8421_v2 = vrot.slane %v10598_v34, 5  ;;  %v9695_v1 = vrot.slane %v8310_v19, 9  ;;  %v10601_v4 = vld [vmem:[#allocation2 + $0x94] sm:$0xf] }
 0x2d2   : > { %v8439_v34 = vrot.slane %v10601_v4, 5 }
 0x2d3   : > { %v8422_v55 = vsel %vm11536_vm13, %v8420_v38, %v8421_v2 }
 0x2d4   : > { %v10175_v7 = vpop.f32.mrf.mxu1 }
 0x2d5   : > { %v12532_v31 = vadd.f32 %v10175_v7, %v12325_v25  ;;  %v12544_v25 = vpop.f32.mrf.mxu0  ;;  %v8311_v7 = vld [vmem:[#allocation2 + $0x78] sm:$0xe] }
 0x2d6   : > { %v5584_v21 = vpop.f32.mrf.mxu1  ;;  %13315 = vst [vmem:[#allocation44_spill] sm:$0xff] %v12544_v25  ;;  %10366 = vmatmul.mubr.msk.bf16.gmra.mxu1 %vm4215_vm5, %v9710_v27  ;;  %v9696_v25 = vrot.slane %v8311_v7, 9  ;;  %v8312_v7 = vld [vmem:[#allocation2 + $0x84] sm:$0xe] }
 0x2d7   : > { %v12541_v18 = vadd.f32 %v5584_v21, %v12327_v44  ;;  %10369 = vmatprep.mubr.msk.bf16.mxu1 %vm4215_vm5, %v9711_v6  ;;  %v10599_v44 = vld [vmem:[#allocation2 + $0x80] sm:$0x1]  ;;  %v10600_v21 = vld [vmem:[#allocation2 + $0x88] sm:$0xf]  ;;  %v12553_v23 = vpop.f32.mrf.mxu0 }
 0x2d8   : > { %v10176_v8 = vpop.f32.mrf.mxu1  ;;  %v8428_v49 = vrot.slane %v10599_v44, 5  ;;  %v8432_v27 = vrot.slane %v10600_v21, 5  ;;  %v8426_v19 = vsel %vm11536_vm13, %v9696_v25, %v8425_v56  ;;  %v8441_v21 = vrot.slane %v8439_v34, 4 }
 0x2d9   : > { %v12549_v20 = vadd.f32 %v10176_v8, %v12329_v16  ;;  %v8419_v16 = vsel %vm11536_vm13, %v9695_v1, %v8418_v61  ;;  %v12563_v44 = vpop.f32.mrf.mxu0  ;;  %v10603_v1 = vld [vmem:[#allocation2 + $0x98] sm:$0x1]  ;;  %v9697_v25 = vrot.slane %v8312_v7, 9 }
 0x2da   : > { %v8429_v6 = vsel %vm11536_vm13, %v8427_v26, %v8428_v49  ;;  %v12557_v48 = vpop.f32.mrf.mxu1  ;;  %v9712_v8 = vcombine.low %v8419_v16, %v8422_v55  ;;  %v8434_v2 = vrot.slane %v8432_v27, 4  ;;  %13317 = vst [vmem:[#allocation46_spill] sm:$0xff] %v12563_v44  ;;  %v10602_v49 = vld [vmem:[#allocation2 + $0x8c] sm:$0x1]  ;;  %v8442_v55 = vrot.slane %v10603_v1, 5 }
 0x2db   : > { %13316 = vst [vmem:[#allocation45_spill] sm:$0xff] %v12549_v20  ;;  %v9713_v38 = vcombine.low %v8426_v19, %v8429_v6  ;;  %v8435_v4 = vrot.slane %v10602_v49, 5  ;;  %v8313_v20 = vld [vmem:[#allocation2 + $0x90] sm:$0xe]  ;;  %v10604_v16 = vld [vmem:[#allocation2 + $0xa0] sm:$0xf]  ;;  %v12575_v44 = vpop.f32.mrf.mxu0  ;;  %v8433_v7 = vsel %vm11536_vm13, %v9697_v25, %v8432_v27 }
 0x2dc   : > { %13320 = vst [vmem:[#allocation49_spill] sm:$0xff] %v12575_v44  ;;  %v8443_v49 = vsel %vm11536_vm13, %v8441_v21, %v8442_v55  ;;  %v10606_v55 = vld [vmem:[#allocation2 + $0xa4] sm:$0x1]  ;;  %v8315_v27 = vld [vmem:[#allocation2 + $0xa8] sm:$0xe] }
 0x2dd   : > { %v8436_v6 = vsel %vm11536_vm13, %v8434_v2, %v8435_v4 }
 0x2de   : > { %10370 = vmatmul.mubr.msk.bf16.gmra.mxu1 %vm4215_vm5, %v9712_v8  ;;  %v8446_v8 = vrot.slane %v10604_v16, 5  ;;  %v9714_v2 = vcombine.low %v8433_v7, %v8436_v6  ;;  %v12586_v16 = vpop.f32.mrf.mxu0 }
 0x2df   : > { %v10179_v26 = vpop.f32.mrf.mxu1  ;;  %10373 = vmatprep.mubr.msk.bf16.mxu1 %vm4215_vm5, %v9713_v38  ;;  %v9698_v38 = vrot.slane %v8313_v20, 9  ;;  %13322 = vst [vmem:[#allocation51_spill] sm:$0xff] %v12586_v16  ;;  %v8314_v20 = vld [vmem:[#allocation2 + $0x9c] sm:$0xe]  ;;  %v8317_v16 = vld [vmem:[#allocation2 + $0xc0] sm:$0xe] }
 0x2e0   : > { %v12568_v61 = vadd.f32 %v10179_v26, %v12349_v3  ;;  %v10605_v3 = vld [vmem:[#allocation2 + $0xac] sm:$0xf]  ;;  %v9699_v6 = vrot.slane %v8314_v20, 9  ;;  %v12594_v7 = vpop.f32.mrf.mxu0 }
 0x2e1   : > { %v5600_v56 = vpop.f32.mrf.mxu1  ;;  %v8453_v26 = vrot.slane %v10605_v3, 5  ;;  %v8449_v3 = vrot.slane %v10606_v55, 5 }
 0x2e2   : > { %13318 = vst [vmem:[#allocation47_spill] sm:$0xff] %v12568_v61  ;;  %v12573_v19 = vadd.f32 %v5600_v56, %v12357_v57  ;;  %v8440_v57 = vsel %vm11536_vm13, %v9698_v38, %v8439_v34  ;;  %v8448_v56 = vrot.slane %v8446_v8, 4  ;;  %v10608_v38 = vld [vmem:[#allocation2 + $0xb8] sm:$0xf]  ;;  %v8447_v55 = vsel %vm11536_vm13, %v9699_v6, %v8446_v8  ;;  %v10610_v8 = vld [vmem:[#allocation2 + $0xc8] sm:$0x1] }
 0x2e3   : > { %v10180_v61 = vpop.f32.mrf.mxu1  ;;  %v9715_v4 = vcombine.low %v8440_v57, %v8443_v49  ;;  %v8455_v21 = vrot.slane %v8453_v26, 4  ;;  %v8460_v49 = vrot.slane %v10608_v38, 5  ;;  %v8470_v6 = vrot.slane %v10610_v8, 5 }
 0x2e4   : > { %13319 = vst [vmem:[#allocation48_spill] sm:$0xff] %v12573_v19  ;;  %v12582_v1 = vadd.f32 %v10180_v61, %v12361_v39  ;;  %v10607_v39 = vld [vmem:[#allocation2 + $0xb0] sm:$0x1]  ;;  %v8450_v34 = vsel %vm11536_vm13, %v8448_v56, %v8449_v3  ;;  %v12605_v19 = vpop.f32.mrf.mxu0 }
 0x2e5   : > { %v12590_v25 = vpop.f32.mrf.mxu1  ;;  %v8456_v61 = vrot.slane %v10607_v39, 5  ;;  %v9716_v39 = vcombine.low %v8447_v55, %v8450_v34  ;;  %v8462_v38 = vrot.slane %v8460_v49, 4 }
 0x2e6   : > { %13321 = vst [vmem:[#allocation50_spill] sm:$0xff] %v12582_v1  ;;  %10374 = vmatmul.mubr.msk.bf16.gmra.mxu1 %vm4215_vm5, %v9714_v2  ;;  %v9700_v2 = vrot.slane %v8315_v27, 9 }
 0x2e7   : > { %10377 = vmatprep.mubr.msk.bf16.mxu1 %vm4215_vm5, %v9715_v4  ;;  %v8457_v57 = vsel %vm11536_vm13, %v8455_v21, %v8456_v61  ;;  %v10609_v4 = vld [vmem:[#allocation2 + $0xc4] sm:$0xf]  ;;  %v8316_v21 = vld [vmem:[#allocation2 + $0xb4] sm:$0xe]  ;;  %v9702_v61 = vrot.slane %v8317_v16, 9 }
 0x2e8   : > { %v8467_v44 = vrot.slane %v10609_v4, 5  ;;  %v8454_v20 = vsel %vm11536_vm13, %v9700_v2, %v8453_v26  ;;  %v10611_v26 = vld [vmem:[#allocation2 + $0xbc] sm:$0x1] }
 0x2e9   : > { %v9717_v3 = vcombine.low %v8454_v20, %v8457_v57  ;;  %v9701_v57 = vrot.slane %v8316_v21, 9  ;;  %v13323_v21 = vld [vmem:[#allocation17_spill] sm:$0xff] }
 0x2ea   : > { %v8469_v4 = vrot.slane %v8467_v44, 4  ;;  %v8468_v16 = vsel %vm11536_vm13, %v9702_v61, %v8467_v44  ;;  %v5992_v44 = vadd.f32 %v13323_v21, %v12395_v37 }
 0x2eb   : > { %v10183_v1 = vpop.f32.mrf.mxu1  ;;  %v8461_v20 = vsel %vm11536_vm13, %v9701_v57, %v8460_v49  ;;  %v5990_v49 = vadd.f32 %v13324_v41, %v12398_v58  ;;  %v13326_v57 = vld [vmem:[#allocation20_spill] sm:$0xff] }
 0x2ec   : > { %v12603_v56 = vadd.f32 %v10183_v1, %v12376_v32  ;;  %v8463_v32 = vrot.slane %v10611_v26, 5 }
 0x2ed   : > { %v5616_v27 = vpop.f32.mrf.mxu1 }
 0x2ee   : > { %10378 = vmatmul.mubr.msk.bf16.gmra.mxu1 %vm4215_vm5, %v9716_v39  ;;  %v12609_v34 = vadd.f32 %v5616_v27, %v12382_v60  ;;  %v8464_v55 = vsel %vm11536_vm13, %v8462_v38, %v8463_v32  ;;  %v12617_v39 = vpop.f32.mrf.mxu0  ;;  %v8471_v60 = vsel %vm11536_vm13, %v8469_v4, %v8470_v6  ;;  %v13325_v32 = vcombine.low %v12413_v33, %v12422_v13 }
 0x2ef   : > { %10381 = vmatprep.mubr.msk.bf16.mxu1 %vm4215_vm5, %v9717_v3  ;;  %v10184_v1 = vpop.f32.mrf.mxu1  ;;  %v9718_v3 = vcombine.low %v8461_v20, %v8464_v55  ;;  %v9719_v27 = vcombine.low %v8468_v16, %v8471_v60  ;;  %v5993_v55 = vadd.f32 %v13326_v57, %v12404_v36  ;;  %v13328_v36 = vld [vmem:[#allocation24_spill] sm:$0xff] }
 0x2f0   : > { %v12613_v2 = vadd.f32 %v10184_v1, %v12385_v35  ;;  %v12625_v8 = vpop.f32.mrf.mxu0 }
 0x2f1   : > { %v12629_v35 = vpop.f32.mrf.mxu1 }
 0x2f2   : > { %v7107_v38 = vpop.f32.mrf.mxu0 }
 0x2f4   : > { %v12637_v6 = vpop.f32.mrf.mxu0 }
 0x2f6   : > { %10382 = vmatmul.mubr.msk.bf16.gmra.mxu1 %vm4215_vm5, %v9718_v3  ;;  %v12652_v58 = vpop.f32.mrf.mxu0  ;;  %v13327_v3 = vld [vmem:[#allocation23_spill] sm:$0xff] }
 0x2f7   : > { %10385 = vmatprep.mubr.msk.bf16.mxu1 %vm4215_vm5, %v9719_v27  ;;  %v5996_v27 = vadd.f32 %v13327_v3, %v12418_v59 }
 0x2f8   : > { %v12656_v13 = vpop.f32.mrf.mxu0 }
 0x2fb   : > { %v10223_v61 = vpop.f32.mrf.mxu1 }
 0x2fc   : > { %v12633_v26 = vadd.f32 %v10223_v61, %v5992_v44  ;;  %v5994_v44 = vadd.f32 %v13328_v36, %v12425_v53 }
 0x2fd   : > { %v6589_v4 = vpop.f32.mrf.mxu1 }
 0x2fe   : > { %10386 = vmatmul.mubr.msk.bf16.gmra.mxu1 %vm4215_vm5, %v13325_v32  ;;  %v6716_v1 = vadd.f32 %v6589_v4, %v5990_v49  ;;  %v7123_v32 = vpop.f32.mrf.mxu0 }
 0x2ff   : > { %v10224_v16 = vpop.f32.mrf.mxu1 }
 0x300   : > { %v12645_v37 = vadd.f32 %v10224_v16, %v5993_v55  ;;  %v12648_v60 = vadd.f32 %v12506_v15, %v6716_v1  ;;  %v13329_v15 = vld [vmem:[#allocation26_spill] sm:$0xff]  ;;  %v12671_v55 = vpop.f32.mrf.mxu0  ;;  %v13331_v16 = vld [vmem:[#allocation28_spill] sm:$0xff] }
 0x301   : > { %v12650_v20 = vpop.f32.mrf.mxu1  ;;  %v5997_v49 = vadd.f32 %v13329_v15, %v12433_v10  ;;  %13330 = vst [vmem:[#allocation17_spill] sm:$0xff] %v12671_v55  ;;  %v6000_v3 = vadd.f32 %v13331_v16, %v12444_v0  ;;  %v5998_v10 = vadd.f32 %v12230_v22, %v12450_v12  ;;  %v13333_v22 = vld [vmem:[#allocation7_spill] sm:$0xff]  ;;  %v13334_v16 = vld [vmem:[#allocation25_spill] sm:$0xff] }
 0x304   : > { %v10227_v33 = vpop.f32.mrf.mxu1 }
 0x305   : > { %v12658_v21 = vadd.f32 %v10227_v33, %v5996_v27  ;;  %v12675_v27 = vpop.f32.mrf.mxu0 }
 0x306   : > { %v6605_v61 = vpop.f32.mrf.mxu1  ;;  %13332 = vst [vmem:[#allocation18_spill] sm:$0xff] %v12675_v27 }
 0x307   : > { %v6720_v41 = vadd.f32 %v6605_v61, %v5994_v44 }
 0x308   : > { %v10228_v4 = vpop.f32.mrf.mxu1 }
 0x309   : > { %v12664_v1 = vadd.f32 %v10228_v4, %v5997_v49  ;;  %v12667_v57 = vadd.f32 %v12553_v23, %v6720_v41  ;;  %v6001_v23 = vadd.f32 %v12251_v24, %v12453_v47  ;;  %v12683_v41 = vpop.f32.mrf.mxu0  ;;  %v12695_v4 = vld [vmem:[%s13254_s4] ss:$0 sm:$0xff] }
 0x30a   : > { %v12669_v59 = vpop.f32.mrf.mxu1  ;;  %v4442_v12 = vadd.f32 %v12695_v4, %v13333_v22  ;;  %v6005_v22 = vadd.f32 %v12343_v45, %v12476_v28  ;;  %v6008_v45 = vadd.f32 %v12364_v11, %v12498_v54 }
 0x30b   : > { %v7139_v47 = vpop.f32.mrf.mxu0 }
 0x30c   : > { %v5171_v24 = vadd.f32 %v13334_v16, %v4442_v12  ;;  %v13336_v16 = vld [vmem:[#allocation8_spill] sm:$0xff] }
 0x30d   : > { %v4446_v27 = vadd.f32 %v12695_v4, %v13336_v16 }
 0x311   : > { %v10231_v53 = vpop.f32.mrf.mxu1 }
 0x312   : > { %v12677_v33 = vadd.f32 %v10231_v53, %v6000_v3  ;;  %v6004_v3 = vadd.f32 %v12322_v46, %v12464_v9 }
 0x313   : > { %v6621_v36 = vpop.f32.mrf.mxu1 }
 0x314   : > { %v6724_v44 = vadd.f32 %v6621_v36, %v5998_v10  ;;  %v6002_v36 = vadd.f32 %v12335_v14, %v12471_v30  ;;  %v5175_v14 = vadd.f32 %v12239_v51, %v4446_v27  ;;  %v6009_v51 = vadd.f32 %v12378_v63, %v12511_v43 }
 0x315   : > { %v10232_v61 = vpop.f32.mrf.mxu1 }
 0x316   : > { %v12685_v15 = vadd.f32 %v10232_v61, %v6001_v23  ;;  %v12688_v0 = vadd.f32 %v12594_v7, %v6724_v44  ;;  %v5644_v7 = vadd.f32 %v12484_v62, %v5171_v24  ;;  %v12707_v23 = vpop.f32.mrf.mxu0 }
 0x317   : > { %v12690_v49 = vpop.f32.mrf.mxu1  ;;  %13335 = vst [vmem:[#allocation20_spill] sm:$0xff] %v12707_v23 }
 0x318   : > { %v6003_v9 = vadd.f32 %v12359_v17, %v5644_v7  ;;  %v12719_v30 = vpop.f32.mrf.mxu0  ;;  %v6006_v17 = vadd.f32 %v12370_v52, %v12502_v50 }
 0x319   : > { %13337 = vst [vmem:[#allocation23_spill] sm:$0xff] %v12719_v30 }
 0x31a   : > { %v12730_v7 = vpop.f32.mrf.mxu0 }
 0x31b   : > { %v10235_v53 = vpop.f32.mrf.mxu1 }
 0x31c   : > { %v12703_v10 = vadd.f32 %v10235_v53, %v6004_v3  ;;  %v5648_v53 = vadd.f32 %v12520_v29, %v5175_v14  ;;  %v7155_v16 = vpop.f32.mrf.mxu0 }
 0x31d   : > { %v6637_v44 = vpop.f32.mrf.mxu1 }
 0x31e   : > { %v6728_v61 = vadd.f32 %v6637_v44, %v6002_v36  ;;  %v6007_v11 = vadd.f32 %v12390_v42, %v5648_v53  ;;  %v12746_v43 = vpop.f32.mrf.mxu0  ;;  %v13342_v53 = vld [vmem:[#allocation45_spill] sm:$0xff] }
 0x31f   : > { %v10236_v12 = vpop.f32.mrf.mxu1  ;;  %13340 = vst [vmem:[#allocation26_spill] sm:$0xff] %v12746_v43 }
 0x320   : > { %v12713_v46 = vadd.f32 %v10236_v12, %v6005_v22  ;;  %v12716_v62 = vadd.f32 %v7107_v38, %v6728_v61  ;;  %v13338_v22 = vld [vmem:[#allocation9_spill] sm:$0xff] }
 0x321   : > { %v6640_v24 = vpop.f32.mrf.mxu1  ;;  %v4450_v12 = vadd.f32 %v12695_v4, %v13338_v22  ;;  %v13348_v22 = vld [vmem:[#allocation10_spill] sm:$0xff] }
 0x322   : > { %v12721_v3 = vadd.f32 %v6640_v24, %v6003_v9  ;;  %v6012_v9 = vadd.f32 %v12392_v5, %v12532_v31  ;;  %v12757_v5 = vpop.f32.mrf.mxu0 }
 0x323   : > { %v10239_v28 = vpop.f32.mrf.mxu1  ;;  %v5179_v50 = vadd.f32 %v12337_v40, %v4450_v12  ;;  %v13344_v40 = vld [vmem:[#allocation11_spill] sm:$0xff]  ;;  %13345 = vst [vmem:[#allocation28_spill] sm:$0xff] %v12757_v5 }
 0x324   : > { %v12726_v36 = vadd.f32 %v10239_v28, %v6008_v45  ;;  %v13358_v5 = vld [vmem:[#allocation15_spill] sm:$0xff] }
 0x325   : > { %v6653_v38 = vpop.f32.mrf.mxu1  ;;  %v5652_v24 = vadd.f32 %v12557_v48, %v5179_v50  ;;  %v13350_v50 = vld [vmem:[#allocation47_spill] sm:$0xff] }
 0x326   : > { %v6732_v44 = vadd.f32 %v6653_v38, %v6006_v17  ;;  %v13343_v17 = vld [vmem:[#allocation3_spill] sm:$0xff]  ;;  %v7204_v43 = vadd.f32 %v12656_v13, %v12726_v36 }
 0x327   : > { %v10240_v27 = vpop.f32.mrf.mxu1  ;;  %v6013_v38 = vadd.f32 %v13343_v17, %v13342_v53  ;;  %v13352_v17 = vld [vmem:[#allocation48_spill] sm:$0xff] }
 0x328   : > { %v12734_v61 = vadd.f32 %v10240_v27, %v6009_v51  ;;  %v12737_v54 = vadd.f32 %v7123_v32, %v6732_v44  ;;  %v13341_v32 = vld [vmem:[#allocation13_spill] sm:$0xff]  ;;  %v4454_v51 = vadd.f32 %v12695_v4, %v13344_v40  ;;  %v13347_v27 = vld [vmem:[#allocation30_spill] sm:$0xff] }
 0x329   : > { %v6656_v29 = vpop.f32.mrf.mxu1  ;;  %v6010_v14 = vadd.f32 %v13341_v32, %v12541_v18  ;;  %v6011_v48 = vadd.f32 %v13347_v27, %v5652_v24  ;;  %v13355_v40 = vld [vmem:[#allocation34_spill] sm:$0xff] }
 0x32a   : > { %v12741_v52 = vadd.f32 %v6656_v29, %v6007_v11  ;;  %v5183_v18 = vadd.f32 %v13348_v22, %v4454_v51  ;;  %v13357_v22 = vld [vmem:[#allocation35_spill] sm:$0xff] }
 0x32c   : > { %13339 = vst [vmem:[#allocation24_spill] sm:$0xff] %v12741_v52  ;;  %v13392_v52 = vld [vmem:[#allocation42_spill] sm:$0xff] }
 0x32d   : > { %v10243_v63 = vpop.f32.mrf.mxu1  ;;  %v7189_v55 = vadd.f32 %v13392_v52, %v12645_v37  ;;  %v13396_v37 = vld [vmem:[#allocation22_spill] sm:$0xff] }
 0x32e   : > { %v12749_v42 = vadd.f32 %v10243_v63, %v6012_v9  ;;  %v13351_v9 = vld [vmem:[#allocation31_spill] sm:$0xff] }
 0x32f   : > { %v6669_v45 = vpop.f32.mrf.mxu1  ;;  %v6016_v63 = vadd.f32 %v13351_v9, %v13350_v50 }
 0x330   : > { %v6736_v28 = vadd.f32 %v6669_v45, %v6010_v14  ;;  %v12769_v14 = vpop.f32.mrf.mxu0  ;;  %v5656_v45 = vadd.f32 %v12590_v25, %v5183_v18  ;;  %v4458_v25 = vadd.f32 %v12695_v4, %v13358_v5 }
 0x331   : > { %v10244_v44 = vpop.f32.mrf.mxu1 }
 0x332   : > { %v12759_v31 = vadd.f32 %v10244_v44, %v6013_v38  ;;  %v12762_v11 = vadd.f32 %v7139_v47, %v6736_v28  ;;  %v13353_v38 = vld [vmem:[#allocation33_spill] sm:$0xff]  ;;  %v13354_v44 = vld [vmem:[#allocation50_spill] sm:$0xff]  ;;  %v6015_v50 = vadd.f32 %v13357_v22, %v5656_v45 }
 0x333   : > { %v6672_v29 = vpop.f32.mrf.mxu1  ;;  %v6014_v24 = vadd.f32 %v13353_v38, %v13352_v17  ;;  %v6017_v51 = vadd.f32 %v13355_v40, %v13354_v44  ;;  %v13361_v38 = vld [vmem:[#allocation37_spill] sm:$0xff] }
 0x334   : > { %13346 = vst [vmem:[#allocation7_spill] sm:$0xff] %v12759_v31  ;;  %v12765_v12 = vadd.f32 %v6672_v29, %v6011_v48  ;;  %v7171_v48 = vpop.f32.mrf.mxu0 }
 0x336   : > { %13349 = vst [vmem:[#allocation25_spill] sm:$0xff] %v12765_v12  ;;  %v10247_v32 = vpop.f32.mrf.mxu1  ;;  %v7208_v12 = vadd.f32 %v12683_v41, %v12749_v42  ;;  %v13380_v42 = vld [vmem:[#allocation4_spill] sm:$0xff] }
 0x337   : > { %v12772_v53 = vadd.f32 %v10247_v32, %v6016_v63  ;;  %v13360_v32 = vld [vmem:[#allocation12_spill] sm:$0xff] }
 0x338   : > { %v6685_v47 = vpop.f32.mrf.mxu1  ;;  %v5187_v17 = vadd.f32 %v13360_v32, %v4458_v25 }
 0x339   : > { %v6740_v28 = vadd.f32 %v6685_v47, %v6014_v24  ;;  %v6020_v24 = vadd.f32 %v13361_v38, %v12603_v56  ;;  %v12790_v47 = vpop.f32.mrf.mxu0  ;;  %v13367_v56 = vld [vmem:[#allocation40_spill] sm:$0xff] }
 0x33a   : > { %v10248_v27 = vpop.f32.mrf.mxu1  ;;  %13362 = vst [vmem:[#allocation13_spill] sm:$0xff] %v12790_v47  ;;  %v5660_v40 = vadd.f32 %v12629_v35, %v5187_v17  ;;  %v7200_v47 = vadd.f32 %v12625_v8, %v12703_v10 }
 0x33b   : > { %v12778_v29 = vadd.f32 %v10248_v27, %v6017_v51  ;;  %v12781_v9 = vadd.f32 %v7155_v16, %v6740_v28  ;;  %v13363_v16 = vld [vmem:[#allocation38_spill] sm:$0xff]  ;;  %v13364_v27 = vld [vmem:[#allocation39_spill] sm:$0xff] }
 0x33c   : > { %v6688_v18 = vpop.f32.mrf.mxu1  ;;  %v6018_v45 = vadd.f32 %v13363_v16, %v12609_v34  ;;  %v6021_v22 = vadd.f32 %v13364_v27, %v12613_v2  ;;  %v6019_v32 = vadd.f32 %v13367_v56, %v5660_v40 }
 0x33d   : > { %13356 = vst [vmem:[#allocation8_spill] sm:$0xff] %v12778_v29  ;;  %v12785_v63 = vadd.f32 %v6688_v18, %v6015_v50  ;;  %v12799_v50 = vpop.f32.mrf.mxu0 }
 0x33e   : > { %v10251_v44 = vpop.f32.mrf.mxu1  ;;  %13365 = vst [vmem:[#allocation45_spill] sm:$0xff] %v12799_v50 }
 0x33f   : > { %13359 = vst [vmem:[#allocation9_spill] sm:$0xff] %v12785_v63  ;;  %v12793_v51 = vadd.f32 %v10251_v44, %v6020_v24  ;;  %v13369_v24 = vld [vmem:[#allocation41_spill] sm:$0xff]  ;;  %v12810_v44 = vpop.f32.mrf.mxu0 }
 0x340   : > { %v6701_v28 = vpop.f32.mrf.mxu1  ;;  %v7188_v34 = vadd.f32 %v13369_v24, %v12633_v26 }
 0x341   : > { %v6744_v5 = vadd.f32 %v6701_v28, %v6018_v45  ;;  %v12817_v27 = vpop.f32.mrf.mxu0 }
 0x342   : > { %v10252_v25 = vpop.f32.mrf.mxu1 }
 0x343   : > { %v12801_v18 = vadd.f32 %v10252_v25, %v6021_v22  ;;  %v12804_v38 = vadd.f32 %v7171_v48, %v6744_v5  ;;  %v13370_v5 = vld [vmem:[#allocation44_spill] sm:$0xff]  ;;  %v12825_v25 = vpop.f32.mrf.mxu0 }
 0x344   : > { %v6704_v35 = vpop.f32.mrf.mxu1  ;;  %v7192_v22 = vadd.f32 %v13370_v5, %v12658_v21 }
 0x345   : > { %13366 = vst [vmem:[#allocation3_spill] sm:$0xff] %v12801_v18  ;;  %v12806_v17 = vadd.f32 %v6704_v35, %v6019_v32 }
 0x346   : > { %v10291_v16 = vpop.f32.mrf.mxu1 }
 0x347   : > { %13368 = vst [vmem:[#allocation11_spill] sm:$0xff] %v12806_v17  ;;  %v12812_v45 = vadd.f32 %v10291_v16, %v7188_v34  ;;  %v13371_v16 = vld [vmem:[#allocation51_spill] sm:$0xff] }
 0x348   : > { %v7418_v2 = vpop.f32.mrf.mxu1 }
 0x349   : > { %v12815_v28 = vadd.f32 %v7418_v2, %v12648_v60  ;;  %v12832_v60 = vpop.f32.mrf.mxu0  ;;  %v7196_v2 = vadd.f32 %v13371_v16, %v12677_v33 }
 0x34a   : > { %v12819_v40 = vpop.f32.mrf.mxu1 }
 0x34b   : > { %v12840_v50 = vpop.f32.mrf.mxu0 }
 0x34c   : > { %v12821_v48 = vpop.f32.mrf.mxu1 }
 0x34e   : > { %v10295_v26 = vpop.f32.mrf.mxu1 }
 0x34f   : > { %v12827_v56 = vadd.f32 %v10295_v26, %v7192_v22 }
 0x350   : > { %v7434_v32 = vpop.f32.mrf.mxu1 }
 0x351   : > { %v12830_v35 = vadd.f32 %v7434_v32, %v12667_v57  ;;  %v12847_v57 = vpop.f32.mrf.mxu0 }
 0x352   : > { %v12834_v24 = vpop.f32.mrf.mxu1 }
 0x353   : > { %v12855_v18 = vpop.f32.mrf.mxu0 }
 0x354   : > { %v12836_v34 = vpop.f32.mrf.mxu1 }
 0x356   : > { %v10299_v21 = vpop.f32.mrf.mxu1 }
 0x357   : > { %v12842_v5 = vadd.f32 %v10299_v21, %v7196_v2 }
 0x358   : > { %v7450_v22 = vpop.f32.mrf.mxu1 }
 0x359   : > { %v12845_v26 = vadd.f32 %v7450_v22, %v12688_v0  ;;  %v12862_v0 = vpop.f32.mrf.mxu0 }
 0x35a   : > { %v12849_v32 = vpop.f32.mrf.mxu1 }
 0x35b   : > { %v12870_v29 = vpop.f32.mrf.mxu0 }
 0x35c   : > { %v12851_v17 = vpop.f32.mrf.mxu1 }
 0x35e   : > { %v10303_v33 = vpop.f32.mrf.mxu1 }
 0x35f   : > { %v12857_v16 = vadd.f32 %v10303_v33, %v7200_v47 }
 0x360   : > { %v7466_v2 = vpop.f32.mrf.mxu1 }
 0x361   : > { %v12860_v21 = vadd.f32 %v7466_v2, %v12716_v62  ;;  %v12877_v62 = vpop.f32.mrf.mxu0 }
 0x362   : > { %v12864_v22 = vpop.f32.mrf.mxu1 }
 0x363   : > { %v12885_v23 = vpop.f32.mrf.mxu0 }
 0x364   : > { %v12866_v63 = vpop.f32.mrf.mxu1 }
 0x366   : > { %v10307_v8 = vpop.f32.mrf.mxu1 }
 0x367   : > { %v12872_v10 = vadd.f32 %v10307_v8, %v7204_v43 }
 0x368   : > { %v7482_v47 = vpop.f32.mrf.mxu1 }
 0x369   : > { %13372 = vst [vmem:[#allocation30_spill] sm:$0xff] %v12872_v10  ;;  %v12875_v33 = vadd.f32 %v7482_v47, %v12737_v54  ;;  %v12892_v54 = vpop.f32.mrf.mxu0  ;;  %v13385_v10 = vld [vmem:[#allocation14_spill] sm:$0xff] }
 0x36a   : > { %v12879_v2 = vpop.f32.mrf.mxu1 }
 0x36b   : > { %13373 = vst [vmem:[#allocation10_spill] sm:$0xff] %v12875_v33  ;;  %13374 = vst [vmem:[#allocation47_spill] sm:$0xff] %v12879_v2  ;;  %v7212_v33 = vadd.f32 %v12730_v7, %v12772_v53  ;;  %v7216_v2 = vadd.f32 %v12769_v14, %v12793_v51 }
 0x36c   : > { %v12881_v30 = vpop.f32.mrf.mxu1 }
 0x36d   : > { %13375 = vst [vmem:[#allocation31_spill] sm:$0xff] %v12881_v30  ;;  %v12900_v30 = vpop.f32.mrf.mxu0 }
 0x36e   : > { %v10311_v13 = vpop.f32.mrf.mxu1 }
 0x36f   : > { %v12887_v36 = vadd.f32 %v10311_v13, %v7208_v12  ;;  %v4430_v12 = vadd.f32 %v12695_v4, %v13380_v42  ;;  %v13387_v42 = vld [vmem:[#allocation5_spill] sm:$0xff] }
 0x370   : > { %v7498_v43 = vpop.f32.mrf.mxu1 }
 0x371   : > { %13376 = vst [vmem:[#allocation48_spill] sm:$0xff] %v12887_v36  ;;  %v12890_v8 = vadd.f32 %v7498_v43, %v12762_v11  ;;  %v13382_v11 = vld [vmem:[#allocation16_spill] sm:$0xff] }
 0x372   : > { %v12894_v47 = vpop.f32.mrf.mxu1  ;;  %v5159_v43 = vadd.f32 %v13382_v11, %v4430_v12  ;;  %v13388_v11 = vld [vmem:[#allocation21_spill] sm:$0xff] }
 0x373   : > { %13377 = vst [vmem:[#allocation33_spill] sm:$0xff] %v12890_v8  ;;  %13378 = vst [vmem:[#allocation50_spill] sm:$0xff] %v12894_v47  ;;  %v12910_v47 = vpop.f32.mrf.mxu0 }
 0x374   : > { %v12896_v31 = vpop.f32.mrf.mxu1  ;;  %v5632_v7 = vadd.f32 %v13385_v10, %v5159_v43 }
 0x375   : > { %13379 = vst [vmem:[#allocation34_spill] sm:$0xff] %v12896_v31 }
 0x376   : > { %v10315_v41 = vpop.f32.mrf.mxu1 }
 0x377   : > { %v12904_v13 = vadd.f32 %v10315_v41, %v7212_v33  ;;  %v4434_v33 = vadd.f32 %v12695_v4, %v13387_v42  ;;  %v12921_v41 = vpop.f32.mrf.mxu0 }
 0x378   : > { %v7514_v36 = vpop.f32.mrf.mxu1 }
 0x379   : > { %13381 = vst [vmem:[#allocation35_spill] sm:$0xff] %v12904_v13  ;;  %v12908_v8 = vadd.f32 %v7514_v36, %v12781_v9  ;;  %v5991_v9 = vadd.f32 %v13388_v11, %v5632_v7  ;;  %v12932_v51 = vpop.f32.mrf.mxu0 }
 0x37a   : > { %v12912_v31 = vpop.f32.mrf.mxu1 }
 0x37b   : > { %13383 = vst [vmem:[#allocation15_spill] sm:$0xff] %v12908_v8  ;;  %13384 = vst [vmem:[#allocation12_spill] sm:$0xff] %v12912_v31  ;;  %v13389_v8 = vld [vmem:[#allocation19_spill] sm:$0xff]  ;;  %v6717_v10 = vadd.f32 %v12650_v20, %v5991_v9  ;;  %v8273_v9 = vadd.f32 %v12810_v44, %v12812_v45 }
 0x37c   : > { %v12915_v53 = vpop.f32.mrf.mxu1  ;;  %v5163_v13 = vadd.f32 %v13389_v8, %v4434_v33  ;;  %v13393_v8 = vld [vmem:[#allocation43_spill] sm:$0xff] }
 0x37d   : > { %13386 = vst [vmem:[#allocation37_spill] sm:$0xff] %v12915_v53  ;;  %v13391_v53 = vld [vmem:[#allocation32_spill] sm:$0xff]  ;;  %v7187_v33 = vadd.f32 %v13393_v8, %v6717_v10  ;;  %v8271_v10 = vadd.f32 %v12817_v27, %v12815_v28 }
 0x37e   : > { %v10319_v12 = vpop.f32.mrf.mxu1  ;;  %v5636_v14 = vadd.f32 %v13391_v53, %v5163_v13  ;;  %v13397_v8 = vld [vmem:[#allocation36_spill] sm:$0xff] }
 0x37f   : > { %v12924_v36 = vadd.f32 %v10319_v12, %v7216_v2  ;;  %v7548_v2 = vadd.f32 %v12819_v40, %v7189_v55  ;;  %v13394_v12 = vld [vmem:[#allocation6_spill] sm:$0xff]  ;;  %v7546_v11 = vadd.f32 %v12821_v48, %v7187_v33 }
 0x380   : > { %v7530_v31 = vpop.f32.mrf.mxu1  ;;  %v4438_v20 = vadd.f32 %v12695_v4, %v13394_v12  ;;  %v13398_v48 = vld [vmem:[#allocation46_spill] sm:$0xff] }
 0x381   : > { %v12929_v43 = vadd.f32 %v7530_v31, %v12804_v38  ;;  %v12944_v31 = vpop.f32.mrf.mxu0  ;;  %v13395_v38 = vld [vmem:[#allocation27_spill] sm:$0xff]  ;;  %v8274_v4 = vadd.f32 %v12825_v25, %v7548_v2  ;;  %v7193_v33 = vadd.f32 %v13398_v48, %v12664_v1 }
 0x382   : > { %v12934_v42 = vpop.f32.mrf.mxu1  ;;  %v5995_v13 = vadd.f32 %v13395_v38, %v5636_v14  ;;  %v5167_v52 = vadd.f32 %v13396_v37, %v4438_v20  ;;  %v8272_v20 = vadd.f32 %v12832_v60, %v7546_v11  ;;  %v13400_v37 = vld [vmem:[#allocation29_spill] sm:$0xff] }
 0x383   : > { %13390 = vst [vmem:[#allocation38_spill] sm:$0xff] %v12929_v43  ;;  %v12956_v14 = vpop.f32.mrf.mxu0 }
 0x384   : > { %v12938_v7 = vpop.f32.mrf.mxu1  ;;  %v6721_v43 = vadd.f32 %v12669_v59, %v5995_v13  ;;  %v5640_v12 = vadd.f32 %v13397_v8, %v5167_v52  ;;  %v13399_v59 = vld [vmem:[#allocation49_spill] sm:$0xff]  ;;  %v8277_v8 = vadd.f32 %v12840_v50, %v12827_v56  ;;  %v7197_v50 = vadd.f32 %v12605_v19, %v12685_v15 }
 0x385   : > { %v12963_v2 = vpop.f32.mrf.mxu0  ;;  %v8281_v19 = vadd.f32 %v12870_v29, %v12842_v5  ;;  %v7201_v29 = vadd.f32 %v12637_v6, %v12713_v46  ;;  %v8285_v6 = vadd.f32 %v12900_v30, %v12857_v16 }
 0x386   : > { %v10359_v53 = vpop.f32.mrf.mxu1  ;;  %v7191_v13 = vadd.f32 %v13399_v59, %v6721_v43  ;;  %v5999_v52 = vadd.f32 %v13400_v37, %v5640_v12 }
 0x387   : > { %v8743_v40 = vadd.f32 %v10359_v53, %v8273_v9  ;;  %v7552_v9 = vadd.f32 %v12834_v24, %v7193_v33  ;;  %v12973_v12 = vpop.f32.mrf.mxu0 }
 0x388   : > { %v8614_v55 = vpop.f32.mrf.mxu1  ;;  %v6725_v43 = vadd.f32 %v12690_v49, %v5999_v52 }
 0x389   : > { %v8741_v44 = vadd.f32 %v8614_v55, %v8271_v10  ;;  %v8775_v28 = vmax.f32 %v8743_v40, 0.0  ;;  %v7550_v55 = vadd.f32 %v12836_v34, %v7191_v13  ;;  %v8278_v48 = vadd.f32 %v12855_v18, %v7552_v9  ;;  %v12982_v59 = vpop.f32.mrf.mxu0 }
 0x38a   : > { %v10360_v38 = vpop.f32.mrf.mxu1 }
 0x38b   : > { %v8744_v45 = vadd.f32 %v10360_v38, %v8274_v4  ;;  %v8773_v10 = vmax.f32 %v8741_v44, 0.0  ;;  %v8275_v38 = vadd.f32 %v12847_v57, %v12830_v35  ;;  %v8276_v49 = vadd.f32 %v12862_v0, %v7550_v55  ;;  %v12990_v37 = vpop.f32.mrf.mxu0 }
 0x38c   : > { %v8617_v53 = vpop.f32.mrf.mxu1  ;;  %v7195_v44 = vadd.f32 %v12617_v39, %v6725_v43  ;;  %v7556_v35 = vadd.f32 %v12849_v32, %v7197_v50  ;;  %v8279_v32 = vadd.f32 %v12877_v62, %v12845_v26 }
 0x38d   : > { %v8776_v27 = vmax.f32 %v8744_v45, 0.0  ;;  %v8742_v25 = vadd.f32 %v8617_v53, %v8272_v20 }
 0x38e   : > { %v10363_v1 = vpop.f32.mrf.mxu1  ;;  %v7554_v13 = vadd.f32 %v12851_v17, %v7195_v44 }
 0x38f   : > { %v8919_v60 = vpack.c.bf16 %v8776_v27, %v8775_v28  ;;  %v8774_v11 = vmax.f32 %v8742_v25, 0.0  ;;  %v8747_v40 = vadd.f32 %v10363_v1, %v8277_v8  ;;  %v8282_v25 = vadd.f32 %v12885_v23, %v7556_v35 }
 0x390   : > { %v8630_v4 = vpop.f32.mrf.mxu1  ;;  %v8280_v17 = vadd.f32 %v12892_v54, %v7554_v13  ;;  %v7199_v1 = vadd.f32 %v12652_v58, %v12721_v3  ;;  %v7560_v23 = vadd.f32 %v12864_v22, %v7201_v29  ;;  %v8283_v22 = vadd.f32 %v12910_v47, %v12860_v21  ;;  %v13404_v21 = vld [vmem:[#allocation47_spill] sm:$0xff] }
 0x391   : > { %v8918_v24 = vpack.c.bf16 %v8774_v11, %v8773_v10  ;;  %v8745_v56 = vadd.f32 %v8630_v4, %v8275_v38  ;;  %v8779_v18 = vmax.f32 %v8747_v40, 0.0  ;;  %v13408_v29 = vld [vmem:[#allocation7_spill] sm:$0xff] }
 0x392   : > { %v10364_v33 = vpop.f32.mrf.mxu1  ;;  %v7558_v11 = vadd.f32 %v12866_v63, %v7199_v1  ;;  %v8286_v40 = vadd.f32 %v12921_v41, %v7560_v23  ;;  %v13411_v23 = vld [vmem:[#allocation23_spill] sm:$0xff] }
 0x393   : > { %v8748_v34 = vadd.f32 %v10364_v33, %v8278_v48  ;;  %10391 = vmatprep.mubr.msk.bf16.mxu0 %vm4215_vm5, %v8918_v24  ;;  %v8777_v53 = vmax.f32 %v8745_v56, 0.0  ;;  %v13401_v33 = vld [vmem:[#allocation17_spill] sm:$0xff]  ;;  %v13402_v56 = vld [vmem:[#allocation24_spill] sm:$0xff] }
 0x394   : > { %v8633_v45 = vpop.f32.mrf.mxu1  ;;  %10392 = vmatmul.mubr.msk.bf16.vlgmr.msra.gmra.mxu0 %vm4215_vm5, %v8919_v60  ;;  %v13000_v60 = vpop.f32.mrf.mxu0  ;;  %v7205_v50 = vadd.f32 %v13401_v33, %v12734_v61  ;;  %v8284_v63 = vadd.f32 %v12932_v51, %v7558_v11 }
 0x395   : > { %v8780_v57 = vmax.f32 %v8748_v34, 0.0  ;;  %v8746_v20 = vadd.f32 %v8633_v45, %v8276_v49  ;;  %v13403_v34 = vld [vmem:[#allocation18_spill] sm:$0xff] }
 0x396   : > { %v10367_v15 = vpop.f32.mrf.mxu1  ;;  %v8227_v38 = vpop.f32.mrf.mxu0  ;;  %v7203_v49 = vadd.f32 %v13403_v34, %v13402_v56  ;;  %v7564_v47 = vadd.f32 %v13404_v21, %v7205_v50  ;;  %v13415_v50 = vld [vmem:[#allocation33_spill] sm:$0xff]  ;;  %v13416_v34 = vld [vmem:[#allocation8_spill] sm:$0xff] }
 0x397   : > { %v8921_v0 = vpack.c.bf16 %v8780_v57, %v8779_v18  ;;  %v8778_v9 = vmax.f32 %v8746_v20, 0.0  ;;  %v8751_v27 = vadd.f32 %v10367_v15, %v8281_v19  ;;  %v13405_v57 = vld [vmem:[#allocation30_spill] sm:$0xff]  ;;  %v13406_v19 = vld [vmem:[#allocation31_spill] sm:$0xff] }
 0x398   : > { %v8646_v39 = vpop.f32.mrf.mxu1  ;;  %v10349_v18 = vpop.f32.mrf.mxu0  ;;  %v8289_v61 = vadd.f32 %v12944_v31, %v13405_v57  ;;  %v7562_v15 = vadd.f32 %v13406_v19, %v7203_v49  ;;  %v13417_v49 = vld [vmem:[#allocation26_spill] sm:$0xff] }
 0x399   : > { %v8920_v28 = vpack.c.bf16 %v8778_v9, %v8777_v53  ;;  %v8749_v5 = vadd.f32 %v8646_v39, %v8279_v32  ;;  %v8783_v26 = vmax.f32 %v8751_v27, 0.0  ;;  %v8290_v32 = vadd.f32 %v12963_v2, %v7564_v47 }
 0x39a   : > { %v10368_v52 = vpop.f32.mrf.mxu1  ;;  %v8288_v1 = vadd.f32 %v12973_v12, %v7562_v15 }
 0x39b   : > { %v8752_v8 = vadd.f32 %v10368_v52, %v8282_v25  ;;  %10395 = vmatprep.mubr.msk.bf16.mxu0 %vm4215_vm5, %v8920_v28  ;;  %v8781_v54 = vmax.f32 %v8749_v5, 0.0  ;;  %v13407_v28 = vld [vmem:[#allocation10_spill] sm:$0xff]  ;;  %v8240_v25 = vpop.f32.mrf.mxu0  ;;  %v13409_v5 = vld [vmem:[#allocation20_spill] sm:$0xff] }
 0x39c   : > { %v8649_v55 = vpop.f32.mrf.mxu1  ;;  %10396 = vmatmul.mubr.msk.bf16.gmra.mxu0 %vm4215_vm5, %v8921_v0  ;;  %v8287_v27 = vadd.f32 %v12956_v14, %v13407_v28  ;;  %v13412_v14 = vld [vmem:[#allocation50_spill] sm:$0xff] }
 0x39d   : > { %v8784_v62 = vmax.f32 %v8752_v8, 0.0  ;;  %v8750_v10 = vadd.f32 %v8649_v55, %v8280_v17  ;;  %v7209_v8 = vadd.f32 %v13409_v5, %v13408_v29  ;;  %v13410_v55 = vld [vmem:[#allocation25_spill] sm:$0xff]  ;;  %v10350_v11 = vpop.f32.mrf.mxu0  ;;  %v13423_v5 = vld [vmem:[#allocation15_spill] sm:$0xff] }
 0x39e   : > { %v10371_v46 = vpop.f32.mrf.mxu1 }
 0x39f   : > { %v8923_v43 = vpack.c.bf16 %v8784_v62, %v8783_v26  ;;  %v8782_v4 = vmax.f32 %v8750_v10, 0.0  ;;  %v8755_v24 = vadd.f32 %v10371_v46, %v8285_v6  ;;  %v7207_v26 = vadd.f32 %v13411_v23, %v13410_v55  ;;  %v13425_v55 = vld [vmem:[#allocation13_spill] sm:$0xff] }
 0x3a0   : > { %v8662_v58 = vpop.f32.mrf.mxu1  ;;  %v7568_v10 = vadd.f32 %v13412_v14, %v7209_v8  ;;  %v8295_v8 = vadd.f32 %v8240_v25, %v13423_v5  ;;  %v13426_v14 = vld [vmem:[#allocation11_spill] sm:$0xff] }
 0x3a1   : > { %v8922_v3 = vpack.c.bf16 %v8782_v4, %v8781_v54  ;;  %v8753_v30 = vadd.f32 %v8662_v58, %v8283_v22  ;;  %v8787_v41 = vmax.f32 %v8755_v24, 0.0  ;;  %v13413_v54 = vld [vmem:[#allocation48_spill] sm:$0xff]  ;;  %v13414_v58 = vld [vmem:[#allocation34_spill] sm:$0xff] }
 0x3a2   : > { %v10372_v48 = vpop.f32.mrf.mxu1 }
 0x3a3   : > { %v8756_v16 = vadd.f32 %v10372_v48, %v8286_v40  ;;  %10399 = vmatprep.mubr.msk.bf16.mxu0 %vm4215_vm5, %v8922_v3  ;;  %v8785_v13 = vmax.f32 %v8753_v30, 0.0  ;;  %v7566_v3 = vadd.f32 %v13414_v58, %v7207_v26  ;;  %v8291_v30 = vadd.f32 %v12990_v37, %v13415_v50  ;;  %v13420_v37 = vld [vmem:[#allocation12_spill] sm:$0xff] }
 0x3a4   : > { %v8665_v44 = vpop.f32.mrf.mxu1  ;;  %10400 = vmatmul.mubr.msk.bf16.gmra.mxu0 %vm4215_vm5, %v8923_v43  ;;  %v8293_v43 = vadd.f32 %v12982_v59, %v13413_v54 }
 0x3a5   : > { %v8788_v45 = vmax.f32 %v8756_v16, 0.0  ;;  %v8754_v35 = vadd.f32 %v8665_v44, %v8284_v63  ;;  %v8294_v16 = vadd.f32 %v13000_v60, %v7568_v10  ;;  %v8243_v63 = vpop.f32.mrf.mxu0  ;;  %v7213_v44 = vadd.f32 %v13417_v49, %v13416_v34  ;;  %v13427_v10 = vld [vmem:[#allocation45_spill] sm:$0xff] }
 0x3a6   : > { %v10375_v20 = vpop.f32.mrf.mxu1  ;;  %v8292_v47 = vadd.f32 %v8227_v38, %v7566_v3 }
 0x3a7   : > { %v8925_v51 = vpack.c.bf16 %v8788_v45, %v8787_v41  ;;  %v8786_v53 = vmax.f32 %v8754_v35, 0.0  ;;  %v8759_v39 = vadd.f32 %v10375_v20, %v8289_v61  ;;  %v13418_v41 = vld [vmem:[#allocation9_spill] sm:$0xff]  ;;  %v13419_v45 = vld [vmem:[#allocation28_spill] sm:$0xff]  ;;  %v10353_v57 = vpop.f32.mrf.mxu0  ;;  %v7572_v20 = vadd.f32 %v13420_v37, %v7213_v44 }
 0x3a8   : > { %v8678_v0 = vpop.f32.mrf.mxu1  ;;  %v7211_v35 = vadd.f32 %v13419_v45, %v13418_v41 }
 0x3a9   : > { %v8924_v9 = vpack.c.bf16 %v8786_v53, %v8785_v13  ;;  %v8757_v31 = vadd.f32 %v8678_v0, %v8287_v27  ;;  %v8791_v2 = vmax.f32 %v8759_v39, 0.0  ;;  %v13421_v13 = vld [vmem:[#allocation35_spill] sm:$0xff]  ;;  %v13422_v0 = vld [vmem:[#allocation37_spill] sm:$0xff]  ;;  %v8256_v27 = vpop.f32.mrf.mxu0 }
 0x3aa   : > { %v10376_v52 = vpop.f32.mrf.mxu1 }
 0x3ab   : > { %v8760_v17 = vadd.f32 %v10376_v52, %v8290_v32  ;;  %10403 = vmatprep.mubr.msk.bf16.mxu0 %vm4215_vm5, %v8924_v9  ;;  %v8789_v24 = vmax.f32 %v8757_v31, 0.0  ;;  %v7570_v9 = vadd.f32 %v13422_v0, %v7211_v35  ;;  %v8298_v31 = vadd.f32 %v10350_v11, %v7572_v20  ;;  %v10613_v35 = vld [vmem:[%s10757_s8 + $0x30] sm:$0xff]  ;;  %v13065_v20 = vld [vmem:[%s13256_s6] ss:$0 sm:$0xff] }
 0x3ac   : > { %v8681_v62 = vpop.f32.mrf.mxu1  ;;  %10404 = vmatmul.mubr.msk.bf16.gmra.mxu0 %vm4215_vm5, %v8925_v51  ;;  %v8297_v51 = vadd.f32 %v10349_v18, %v13421_v13  ;;  %v10617_v0 = vld [vmem:[%s10757_s8 + $0x40] sm:$0x3] }
 0x3ad   : > { %v8792_v6 = vmax.f32 %v8760_v17, 0.0  ;;  %v8758_v46 = vadd.f32 %v8681_v62, %v8288_v1  ;;  %v13424_v1 = vld [vmem:[#allocation3_spill] sm:$0xff]  ;;  %v8296_v18 = vadd.f32 %v8243_v63, %v7570_v9  ;;  %v8814_v9 = vrot.slane %v10617_v0, 1 }
 0x3ae   : > { %v10379_v4 = vpop.f32.mrf.mxu1  ;;  %v7217_v23 = vadd.f32 %v13425_v55, %v13424_v1  ;;  %v10620_v1 = vld [vmem:[%s10757_s8 + $0x68] sm:$0xff] }
 0x3af   : > { %v8927_v12 = vpack.c.bf16 %v8792_v6, %v8791_v2  ;;  %v8790_v22 = vmax.f32 %v8758_v46, 0.0  ;;  %v8763_v33 = vadd.f32 %v10379_v4, %v8293_v43  ;;  %v7215_v2 = vadd.f32 %v13427_v10, %v13426_v14  ;;  %v10354_v6 = vpop.f32.mrf.mxu0  ;;  %v10621_v10 = vld [vmem:[%s10757_s8 + $0x48] sm:$0xff] }
 0x3b0   : > { %v8694_v40 = vpop.f32.mrf.mxu1  ;;  %v7576_v54 = vadd.f32 %v12934_v42, %v7217_v23  ;;  %v8301_v4 = vadd.f32 %v10353_v57, %v12924_v36  ;;  %v8811_v57 = vrot.slane %v10613_v35, 1  ;;  %v8822_v55 = vrot.slane %v10620_v1, 1 }
 0x3b1   : > { %v8926_v48 = vpack.c.bf16 %v8790_v22, %v8789_v24  ;;  %v8761_v59 = vadd.f32 %v8694_v40, %v8291_v30  ;;  %v8795_v60 = vmax.f32 %v8763_v33, 0.0  ;;  %v7574_v3 = vadd.f32 %v12938_v7, %v7215_v2  ;;  %v8259_v40 = vpop.f32.mrf.mxu0  ;;  %v13428_v33 = vld [vmem:[#allocation38_spill] sm:$0xff] }
 0x3b2   : > { %v10380_v56 = vpop.f32.mrf.mxu1  ;;  %v8299_v50 = vadd.f32 %v8256_v27, %v13428_v33  ;;  %v8302_v30 = vadd.f32 %v10354_v6, %v7576_v54  ;;  %v10618_v27 = vld [vmem:[%s10757_s8 + $0x28] sm:$0x3]  ;;  %v8816_v2 = vrot.slane %v10621_v10, 1  ;;  %v10622_v6 = vld [vmem:[%s10757_s8 + $0x50] sm:$0xff]  ;;  %v10624_v33 = vld [vmem:[%s10757_s8 + $0x58] sm:$0x3] }
 0x3b3   : > { %v8764_v21 = vadd.f32 %v10380_v56, %v8294_v16  ;;  %10407 = vmatprep.mubr.msk.bf16.mxu0 %vm4215_vm5, %v8926_v48  ;;  %v8793_v39 = vmax.f32 %v8761_v59, 0.0  ;;  %v8300_v42 = vadd.f32 %v8259_v40, %v7574_v3 }
 0x3b4   : > { %v8697_v61 = vpop.f32.mrf.mxu1  ;;  %10408 = vmatmul.mubr.msk.bf16.gmra.mxu0 %vm4215_vm5, %v8927_v12 }
 0x3b5   : > { %v8796_v19 = vmax.f32 %v8764_v21, 0.0  ;;  %v8762_v15 = vadd.f32 %v8697_v61, %v8292_v47  ;;  %v10614_v61 = vld [vmem:[%s10757_s8 + $0x38] sm:$0xff] }
 0x3b6   : > { %v10383_v53 = vpop.f32.mrf.mxu1  ;;  %v8812_v37 = vrot.slane %v10614_v61, 1 }
 0x3b7   : > { %v8929_v28 = vpack.c.bf16 %v8796_v19, %v8795_v60  ;;  %v8794_v38 = vmax.f32 %v8762_v15, 0.0  ;;  %v8767_v29 = vadd.f32 %v10383_v53, %v8297_v51  ;;  %v10615_v60 = vld [vmem:[%s10757_s8 + $0x18] sm:$0xff]  ;;  %v10616_v15 = vld [vmem:[%s10757_s8 + $0x20] sm:$0xff] }
 0x3b8   : > { %v8710_v32 = vpop.f32.mrf.mxu1  ;;  %v8806_v19 = vrot.slane %v10615_v60, 1  ;;  %v8807_v13 = vrot.slane %v10616_v15, 1  ;;  %v8813_v51 = vsel %vm8805_vm14, %v8811_v57, %v8812_v37  ;;  %v8815_v5 = vsel %vm8805_vm14, %v8812_v37, %v8814_v9  ;;  %v10628_v57 = vld [vmem:[%s10757_s8 + $0x80] sm:$0xff] }
 0x3b9   : > { %v8928_v52 = vpack.c.bf16 %v8794_v38, %v8793_v39  ;;  %v8765_v26 = vadd.f32 %v8710_v32, %v8295_v8  ;;  %v8799_v25 = vmax.f32 %v8767_v29, 0.0  ;;  %v8809_v32 = vrot.slane %v10618_v27, 1  ;;  %v10630_v27 = vld [vmem:[%s10757_s8 + $0x88] sm:$0x3] }
 0x3ba   : > { %v10384_v17 = vpop.f32.mrf.mxu1  ;;  %v8827_v61 = vrot.slane %v10628_v57, 1 }
 0x3bb   : > { %v8768_v62 = vadd.f32 %v10384_v17, %v8298_v31  ;;  %10411 = vmatprep.mubr.msk.bf16.mxu0 %vm4215_vm5, %v8928_v52  ;;  %v8797_v24 = vmax.f32 %v8765_v26, 0.0  ;;  %v10619_v31 = vld [vmem:[%s10757_s8 + $0x60] sm:$0xff] }
 0x3bc   : > { %v8713_v46 = vpop.f32.mrf.mxu1  ;;  %10412 = vmatmul.mubr.msk.bf16.gmra.mxu0 %vm4215_vm5, %v8929_v28  ;;  %v8808_v28 = vsel %vm8805_vm14, %v8806_v19, %v8807_v13  ;;  %v8821_v17 = vrot.slane %v10619_v31, 1 }
 0x3bd   : > { %v8800_v11 = vmax.f32 %v8768_v62, 0.0  ;;  %v8766_v43 = vadd.f32 %v8713_v46, %v8296_v18  ;;  %v8810_v18 = vsel %vm8805_vm14, %v8807_v13, %v8809_v32  ;;  %v8817_v46 = vrot.slane %v10622_v6, 1 }
 0x3be   : > { %v10387_v58 = vpop.f32.mrf.mxu1  ;;  %v8829_v32 = vrot.slane %v10630_v27, 1 }
 0x3bf   : > { %v8931_v12 = vpack.c.bf16 %v8800_v11, %v8799_v25  ;;  %v8798_v22 = vmax.f32 %v8766_v43, 0.0  ;;  %v8771_v63 = vadd.f32 %v10387_v58, %v8301_v4  ;;  %v8823_v43 = vsel %vm8805_vm14, %v8821_v17, %v8822_v55  ;;  %v10623_v58 = vld [vmem:[%s10757_s8 + $0x70] sm:$0x3]  ;;  %v10631_v17 = vld [vmem:[%s10757_s8 + $0xc0] sm:$0xff] }
 0x3c0   : > { %v8726_v48 = vpop.f32.mrf.mxu1  ;;  %v8824_v3 = vrot.slane %v10623_v58, 1  ;;  %v8818_v40 = vsel %vm8805_vm14, %v8816_v2, %v8817_v46  ;;  %v8841_v1 = vrot.slane %v10631_v17, 1  ;;  %v10633_v2 = vld [vmem:[%s10757_s8 + $0xa8] sm:$0xff] }
 0x3c1   : > { %v8930_v16 = vpack.c.bf16 %v8798_v22, %v8797_v24  ;;  %v8769_v34 = vadd.f32 %v8726_v48, %v8299_v50  ;;  %v8803_v7 = vmax.f32 %v8771_v63, 0.0  ;;  %v8819_v50 = vrot.slane %v10624_v33, 1 }
 0x3c2   : > { %v10388_v56 = vpop.f32.mrf.mxu1  ;;  %v8836_v6 = vrot.slane %v10633_v2, 1 }
 0x3c3   : > { %v8772_v49 = vadd.f32 %v10388_v56, %v8302_v30  ;;  %10415 = vmatprep.mubr.msk.bf16.mxu0 %vm4215_vm5, %v8930_v16  ;;  %v8801_v21 = vmax.f32 %v8769_v34, 0.0  ;;  %v8825_v56 = vsel %vm8805_vm14, %v8822_v55, %v8824_v3  ;;  %v10625_v34 = vld [vmem:[%s10757_s8 + $0x90] sm:$0xff]  ;;  %v10632_v55 = vld [vmem:[%s10757_s8 + $0xc8] sm:$0xff] }
 0x3c4   : > { %v8729_v36 = vpop.f32.mrf.mxu1  ;;  %10416 = vmatmul.mubr.msk.bf16.gmra.mxu0 %vm4215_vm5, %v8931_v12  ;;  %v10635_v3 = vld [vmem:[%s10757_s8 + $0xd0] sm:$0x3] }
 0x3c5   : > { %v8804_v44 = vmax.f32 %v8772_v49, 0.0  ;;  %v8770_v59 = vadd.f32 %v8729_v36, %v8300_v42  ;;  %v8831_v49 = vrot.slane %v10625_v34, 1  ;;  %v10626_v36 = vld [vmem:[%s10757_s8 + $0x98] sm:$0xff] }
 0x3c7   : > { %v8933_v47 = vpack.c.bf16 %v8804_v44, %v8803_v7  ;;  %v8802_v41 = vmax.f32 %v8770_v59, 0.0  ;;  %v8832_v7 = vrot.slane %v10626_v36, 1 }
 0x3c9   : > { %v8932_v45 = vpack.c.bf16 %v8802_v41, %v8801_v21  ;;  %v8833_v15 = vsel %vm8805_vm14, %v8831_v49, %v8832_v7  ;;  %v10637_v49 = vld [vmem:[%s10757_s8 + $0xf0] sm:$0xff] }
 0x3ca   : > { %v8851_v36 = vrot.slane %v10637_v49, 1 }
 0x3cb   : > { %10419 = vmatprep.mubr.msk.bf16.mxu0 %vm4215_vm5, %v8932_v45  ;;  %v10627_v45 = vld [vmem:[%s10757_s8 + $0x78] sm:$0xff] }
 0x3cc   : > { %10420 = vmatmul.mubr.msk.bf16.gmra.mxu0 %vm4215_vm5, %v8933_v47  ;;  %v8820_v47 = vsel %vm8805_vm14, %v8817_v46, %v8819_v50  ;;  %v8826_v35 = vrot.slane %v10627_v45, 1  ;;  %v10634_v46 = vld [vmem:[%s10757_s8 + $0xb0] sm:$0xff]  ;;  %v10636_v50 = vld [vmem:[%s10757_s8 + $0xb8] sm:$0x3] }
 0x454   : > { %v10393_v53 = vpop.f32.mrf.mxu0 }
 0x455   : > { %v9036_v39 = vadd.f32 %v10393_v53, %v13065_v20 }
 0x456   : > { %v9027_v38 = vpop.f32.mrf.mxu0 }
 0x457   : > { %v9156_v52 = vadd.f32 %v9036_v39, %v8813_v51  ;;  %v9028_v29 = vadd.f32 %v13065_v20, %v9027_v38  ;;  %v10629_v51 = vld [vmem:[%s10757_s8 + $0xa0] sm:$0x3] }
 0x458   : > { %v10394_v8 = vpop.f32.mrf.mxu0  ;;  %v8834_v53 = vrot.slane %v10629_v51, 1 }
 0x459   : > { %v9188_v23 = vmax.f32 %v9156_v52, 0.0  ;;  %v9154_v26 = vadd.f32 %v9028_v29, %v8808_v28  ;;  %v9039_v62 = vadd.f32 %v10394_v8, %v13065_v20  ;;  %v8828_v28 = vsel %vm8805_vm14, %v8826_v35, %v8827_v61  ;;  %v10639_v35 = vld [vmem:[%s10757_s8 + $0xd8] sm:$0xff] }
 0x45a   : > { %v9030_v14 = vpop.f32.mrf.mxu0  ;;  %v8835_v8 = vsel %vm8805_vm14, %v8832_v7, %v8834_v53  ;;  %v10638_v7 = vld [vmem:[%s10757_s8 + $0xf8] sm:$0xff]  ;;  %v8846_v57 = vrot.slane %v10639_v35, 1  ;;  %v10641_v53 = vld [vmem:[%s10757_s8 + $0x100] sm:$0x3] }
 0x45b   : > { %9220 = vst.msk [vmem:[%s13079_s30 + $0x10] sm:$0xff] %vm1891_vm1, %v9188_v23  ;;  %v9186_v54 = vmax.f32 %v9154_v26, 0.0  ;;  %v9157_v25 = vadd.f32 %v9039_v62, %v8815_v5  ;;  %v9031_v11 = vadd.f32 %v13065_v20, %v9030_v14  ;;  %v8842_v23 = vrot.slane %v10632_v55, 1 }
 0x45c   : > { %v10397_v4 = vpop.f32.mrf.mxu0  ;;  %v8830_v14 = vsel %vm8805_vm14, %v8827_v61, %v8829_v32  ;;  %v10640_v61 = vld [vmem:[%s10757_s8 + $0xe0] sm:$0xff]  ;;  %v10642_v32 = vld [vmem:[%s10757_s8 + $0xe8] sm:$0x3] }
 0x45d   : > { %9218 = vst.msk [vmem:[%s13079_s30] sm:$0xff] %vm1891_vm1, %v9186_v54  ;;  %v9189_v24 = vmax.f32 %v9157_v25, 0.0  ;;  %v9155_v12 = vadd.f32 %v9031_v11, %v8810_v18  ;;  %v9052_v22 = vadd.f32 %v10397_v4, %v13065_v20  ;;  %v8837_v54 = vrot.slane %v10634_v46, 1 }
 0x45e   : > { %v9043_v48 = vpop.f32.mrf.mxu0  ;;  %v8843_v4 = vsel %vm8805_vm14, %v8841_v1, %v8842_v23  ;;  %v10643_v1 = vld [vmem:[%s10757_s8 + $0x120] sm:$0xff] }
 0x45f   : > { %9221 = vst.msk [vmem:[%s13079_s30 + $0x18] sm:$0xff] %vm1891_vm1, %v9189_v24  ;;  %v9187_v30 = vmax.f32 %v9155_v12, 0.0  ;;  %v9160_v16 = vadd.f32 %v9052_v22, %v8823_v43  ;;  %v9044_v63 = vadd.f32 %v13065_v20, %v9043_v48  ;;  %v8844_v24 = vrot.slane %v10635_v3, 1 }
 0x460   : > { %v10398_v42 = vpop.f32.mrf.mxu0  ;;  %v8838_v48 = vsel %vm8805_vm14, %v8836_v6, %v8837_v54  ;;  %v8861_v55 = vrot.slane %v10643_v1, 1  ;;  %v10645_v6 = vld [vmem:[%s10757_s8 + $0x108] sm:$0xff] }
 0x461   : > { %9219 = vst.msk [vmem:[%s13079_s30 + $0x8] sm:$0xff] %vm1891_vm1, %v9187_v30  ;;  %v9192_v44 = vmax.f32 %v9160_v16, 0.0  ;;  %v9158_v59 = vadd.f32 %v9044_v63, %v8818_v40  ;;  %v9055_v21 = vadd.f32 %v10398_v42, %v13065_v20  ;;  %v8839_v30 = vrot.slane %v10636_v50, 1 }
 0x462   : > { %v9046_v41 = vpop.f32.mrf.mxu0  ;;  %v8845_v42 = vsel %vm8805_vm14, %v8842_v23, %v8844_v24  ;;  %v10644_v23 = vld [vmem:[%s10757_s8 + $0x128] sm:$0xff]  ;;  %v8856_v46 = vrot.slane %v10645_v6, 1  ;;  %v10647_v24 = vld [vmem:[%s10757_s8 + $0x130] sm:$0x3] }
 0x463   : > { %9224 = vst.msk [vmem:[%s13079_s30 + $0x30] sm:$0xff] %vm1891_vm1, %v9192_v44  ;;  %v9190_v37 = vmax.f32 %v9158_v59, 0.0  ;;  %v9161_v60 = vadd.f32 %v9055_v21, %v8825_v56  ;;  %v9047_v19 = vadd.f32 %v13065_v20, %v9046_v41  ;;  %v8852_v44 = vrot.slane %v10638_v7, 1 }
 0x464   : > { %v10401_v13 = vpop.f32.mrf.mxu0  ;;  %v8840_v41 = vsel %vm8805_vm14, %v8837_v54, %v8839_v30  ;;  %v10646_v54 = vld [vmem:[%s10757_s8 + $0x110] sm:$0xff]  ;;  %v10648_v30 = vld [vmem:[%s10757_s8 + $0x118] sm:$0x3] }
 0x465   : > { %9222 = vst.msk [vmem:[%s13079_s30 + $0x20] sm:$0xff] %vm1891_vm1, %v9190_v37  ;;  %v9193_v0 = vmax.f32 %v9161_v60, 0.0  ;;  %v9159_v9 = vadd.f32 %v9047_v19, %v8820_v47  ;;  %v9068_v39 = vadd.f32 %v10401_v13, %v13065_v20  ;;  %v8847_v37 = vrot.slane %v10640_v61, 1 }
 0x466   : > { %v9059_v38 = vpop.f32.mrf.mxu0  ;;  %v8853_v13 = vsel %vm8805_vm14, %v8851_v36, %v8852_v44  ;;  %v10649_v36 = vld [vmem:[%s10757_s8 + $0x150] sm:$0xff] }
 0x467   : > { %9225 = vst.msk [vmem:[%s13079_s30 + $0x38] sm:$0xff] %vm1891_vm1, %v9193_v0  ;;  %v9191_v52 = vmax.f32 %v9159_v9, 0.0  ;;  %v9164_v29 = vadd.f32 %v9068_v39, %v8833_v15  ;;  %v9060_v5 = vadd.f32 %v13065_v20, %v9059_v38  ;;  %v8854_v0 = vrot.slane %v10641_v53, 1 }
 0x468   : > { %v10402_v31 = vpop.f32.mrf.mxu0  ;;  %v8848_v38 = vsel %vm8805_vm14, %v8846_v57, %v8847_v37  ;;  %v8871_v7 = vrot.slane %v10649_v36, 1  ;;  %v10651_v57 = vld [vmem:[%s10757_s8 + $0x138] sm:$0xff] }
 0x469   : > { %9223 = vst.msk [vmem:[%s13079_s30 + $0x28] sm:$0xff] %vm1891_vm1, %v9191_v52  ;;  %v9196_v26 = vmax.f32 %v9164_v29, 0.0  ;;  %v9162_v62 = vadd.f32 %v9060_v5, %v8828_v28  ;;  %v9071_v18 = vadd.f32 %v10402_v31, %v13065_v20  ;;  %v8849_v52 = vrot.slane %v10642_v32, 1 }
 0x46a   : > { %v9062_v10 = vpop.f32.mrf.mxu0  ;;  %v8855_v31 = vsel %vm8805_vm14, %v8852_v44, %v8854_v0  ;;  %v10650_v44 = vld [vmem:[%s10757_s8 + $0x158] sm:$0xff]  ;;  %v8866_v61 = vrot.slane %v10651_v57, 1  ;;  %v10653_v0 = vld [vmem:[%s10757_s8 + $0x160] sm:$0x3] }
 0x46b   : > { %9228 = vst.msk [vmem:[%s13079_s30 + $0x50] sm:$0xff] %vm1891_vm1, %v9196_v26  ;;  %v9194_v25 = vmax.f32 %v9162_v62, 0.0  ;;  %v9165_v11 = vadd.f32 %v9071_v18, %v8835_v8  ;;  %v9063_v43 = vadd.f32 %v13065_v20, %v9062_v10  ;;  %v8862_v26 = vrot.slane %v10644_v23, 1 }
 0x46c   : > { %v10405_v58 = vpop.f32.mrf.mxu0  ;;  %v8850_v10 = vsel %vm8805_vm14, %v8847_v37, %v8849_v52  ;;  %v10652_v37 = vld [vmem:[%s10757_s8 + $0x140] sm:$0xff]  ;;  %v10654_v52 = vld [vmem:[%s10757_s8 + $0x148] sm:$0x3] }
 0x46d   : > { %9226 = vst.msk [vmem:[%s13079_s30 + $0x40] sm:$0xff] %vm1891_vm1, %v9194_v25  ;;  %v9197_v12 = vmax.f32 %v9165_v11, 0.0  ;;  %v9163_v22 = vadd.f32 %v9063_v43, %v8830_v14  ;;  %v9084_v40 = vadd.f32 %v10405_v58, %v13065_v20  ;;  %v8857_v25 = vrot.slane %v10646_v54, 1 }
 0x46e   : > { %v9075_v33 = vpop.f32.mrf.mxu0  ;;  %v8863_v58 = vsel %vm8805_vm14, %v8861_v55, %v8862_v26  ;;  %v10655_v55 = vld [vmem:[%s10757_s8 + $0x180] sm:$0xff] }
 0x46f   : > { %9229 = vst.msk [vmem:[%s13079_s30 + $0x58] sm:$0xff] %vm1891_vm1, %v9197_v12  ;;  %v9195_v16 = vmax.f32 %v9163_v22, 0.0  ;;  %v9168_v63 = vadd.f32 %v9084_v40, %v8843_v4  ;;  %v9076_v56 = vadd.f32 %v13065_v20, %v9075_v33  ;;  %v8864_v12 = vrot.slane %v10647_v24, 1 }
 0x470   : > { %v10406_v34 = vpop.f32.mrf.mxu0  ;;  %v8858_v33 = vsel %vm8805_vm14, %v8856_v46, %v8857_v25  ;;  %v8881_v23 = vrot.slane %v10655_v55, 1  ;;  %v10657_v46 = vld [vmem:[%s10757_s8 + $0x168] sm:$0xff] }
 0x471   : > { %9227 = vst.msk [vmem:[%s13079_s30 + $0x48] sm:$0xff] %vm1891_vm1, %v9195_v16  ;;  %v9200_v59 = vmax.f32 %v9168_v63, 0.0  ;;  %v9166_v21 = vadd.f32 %v9076_v56, %v8838_v48  ;;  %v9087_v47 = vadd.f32 %v10406_v34, %v13065_v20  ;;  %v8859_v16 = vrot.slane %v10648_v30, 1 }
 0x472   : > { %v9078_v45 = vpop.f32.mrf.mxu0  ;;  %v8865_v34 = vsel %vm8805_vm14, %v8862_v26, %v8864_v12  ;;  %v10656_v26 = vld [vmem:[%s10757_s8 + $0x188] sm:$0xff]  ;;  %v8876_v54 = vrot.slane %v10657_v46, 1  ;;  %v10659_v12 = vld [vmem:[%s10757_s8 + $0x190] sm:$0x3] }
 0x473   : > { %9232 = vst.msk [vmem:[%s13079_s30 + $0x70] sm:$0xff] %vm1891_vm1, %v9200_v59  ;;  %v9198_v60 = vmax.f32 %v9166_v21, 0.0  ;;  %v9169_v19 = vadd.f32 %v9087_v47, %v8845_v42  ;;  %v9079_v15 = vadd.f32 %v13065_v20, %v9078_v45  ;;  %v8872_v59 = vrot.slane %v10650_v44, 1 }
 0x474   : > { %v10409_v51 = vpop.f32.mrf.mxu0  ;;  %v8860_v45 = vsel %vm8805_vm14, %v8857_v25, %v8859_v16  ;;  %v10658_v25 = vld [vmem:[%s10757_s8 + $0x170] sm:$0xff]  ;;  %v10660_v16 = vld [vmem:[%s10757_s8 + $0x178] sm:$0x3] }
 0x475   : > { %9230 = vst.msk [vmem:[%s13079_s30 + $0x60] sm:$0xff] %vm1891_vm1, %v9198_v60  ;;  %v9201_v9 = vmax.f32 %v9169_v19, 0.0  ;;  %v9167_v39 = vadd.f32 %v9079_v15, %v8840_v41  ;;  %v9100_v28 = vadd.f32 %v10409_v51, %v13065_v20  ;;  %v8867_v60 = vrot.slane %v10652_v37, 1 }
 0x476   : > { %v9091_v27 = vpop.f32.mrf.mxu0  ;;  %v8873_v51 = vsel %vm8805_vm14, %v8871_v7, %v8872_v59 }
 0x477   : > { %9233 = vst.msk [vmem:[%s13079_s30 + $0x78] sm:$0xff] %vm1891_vm1, %v9201_v9  ;;  %v9199_v29 = vmax.f32 %v9167_v39, 0.0  ;;  %v9172_v5 = vadd.f32 %v9100_v28, %v8853_v13  ;;  %v9092_v8 = vadd.f32 %v13065_v20, %v9091_v27  ;;  %v8874_v9 = vrot.slane %v10653_v0, 1 }
 0x478   : > { %v10410_v17 = vpop.f32.mrf.mxu0  ;;  %v8868_v27 = vsel %vm8805_vm14, %v8866_v61, %v8867_v60 }
 0x479   : > { %9231 = vst.msk [vmem:[%s13079_s30 + $0x68] sm:$0xff] %vm1891_vm1, %v9199_v29  ;;  %v9204_v62 = vmax.f32 %v9172_v5, 0.0  ;;  %v9170_v18 = vadd.f32 %v9092_v8, %v8848_v38  ;;  %v9103_v14 = vadd.f32 %v10410_v17, %v13065_v20  ;;  %v8869_v29 = vrot.slane %v10654_v52, 1 }
 0x47a   : > { %v9094_v2 = vpop.f32.mrf.mxu0  ;;  %v8875_v17 = vsel %vm8805_vm14, %v8872_v59, %v8874_v9 }
 0x47b   : > { %9236 = vst.msk [vmem:[%s13079_s30 + $0x90] sm:$0xff] %vm1891_vm1, %v9204_v62  ;;  %v9202_v11 = vmax.f32 %v9170_v18, 0.0  ;;  %v9173_v43 = vadd.f32 %v9103_v14, %v8855_v31  ;;  %v9095_v4 = vadd.f32 %v13065_v20, %v9094_v2  ;;  %v8882_v62 = vrot.slane %v10656_v26, 1 }
 0x47c   : > { %v10413_v3 = vpop.f32.mrf.mxu0  ;;  %v8870_v2 = vsel %vm8805_vm14, %v8867_v60, %v8869_v29 }
 0x47d   : > { %9234 = vst.msk [vmem:[%s13079_s30 + $0x80] sm:$0xff] %vm1891_vm1, %v9202_v11  ;;  %v9205_v22 = vmax.f32 %v9173_v43, 0.0  ;;  %v9171_v40 = vadd.f32 %v9095_v4, %v8850_v10  ;;  %v9116_v48 = vadd.f32 %v10413_v3, %v13065_v20  ;;  %v8877_v11 = vrot.slane %v10658_v25, 1 }
 0x47e   : > { %v9107_v50 = vpop.f32.mrf.mxu0  ;;  %v8883_v3 = vsel %vm8805_vm14, %v8881_v23, %v8882_v62 }
 0x47f   : > { %9237 = vst.msk [vmem:[%s13079_s30 + $0x98] sm:$0xff] %vm1891_vm1, %v9205_v22  ;;  %v9203_v63 = vmax.f32 %v9171_v40, 0.0  ;;  %v9176_v56 = vadd.f32 %v9116_v48, %v8863_v58  ;;  %v9108_v42 = vadd.f32 %v13065_v20, %v9107_v50  ;;  %v8884_v22 = vrot.slane %v10659_v12, 1 }
 0x480   : > { %v10414_v49 = vpop.f32.mrf.mxu0  ;;  %v8878_v50 = vsel %vm8805_vm14, %v8876_v54, %v8877_v11 }
 0x481   : > { %9235 = vst.msk [vmem:[%s13079_s30 + $0x88] sm:$0xff] %vm1891_vm1, %v9203_v63  ;;  %v9208_v21 = vmax.f32 %v9176_v56, 0.0  ;;  %v9174_v47 = vadd.f32 %v9108_v42, %v8858_v33  ;;  %v9119_v41 = vadd.f32 %v10414_v49, %v13065_v20  ;;  %v8879_v63 = vrot.slane %v10660_v16, 1 }
 0x482   : > { %v9110_v35 = vpop.f32.mrf.mxu0  ;;  %v8885_v49 = vsel %vm8805_vm14, %v8882_v62, %v8884_v22 }
 0x483   : > { %9240 = vst.msk [vmem:[%s13079_s30 + $0xb0] sm:$0xff] %vm1891_vm1, %v9208_v21  ;;  %v9206_v19 = vmax.f32 %v9174_v47, 0.0  ;;  %v9177_v15 = vadd.f32 %v9119_v41, %v8865_v34  ;;  %v9111_v13 = vadd.f32 %v13065_v20, %v9110_v35  ;;  %v8880_v21 = vsel %vm8805_vm14, %v8877_v11, %v8879_v63 }
 0x484   : > { %v10417_v53 = vpop.f32.mrf.mxu0 }
 0x485   : > { %9238 = vst.msk [vmem:[%s13079_s30 + $0xa0] sm:$0xff] %vm1891_vm1, %v9206_v19  ;;  %v9209_v39 = vmax.f32 %v9177_v15, 0.0  ;;  %v9175_v28 = vadd.f32 %v9111_v13, %v8860_v45  ;;  %v9132_v38 = vadd.f32 %v10417_v53, %v13065_v20 }
 0x486   : > { %v9123_v32 = vpop.f32.mrf.mxu0 }
 0x487   : > { %9241 = vst.msk [vmem:[%s13079_s30 + $0xb8] sm:$0xff] %vm1891_vm1, %v9209_v39  ;;  %v9207_v5 = vmax.f32 %v9175_v28, 0.0  ;;  %v9180_v8 = vadd.f32 %v9132_v38, %v8873_v51  ;;  %v9124_v31 = vadd.f32 %v13065_v20, %v9123_v32 }
 0x488   : > { %v10418_v1 = vpop.f32.mrf.mxu0 }
 0x489   : > { %9239 = vst.msk [vmem:[%s13079_s30 + $0xa8] sm:$0xff] %vm1891_vm1, %v9207_v5  ;;  %v9212_v18 = vmax.f32 %v9180_v8, 0.0  ;;  %v9178_v14 = vadd.f32 %v9124_v31, %v8868_v27  ;;  %v9135_v10 = vadd.f32 %v10418_v1, %v13065_v20 }
 0x48a   : > { %v9126_v6 = vpop.f32.mrf.mxu0 }
 0x48b   : > { %9244 = vst.msk [vmem:[%s13079_s30 + $0xd0] sm:$0xff] %vm1891_vm1, %v9212_v18  ;;  %v9210_v43 = vmax.f32 %v9178_v14, 0.0  ;;  %v9181_v4 = vadd.f32 %v9135_v10, %v8875_v17  ;;  %v9127_v58 = vadd.f32 %v13065_v20, %v9126_v6 }
 0x48c   : > { %v10421_v24 = vpop.f32.mrf.mxu0 }
 0x48d   : > { %9242 = vst.msk [vmem:[%s13079_s30 + $0xc0] sm:$0xff] %vm1891_vm1, %v9210_v43  ;;  %v9213_v40 = vmax.f32 %v9181_v4, 0.0  ;;  %v9179_v48 = vadd.f32 %v9127_v58, %v8870_v2  ;;  %v9148_v33 = vadd.f32 %v10421_v24, %v13065_v20 }
 0x48e   : > { %v9139_v30 = vpop.f32.mrf.mxu0 }
 0x48f   : > { %9245 = vst.msk [vmem:[%s13079_s30 + $0xd8] sm:$0xff] %vm1891_vm1, %v9213_v40  ;;  %v9211_v56 = vmax.f32 %v9179_v48, 0.0  ;;  %v9184_v42 = vadd.f32 %v9148_v33, %v8883_v3  ;;  %v9140_v34 = vadd.f32 %v13065_v20, %v9139_v30 }
 0x490   : > { %v10422_v36 = vpop.f32.mrf.mxu0 }
 0x491   : > { %9243 = vst.msk [vmem:[%s13079_s30 + $0xc8] sm:$0xff] %vm1891_vm1, %v9211_v56  ;;  %v9216_v7 = vmax.f32 %v9184_v42, 0.0  ;;  %v9182_v44 = vadd.f32 %v9140_v34, %v8878_v50  ;;  %v9151_v59 = vadd.f32 %v10422_v36, %v13065_v20 }
 0x492   : > { %v9142_v47 = vpop.f32.mrf.mxu0 }
 0x493   : > { %9248 = vst.msk [vmem:[%s13079_s30 + $0xf0] sm:$0xff] %vm1891_vm1, %v9216_v7  ;;  %v9214_v41 = vmax.f32 %v9182_v44, 0.0  ;;  %v9185_v45 = vadd.f32 %v9151_v59, %v8885_v49  ;;  %v9143_v35 = vadd.f32 %v13065_v20, %v9142_v47 }
 0x495   : > { %9246 = vst.msk [vmem:[%s13079_s30 + $0xe0] sm:$0xff] %vm1891_vm1, %v9214_v41  ;;  %v9217_v57 = vmax.f32 %v9185_v45, 0.0  ;;  %v9183_v61 = vadd.f32 %v9143_v35, %v8880_v21 }
 0x497   : > { %9249 = vst.msk [vmem:[%s13079_s30 + $0xf8] sm:$0xff] %vm1891_vm1, %v9217_v57  ;;  %v9215_v37 = vmax.f32 %v9183_v61, 0.0 }
 0x499   : > { %9247 = vst.msk [vmem:[%s13079_s30 + $0xe8] sm:$0xff] %vm1891_vm1, %v9215_v37 }
 0x49a PF: > { %s17_s24 = sadd.s32 1, %s10683_s24  }
 0x49b   : > { %p14_p4 = scmp.ge.s32.totalorder %s17_s24, 4  }
 0x49d   :  { %16 = sbr.rel (!%p14_p4) target bundleno = 1 (0x1), region = 88 }

</bundles_post_ra>
